<compile_context>
chip_gen: v7x
topology: tpu7x:2x2x1
jax: 0.10.0
libtpu: 0.0.40
codegen_flags: <defaults>
</compile_context>

<pallas_src>
from functools import partial

import numpy as np
import jax
import jax.numpy as jnp
from jax.experimental import pallas as pl
from jax.experimental.pallas import tpu as pltpu


# ---------------------------------------------------------------------------
# Fused Bottleneck kernel (one grid step == one image)
# ---------------------------------------------------------------------------
def _bottleneck_kernel(x_ref, w1_ref, b1_ref, w2_ref, b2_ref, w3_ref, b3_ref,
                       *rest, H, W, Ho, Wo, stride, has_proj):
    if has_proj:
        ws_ref, bs_ref, o_ref = rest
    else:
        (o_ref,) = rest

    cd = x_ref.dtype                       # MXU input (compute) dtype
    xpad = x_ref[0]                        # (Hp, Wpad, Cin_p), zero halo
    Hp, Wpad, Cin_p = xpad.shape
    P_p = w1_ref.shape[1]
    C4_p = w3_ref.shape[1]

    # ---- conv1 (1x1) + bn1 + relu over the spatially padded frame ----------
    h1 = jnp.dot(xpad.reshape(Hp * Wpad, Cin_p), w1_ref[...],
                 preferred_element_type=jnp.float32)
    h1 = jnp.maximum(h1 + b1_ref[...], 0.0).reshape(Hp, Wpad, P_p)
    # Zero the halo pixels so they act as conv2's `padding=1` zeros.
    row = jax.lax.broadcasted_iota(jnp.int32, (Hp, Wpad, P_p), 0)
    col = jax.lax.broadcasted_iota(jnp.int32, (Hp, Wpad, P_p), 1)
    interior = (row >= 1) & (row <= H) & (col >= 1) & (col <= W)
    h1 = jnp.where(interior, h1, 0.0).astype(cd)

    # ---- conv2 (3x3, stride, pad=1) + bn2 + relu: nine shifted matmuls -----
    acc = jnp.zeros((Ho * Wo, P_p), jnp.float32)
    for dh in range(3):
        for dw in range(3):
            if stride == 1:
                win = h1[dh:dh + Ho, dw:dw + Wo, :]
            else:  # only traced when stride > 1
                win = h1[dh:dh + stride * (Ho - 1) + 1:stride,
                         dw:dw + stride * (Wo - 1) + 1:stride, :]
            acc = acc + jnp.dot(win.reshape(Ho * Wo, P_p),
                                w2_ref[dh * 3 + dw],
                                preferred_element_type=jnp.float32)
    h2 = jnp.maximum(acc + b2_ref[...], 0.0).astype(cd)

    # ---- conv3 (1x1) + bn3 --------------------------------------------------
    out = jnp.dot(h2, w3_ref[...], preferred_element_type=jnp.float32)
    out = out + b3_ref[...]

    # ---- shortcut, fused ----------------------------------------------------
    if stride == 1:
        x_in = xpad[1:H + 1, 1:W + 1, :]
    else:  # only traced when stride > 1
        x_in = xpad[1:1 + stride * (Ho - 1) + 1:stride,
                    1:1 + stride * (Wo - 1) + 1:stride, :]
    x_in = x_in.reshape(Ho * Wo, Cin_p)
    if has_proj:
        sc = jnp.dot(x_in, ws_ref[...], preferred_element_type=jnp.float32)
        sc = sc + bs_ref[...]
    else:
        sc = x_in.astype(jnp.float32)

    o_ref[0] = jnp.maximum(out + sc, 0.0).reshape(Ho, Wo, C4_p).astype(o_ref.dtype)


# ---------------------------------------------------------------------------
# Weight / BN preparation (fold scale into weight columns, pad channels)
# ---------------------------------------------------------------------------
def _round_up(x, m):
    return ((x + m - 1) // m) * m


def _fold_bn(gamma, beta, mean, var, eps=1e-5):
    scale = gamma * jax.lax.rsqrt(var + eps)
    return scale, beta - mean * scale


def _prep_1x1(w_oihw, scale, cin_p, cout_p, dtype):
    """(Cout, Cin, 1, 1) -> (Cin_p, Cout_p), BN scale folded into columns."""
    w = jnp.transpose(w_oihw[:, :, 0, 0], (1, 0)) * scale[None, :]
    w = jnp.pad(w, ((0, cin_p - w.shape[0]), (0, cout_p - w.shape[1])))
    return w.astype(dtype)


def _prep_3x3(w_oihw, scale, cin_p, cout_p, dtype):
    """(Cout, Cin, 3, 3) -> (9, Cin_p, Cout_p), tap-major (dh, dw)."""
    w = jnp.transpose(w_oihw, (2, 3, 1, 0)) * scale[None, None, None, :]
    w = jnp.pad(w, ((0, 0), (0, 0),
                    (0, cin_p - w.shape[2]), (0, cout_p - w.shape[3])))
    return w.reshape(9, cin_p, cout_p).astype(dtype)


def _prep_bias(bias, cout_p):
    return jnp.pad(bias, (0, cout_p - bias.shape[0])).reshape(1, cout_p).astype(jnp.float32)


# ---------------------------------------------------------------------------
# Bottleneck forward (single fused pallas_call)
# ---------------------------------------------------------------------------
def bottleneck_forward(x_nhwc, p, *, stride, compute_dtype=jnp.bfloat16):
    N, H, W, Cin = x_nhwc.shape
    planes = p["w1"].shape[0]
    C4 = 4 * planes

    LANE = 128
    Cin_p = _round_up(Cin, LANE)
    P_p = _round_up(planes, LANE)
    C4_p = _round_up(C4, LANE)

    Ho = (H + 2 - 3) // stride + 1
    Wo = (W + 2 - 3) // stride + 1
    has_proj = (stride != 1) or (Cin != C4)

    s1, b1 = _fold_bn(p["g1"], p["be1"], p["m1"], p["v1"])
    s2, b2 = _fold_bn(p["g2"], p["be2"], p["m2"], p["v2"])
    s3, b3 = _fold_bn(p["g3"], p["be3"], p["m3"], p["v3"])

    w1 = _prep_1x1(p["w1"], s1, Cin_p, P_p, compute_dtype)
    w2 = _prep_3x3(p["w2"], s2, P_p, P_p, compute_dtype)
    w3 = _prep_1x1(p["w3"], s3, P_p, C4_p, compute_dtype)
    b1p, b2p, b3p = _prep_bias(b1, P_p), _prep_bias(b2, P_p), _prep_bias(b3, C4_p)

    # Single zero-pad of the raw input: spatial halo for conv2 (pad=1) plus
    # lane-dense channel padding.  W is also rounded to a multiple of 8 so the
    # in-kernel (Hp, Wpad, C) <-> (Hp*Wpad, C) reshapes are layout-friendly.
    Hp = H + 2
    Wpad = _round_up(W + 2, 8)
    xp = jnp.pad(x_nhwc.astype(compute_dtype),
                 ((0, 0), (1, 1), (1, Wpad - W - 1), (0, Cin_p - Cin)))

    args = [xp, w1, b1p, w2, b2p, w3, b3p]
    in_specs = [
        pl.BlockSpec((1, Hp, Wpad, Cin_p), lambda n: (n, 0, 0, 0)),
        pl.BlockSpec((Cin_p, P_p), lambda n: (0, 0)),
        pl.BlockSpec((1, P_p), lambda n: (0, 0)),
        pl.BlockSpec((9, P_p, P_p), lambda n: (0, 0, 0)),
        pl.BlockSpec((1, P_p), lambda n: (0, 0)),
        pl.BlockSpec((P_p, C4_p), lambda n: (0, 0)),
        pl.BlockSpec((1, C4_p), lambda n: (0, 0)),
    ]
    if has_proj:
        ss, bs = _fold_bn(p["gs"], p["bes"], p["ms"], p["vs"])
        args += [_prep_1x1(p["ws"], ss, Cin_p, C4_p, compute_dtype),
                 _prep_bias(bs, C4_p)]
        in_specs += [pl.BlockSpec((Cin_p, C4_p), lambda n: (0, 0)),
                     pl.BlockSpec((1, C4_p), lambda n: (0, 0))]

    flops = 2 * N * (Hp * Wpad * Cin_p * P_p
                     + 9 * Ho * Wo * P_p * P_p
                     + Ho * Wo * P_p * C4_p
                     + (Ho * Wo * Cin_p * C4_p if has_proj else 0))
    bytes_accessed = sum(int(np.prod(a.shape)) * a.dtype.itemsize for a in args)
    bytes_accessed += N * Ho * Wo * C4_p * 4

    kern = partial(_bottleneck_kernel, H=H, W=W, Ho=Ho, Wo=Wo,
                   stride=stride, has_proj=has_proj)

    out = pl.pallas_call(
        kern,
        out_shape=jax.ShapeDtypeStruct((N, Ho, Wo, C4_p), jnp.float32),
        grid=(N,),
        in_specs=in_specs,
        out_specs=pl.BlockSpec((1, Ho, Wo, C4_p), lambda n: (n, 0, 0, 0)),
        compiler_params=pltpu.CompilerParams(
            dimension_semantics=("parallel",),
            vmem_limit_bytes=32 * 1024 * 1024),
        cost_estimate=pl.CostEstimate(flops=flops, transcendentals=0,
                                      bytes_accessed=bytes_accessed),
    )(*args)

    # Strip the lane padding of the output channels (single small slice).
    return out[..., :C4]


# ---------------------------------------------------------------------------
# Pure-JAX reference (inference-mode BN, same semantics as the PyTorch module)
# ---------------------------------------------------------------------------
def bottleneck_reference(x_nhwc, p, stride):
    hi = jax.lax.Precision.HIGHEST

    def conv(x, w_oihw, s, pad):
        w = jnp.transpose(w_oihw, (2, 3, 1, 0))  # HWIO
        return jax.lax.conv_general_dilated(
            x, w, (s, s), [(pad, pad), (pad, pad)],
            dimension_numbers=("NHWC", "HWIO", "NHWC"), precision=hi)

    def bn(x, g, be, m, v, eps=1e-5):
        return (x - m) / jnp.sqrt(v + eps) * g + be

    planes = p["w1"].shape[0]
    out = jax.nn.relu(bn(conv(x_nhwc, p["w1"], 1, 0), p["g1"], p["be1"], p["m1"], p["v1"]))
    out = jax.nn.relu(bn(conv(out, p["w2"], stride, 1), p["g2"], p["be2"], p["m2"], p["v2"]))
    out = bn(conv(out, p["w3"], 1, 0), p["g3"], p["be3"], p["m3"], p["v3"])
    if stride != 1 or x_nhwc.shape[-1] != 4 * planes:
        sc = bn(conv(x_nhwc, p["ws"], stride, 0), p["gs"], p["bes"], p["ms"], p["vs"])
    else:
        sc = x_nhwc
    return jax.nn.relu(out + sc)


# ---------------------------------------------------------------------------
def make_params(key, in_planes, planes):
    expansion = 4
    ks = jax.random.split(key, 8)
    f32 = jnp.float32

    def bn_params(k, c):
        k1, k2, k3, k4 = jax.random.split(k, 4)
        return (jax.random.uniform(k1, (c,), f32, 0.5, 1.5),     # gamma
                jax.random.normal(k2, (c,), f32) * 0.1,          # beta
                jax.random.normal(k3, (c,), f32) * 0.1,          # running_mean
                jax.random.uniform(k4, (c,), f32, 0.5, 1.5))     # running_var

    p = {}
    p["w1"] = jax.random.normal(ks[0], (planes, in_planes, 1, 1), f32) * 0.3
    p["w2"] = jax.random.normal(ks[1], (planes, planes, 3, 3), f32) * 0.1
    p["w3"] = jax.random.normal(ks[2], (expansion * planes, planes, 1, 1), f32) * 0.3
    p["ws"] = jax.random.normal(ks[3], (expansion * planes, in_planes, 1, 1), f32) * 0.3
    p["g1"], p["be1"], p["m1"], p["v1"] = bn_params(ks[4], planes)
    p["g2"], p["be2"], p["m2"], p["v2"] = bn_params(ks[5], planes)
    p["g3"], p["be3"], p["m3"], p["v3"] = bn_params(ks[6], expansion * planes)
    p["gs"], p["bes"], p["ms"], p["vs"] = bn_params(ks[7], expansion * planes)
    return p


if __name__ == "__main__":
    key = jax.random.PRNGKey(0)
    kx, kp = jax.random.split(key)

    N, in_planes, H, W = 2, 4, 16, 16
    planes, stride = 4, 1  # projection shortcut triggered (4 != 4*planes)

    x_nchw = jax.random.normal(kx, (N, in_planes, H, W), jnp.float32)
    x_nhwc = jnp.transpose(x_nchw, (0, 2, 3, 1))  # NCHW -> NHWC

    params = make_params(kp, in_planes, planes)

    ref = jax.block_until_ready(bottleneck_reference(x_nhwc, params, stride))

    fwd = jax.jit(bottleneck_forward, static_argnames=("stride", "compute_dtype"))

    # f32 compute path (structural check, moderate tolerance).
    out_f32 = jax.block_until_ready(
        fwd(x_nhwc, params, stride=stride, compute_dtype=jnp.float32))
    np.testing.assert_allclose(np.asarray(out_f32), np.asarray(ref),
                               rtol=2e-2, atol=2e-2)

    # bf16 compute path (the performance-recommended configuration).
    out_bf16 = jax.block_until_ready(
        fwd(x_nhwc, params, stride=stride, compute_dtype=jnp.bfloat16))
    np.testing.assert_allclose(np.asarray(out_bf16), np.asarray(ref),
                               rtol=1e-1, atol=1e-1)

    print("KERNEL_OK")
</pallas_src>

<mosaic_0001>
module attributes {stable_mosaic.version = 11 : i64} {
  func.func @_bottleneck_kernel(%arg0: i32, %arg1: memref<1x18x24x128xf32, #tpu.memory_space<vmem>>, %arg2: memref<128x128xf32, #tpu.memory_space<vmem>>, %arg3: memref<1x128xf32, #tpu.memory_space<vmem>>, %arg4: memref<9x128x128xf32, #tpu.memory_space<vmem>>, %arg5: memref<1x128xf32, #tpu.memory_space<vmem>>, %arg6: memref<128x128xf32, #tpu.memory_space<vmem>>, %arg7: memref<1x128xf32, #tpu.memory_space<vmem>>, %arg8: memref<128x128xf32, #tpu.memory_space<vmem>>, %arg9: memref<1x128xf32, #tpu.memory_space<vmem>>, %arg10: memref<1x16x16x128xf32, #tpu.memory_space<vmem>>) attributes {dimension_semantics = [#tpu.dimension_semantics<parallel>], iteration_bounds = array<i64: 2>, scalar_prefetch = 0 : i64, scratch_operands = 0 : i64, tpu.core_type = #tpu.core_type<tc>, window_params = [{transform_indices = @transform_0, window_bounds = array<i64: 1, 18, 24, 128>}, {pipeline_mode = #tpu.pipeline_mode<synchronous>, transform_indices = @transform_1, window_bounds = array<i64: 128, 128>}, {pipeline_mode = #tpu.pipeline_mode<synchronous>, transform_indices = @transform_2, window_bounds = array<i64: 1, 128>}, {pipeline_mode = #tpu.pipeline_mode<synchronous>, transform_indices = @transform_3, window_bounds = array<i64: 9, 128, 128>}, {pipeline_mode = #tpu.pipeline_mode<synchronous>, transform_indices = @transform_4, window_bounds = array<i64: 1, 128>}, {pipeline_mode = #tpu.pipeline_mode<synchronous>, transform_indices = @transform_5, window_bounds = array<i64: 128, 128>}, {pipeline_mode = #tpu.pipeline_mode<synchronous>, transform_indices = @transform_6, window_bounds = array<i64: 1, 128>}, {pipeline_mode = #tpu.pipeline_mode<synchronous>, transform_indices = @transform_7, window_bounds = array<i64: 128, 128>}, {pipeline_mode = #tpu.pipeline_mode<synchronous>, transform_indices = @transform_8, window_bounds = array<i64: 1, 128>}, {transform_indices = @transform_9, window_bounds = array<i64: 1, 16, 16, 128>}]} {
    %c0 = arith.constant 0 : index
    %c0_0 = arith.constant 0 : index
    %c0_1 = arith.constant 0 : index
    %c0_2 = arith.constant 0 : index
    %0 = vector.load %arg1[%c0, %c0_0, %c0_1, %c0_2] : memref<1x18x24x128xf32, #tpu.memory_space<vmem>>, vector<1x18x24x128xf32>
    %1 = vector.shape_cast %0 : vector<1x18x24x128xf32> to vector<18x24x128xf32>
    %2 = vector.shape_cast %1 : vector<18x24x128xf32> to vector<432x128xf32>
    %c0_3 = arith.constant 0 : index
    %c0_4 = arith.constant 0 : index
    %3 = vector.load %arg2[%c0_3, %c0_4] : memref<128x128xf32, #tpu.memory_space<vmem>>, vector<128x128xf32>
    %cst = arith.constant dense<0.000000e+00> : vector<432x128xf32>
    %4 = tpu.matmul %2, %3, %cst {dimension_numbers = #tpu.dot_dimension_numbers<[1], [0], [0], [1], [0, 0, 1, 1], [], []>} : vector<432x128xf32>, vector<128x128xf32>, vector<432x128xf32> -> vector<432x128xf32>
    %c0_5 = arith.constant 0 : index
    %c0_6 = arith.constant 0 : index
    %5 = vector.load %arg3[%c0_5, %c0_6] : memref<1x128xf32, #tpu.memory_space<vmem>>, vector<1x128xf32>
    %6 = vector.broadcast %5 : vector<1x128xf32> to vector<432x128xf32>
    %7 = arith.addf %4, %6 : vector<432x128xf32>
    %cst_7 = arith.constant 0.000000e+00 : f32
    %8 = vector.broadcast %cst_7 : f32 to vector<432x128xf32>
    %9 = arith.maximumf %7, %8 : vector<432x128xf32>
    %10 = vector.shape_cast %9 : vector<432x128xf32> to vector<18x24x128xf32>
    %11 = tpu.iota {dimensions = array<i32: 0>} : vector<18x24x128xi32>
    %12 = tpu.iota {dimensions = array<i32: 1>} : vector<18x24x128xi32>
    %c1_i32 = arith.constant 1 : i32
    %13 = vector.broadcast %c1_i32 : i32 to vector<18x24x128xi32>
    %14 = arith.cmpi sge, %11, %13 : vector<18x24x128xi32>
    %c16_i32 = arith.constant 16 : i32
    %15 = vector.broadcast %c16_i32 : i32 to vector<18x24x128xi32>
    %16 = arith.cmpi sle, %11, %15 : vector<18x24x128xi32>
    %17 = arith.andi %14, %16 : vector<18x24x128xi1>
    %c1_i32_8 = arith.constant 1 : i32
    %18 = vector.broadcast %c1_i32_8 : i32 to vector<18x24x128xi32>
    %19 = arith.cmpi sge, %12, %18 : vector<18x24x128xi32>
    %20 = arith.andi %17, %19 : vector<18x24x128xi1>
    %c16_i32_9 = arith.constant 16 : i32
    %21 = vector.broadcast %c16_i32_9 : i32 to vector<18x24x128xi32>
    %22 = arith.cmpi sle, %12, %21 : vector<18x24x128xi32>
    %23 = arith.andi %20, %22 : vector<18x24x128xi1>
    %cst_10 = arith.constant 0.000000e+00 : f32
    %24 = vector.broadcast %cst_10 : f32 to vector<18x24x128xf32>
    %25 = arith.select %23, %10, %24 : vector<18x24x128xi1>, vector<18x24x128xf32>
    %cst_11 = arith.constant 0.000000e+00 : f32
    %26 = vector.broadcast %cst_11 : f32 to vector<256x128xf32>
    %27 = vector.extract_strided_slice %25 {offsets = [0, 0, 0], sizes = [16, 16, 128], strides = [1, 1, 1]} : vector<18x24x128xf32> to vector<16x16x128xf32>
    %28 = vector.shape_cast %27 : vector<16x16x128xf32> to vector<256x128xf32>
    %c0_12 = arith.constant 0 : index
    %c0_13 = arith.constant 0 : index
    %c0_14 = arith.constant 0 : index
    %29 = vector.load %arg4[%c0_12, %c0_13, %c0_14] : memref<9x128x128xf32, #tpu.memory_space<vmem>>, vector<1x128x128xf32>
    %30 = vector.shape_cast %29 : vector<1x128x128xf32> to vector<128x128xf32>
    %cst_15 = arith.constant dense<0.000000e+00> : vector<256x128xf32>
    %31 = tpu.matmul %28, %30, %cst_15 {dimension_numbers = #tpu.dot_dimension_numbers<[1], [0], [0], [1], [0, 0, 1, 1], [], []>} : vector<256x128xf32>, vector<128x128xf32>, vector<256x128xf32> -> vector<256x128xf32>
    %32 = arith.addf %26, %31 : vector<256x128xf32>
    %33 = vector.extract_strided_slice %25 {offsets = [0, 1, 0], sizes = [16, 16, 128], strides = [1, 1, 1]} : vector<18x24x128xf32> to vector<16x16x128xf32>
    %34 = vector.shape_cast %33 : vector<16x16x128xf32> to vector<256x128xf32>
    %c1 = arith.constant 1 : index
    %c0_16 = arith.constant 0 : index
    %c0_17 = arith.constant 0 : index
    %35 = vector.load %arg4[%c1, %c0_16, %c0_17] : memref<9x128x128xf32, #tpu.memory_space<vmem>>, vector<1x128x128xf32>
    %36 = vector.shape_cast %35 : vector<1x128x128xf32> to vector<128x128xf32>
    %cst_18 = arith.constant dense<0.000000e+00> : vector<256x128xf32>
    %37 = tpu.matmul %34, %36, %cst_18 {dimension_numbers = #tpu.dot_dimension_numbers<[1], [0], [0], [1], [0, 0, 1, 1], [], []>} : vector<256x128xf32>, vector<128x128xf32>, vector<256x128xf32> -> vector<256x128xf32>
    %38 = arith.addf %32, %37 : vector<256x128xf32>
    %39 = vector.extract_strided_slice %25 {offsets = [0, 2, 0], sizes = [16, 16, 128], strides = [1, 1, 1]} : vector<18x24x128xf32> to vector<16x16x128xf32>
    %40 = vector.shape_cast %39 : vector<16x16x128xf32> to vector<256x128xf32>
    %c2 = arith.constant 2 : index
    %c0_19 = arith.constant 0 : index
    %c0_20 = arith.constant 0 : index
    %41 = vector.load %arg4[%c2, %c0_19, %c0_20] : memref<9x128x128xf32, #tpu.memory_space<vmem>>, vector<1x128x128xf32>
    %42 = vector.shape_cast %41 : vector<1x128x128xf32> to vector<128x128xf32>
    %cst_21 = arith.constant dense<0.000000e+00> : vector<256x128xf32>
    %43 = tpu.matmul %40, %42, %cst_21 {dimension_numbers = #tpu.dot_dimension_numbers<[1], [0], [0], [1], [0, 0, 1, 1], [], []>} : vector<256x128xf32>, vector<128x128xf32>, vector<256x128xf32> -> vector<256x128xf32>
    %44 = arith.addf %38, %43 : vector<256x128xf32>
    %45 = vector.extract_strided_slice %25 {offsets = [1, 0, 0], sizes = [16, 16, 128], strides = [1, 1, 1]} : vector<18x24x128xf32> to vector<16x16x128xf32>
    %46 = vector.shape_cast %45 : vector<16x16x128xf32> to vector<256x128xf32>
    %c3 = arith.constant 3 : index
    %c0_22 = arith.constant 0 : index
    %c0_23 = arith.constant 0 : index
    %47 = vector.load %arg4[%c3, %c0_22, %c0_23] : memref<9x128x128xf32, #tpu.memory_space<vmem>>, vector<1x128x128xf32>
    %48 = vector.shape_cast %47 : vector<1x128x128xf32> to vector<128x128xf32>
    %cst_24 = arith.constant dense<0.000000e+00> : vector<256x128xf32>
    %49 = tpu.matmul %46, %48, %cst_24 {dimension_numbers = #tpu.dot_dimension_numbers<[1], [0], [0], [1], [0, 0, 1, 1], [], []>} : vector<256x128xf32>, vector<128x128xf32>, vector<256x128xf32> -> vector<256x128xf32>
    %50 = arith.addf %44, %49 : vector<256x128xf32>
    %51 = vector.extract_strided_slice %25 {offsets = [1, 1, 0], sizes = [16, 16, 128], strides = [1, 1, 1]} : vector<18x24x128xf32> to vector<16x16x128xf32>
    %52 = vector.shape_cast %51 : vector<16x16x128xf32> to vector<256x128xf32>
    %c4 = arith.constant 4 : index
    %c0_25 = arith.constant 0 : index
    %c0_26 = arith.constant 0 : index
    %53 = vector.load %arg4[%c4, %c0_25, %c0_26] : memref<9x128x128xf32, #tpu.memory_space<vmem>>, vector<1x128x128xf32>
    %54 = vector.shape_cast %53 : vector<1x128x128xf32> to vector<128x128xf32>
    %cst_27 = arith.constant dense<0.000000e+00> : vector<256x128xf32>
    %55 = tpu.matmul %52, %54, %cst_27 {dimension_numbers = #tpu.dot_dimension_numbers<[1], [0], [0], [1], [0, 0, 1, 1], [], []>} : vector<256x128xf32>, vector<128x128xf32>, vector<256x128xf32> -> vector<256x128xf32>
    %56 = arith.addf %50, %55 : vector<256x128xf32>
    %57 = vector.extract_strided_slice %25 {offsets = [1, 2, 0], sizes = [16, 16, 128], strides = [1, 1, 1]} : vector<18x24x128xf32> to vector<16x16x128xf32>
    %58 = vector.shape_cast %57 : vector<16x16x128xf32> to vector<256x128xf32>
    %c5 = arith.constant 5 : index
    %c0_28 = arith.constant 0 : index
    %c0_29 = arith.constant 0 : index
    %59 = vector.load %arg4[%c5, %c0_28, %c0_29] : memref<9x128x128xf32, #tpu.memory_space<vmem>>, vector<1x128x128xf32>
    %60 = vector.shape_cast %59 : vector<1x128x128xf32> to vector<128x128xf32>
    %cst_30 = arith.constant dense<0.000000e+00> : vector<256x128xf32>
    %61 = tpu.matmul %58, %60, %cst_30 {dimension_numbers = #tpu.dot_dimension_numbers<[1], [0], [0], [1], [0, 0, 1, 1], [], []>} : vector<256x128xf32>, vector<128x128xf32>, vector<256x128xf32> -> vector<256x128xf32>
    %62 = arith.addf %56, %61 : vector<256x128xf32>
    %63 = vector.extract_strided_slice %25 {offsets = [2, 0, 0], sizes = [16, 16, 128], strides = [1, 1, 1]} : vector<18x24x128xf32> to vector<16x16x128xf32>
    %64 = vector.shape_cast %63 : vector<16x16x128xf32> to vector<256x128xf32>
    %c6 = arith.constant 6 : index
    %c0_31 = arith.constant 0 : index
    %c0_32 = arith.constant 0 : index
    %65 = vector.load %arg4[%c6, %c0_31, %c0_32] : memref<9x128x128xf32, #tpu.memory_space<vmem>>, vector<1x128x128xf32>
    %66 = vector.shape_cast %65 : vector<1x128x128xf32> to vector<128x128xf32>
    %cst_33 = arith.constant dense<0.000000e+00> : vector<256x128xf32>
    %67 = tpu.matmul %64, %66, %cst_33 {dimension_numbers = #tpu.dot_dimension_numbers<[1], [0], [0], [1], [0, 0, 1, 1], [], []>} : vector<256x128xf32>, vector<128x128xf32>, vector<256x128xf32> -> vector<256x128xf32>
    %68 = arith.addf %62, %67 : vector<256x128xf32>
    %69 = vector.extract_strided_slice %25 {offsets = [2, 1, 0], sizes = [16, 16, 128], strides = [1, 1, 1]} : vector<18x24x128xf32> to vector<16x16x128xf32>
    %70 = vector.shape_cast %69 : vector<16x16x128xf32> to vector<256x128xf32>
    %c7 = arith.constant 7 : index
    %c0_34 = arith.constant 0 : index
    %c0_35 = arith.constant 0 : index
    %71 = vector.load %arg4[%c7, %c0_34, %c0_35] : memref<9x128x128xf32, #tpu.memory_space<vmem>>, vector<1x128x128xf32>
    %72 = vector.shape_cast %71 : vector<1x128x128xf32> to vector<128x128xf32>
    %cst_36 = arith.constant dense<0.000000e+00> : vector<256x128xf32>
    %73 = tpu.matmul %70, %72, %cst_36 {dimension_numbers = #tpu.dot_dimension_numbers<[1], [0], [0], [1], [0, 0, 1, 1], [], []>} : vector<256x128xf32>, vector<128x128xf32>, vector<256x128xf32> -> vector<256x128xf32>
    %74 = arith.addf %68, %73 : vector<256x128xf32>
    %75 = vector.extract_strided_slice %25 {offsets = [2, 2, 0], sizes = [16, 16, 128], strides = [1, 1, 1]} : vector<18x24x128xf32> to vector<16x16x128xf32>
    %76 = vector.shape_cast %75 : vector<16x16x128xf32> to vector<256x128xf32>
    %c8 = arith.constant 8 : index
    %c0_37 = arith.constant 0 : index
    %c0_38 = arith.constant 0 : index
    %77 = vector.load %arg4[%c8, %c0_37, %c0_38] : memref<9x128x128xf32, #tpu.memory_space<vmem>>, vector<1x128x128xf32>
    %78 = vector.shape_cast %77 : vector<1x128x128xf32> to vector<128x128xf32>
    %cst_39 = arith.constant dense<0.000000e+00> : vector<256x128xf32>
    %79 = tpu.matmul %76, %78, %cst_39 {dimension_numbers = #tpu.dot_dimension_numbers<[1], [0], [0], [1], [0, 0, 1, 1], [], []>} : vector<256x128xf32>, vector<128x128xf32>, vector<256x128xf32> -> vector<256x128xf32>
    %80 = arith.addf %74, %79 : vector<256x128xf32>
    %c0_40 = arith.constant 0 : index
    %c0_41 = arith.constant 0 : index
    %81 = vector.load %arg5[%c0_40, %c0_41] : memref<1x128xf32, #tpu.memory_space<vmem>>, vector<1x128xf32>
    %82 = vector.broadcast %81 : vector<1x128xf32> to vector<256x128xf32>
    %83 = arith.addf %80, %82 : vector<256x128xf32>
    %cst_42 = arith.constant 0.000000e+00 : f32
    %84 = vector.broadcast %cst_42 : f32 to vector<256x128xf32>
    %85 = arith.maximumf %83, %84 : vector<256x128xf32>
    %c0_43 = arith.constant 0 : index
    %c0_44 = arith.constant 0 : index
    %86 = vector.load %arg6[%c0_43, %c0_44] : memref<128x128xf32, #tpu.memory_space<vmem>>, vector<128x128xf32>
    %cst_45 = arith.constant dense<0.000000e+00> : vector<256x128xf32>
    %87 = tpu.matmul %85, %86, %cst_45 {dimension_numbers = #tpu.dot_dimension_numbers<[1], [0], [0], [1], [0, 0, 1, 1], [], []>} : vector<256x128xf32>, vector<128x128xf32>, vector<256x128xf32> -> vector<256x128xf32>
    %c0_46 = arith.constant 0 : index
    %c0_47 = arith.constant 0 : index
    %88 = vector.load %arg7[%c0_46, %c0_47] : memref<1x128xf32, #tpu.memory_space<vmem>>, vector<1x128xf32>
    %89 = vector.broadcast %88 : vector<1x128xf32> to vector<256x128xf32>
    %90 = arith.addf %87, %89 : vector<256x128xf32>
    %91 = vector.extract_strided_slice %1 {offsets = [1, 1, 0], sizes = [16, 16, 128], strides = [1, 1, 1]} : vector<18x24x128xf32> to vector<16x16x128xf32>
    %92 = vector.shape_cast %91 : vector<16x16x128xf32> to vector<256x128xf32>
    %c0_48 = arith.constant 0 : index
    %c0_49 = arith.constant 0 : index
    %93 = vector.load %arg8[%c0_48, %c0_49] : memref<128x128xf32, #tpu.memory_space<vmem>>, vector<128x128xf32>
    %cst_50 = arith.constant dense<0.000000e+00> : vector<256x128xf32>
    %94 = tpu.matmul %92, %93, %cst_50 {dimension_numbers = #tpu.dot_dimension_numbers<[1], [0], [0], [1], [0, 0, 1, 1], [], []>} : vector<256x128xf32>, vector<128x128xf32>, vector<256x128xf32> -> vector<256x128xf32>
    %c0_51 = arith.constant 0 : index
    %c0_52 = arith.constant 0 : index
    %95 = vector.load %arg9[%c0_51, %c0_52] : memref<1x128xf32, #tpu.memory_space<vmem>>, vector<1x128xf32>
    %96 = vector.broadcast %95 : vector<1x128xf32> to vector<256x128xf32>
    %97 = arith.addf %94, %96 : vector<256x128xf32>
    %98 = arith.addf %90, %97 : vector<256x128xf32>
    %cst_53 = arith.constant 0.000000e+00 : f32
    %99 = vector.broadcast %cst_53 : f32 to vector<256x128xf32>
    %100 = arith.maximumf %98, %99 : vector<256x128xf32>
    %101 = vector.shape_cast %100 : vector<256x128xf32> to vector<16x16x128xf32>
    %c0_54 = arith.constant 0 : index
    %c0_55 = arith.constant 0 : index
    %c0_56 = arith.constant 0 : index
    %c0_57 = arith.constant 0 : index
    %102 = vector.load %arg10[%c0_54, %c0_55, %c0_56, %c0_57] : memref<1x16x16x128xf32, #tpu.memory_space<vmem>>, vector<1x16x16x128xf32>
    %103 = vector.shape_cast %102 : vector<1x16x16x128xf32> to vector<16x16x128xf32>
    %104 = vector.shape_cast %101 : vector<16x16x128xf32> to vector<1x16x16x128xf32>
    tpu.vector_store %arg10[%c0_54, %c0_55, %c0_56, %c0_57], %104 {strides = array<i32>} : memref<1x16x16x128xf32, #tpu.memory_space<vmem>>, vector<1x16x16x128xf32>,
    return
  }
  func.func @transform_0(%arg0: i32) -> (i32, i32, i32, i32) {
    %c0_i32 = arith.constant 0 : i32
    %c0_i32_0 = arith.constant 0 : i32
    %c0_i32_1 = arith.constant 0 : i32
    %c0_i32_2 = arith.constant 0 : i32
    return %arg0, %c0_i32, %c0_i32_0, %c0_i32_1 : i32, i32, i32, i32
  }
  func.func @transform_1(%arg0: i32) -> (i32, i32) {
    %c0_i32 = arith.constant 0 : i32
    %c0_i32_0 = arith.constant 0 : i32
    %c0_i32_1 = arith.constant 0 : i32
    return %c0_i32, %c0_i32_0 : i32, i32
  }
  func.func @transform_2(%arg0: i32) -> (i32, i32) {
    %c0_i32 = arith.constant 0 : i32
    %c0_i32_0 = arith.constant 0 : i32
    %c0_i32_1 = arith.constant 0 : i32
    return %c0_i32, %c0_i32_0 : i32, i32
  }
  func.func @transform_3(%arg0: i32) -> (i32, i32, i32) {
    %c0_i32 = arith.constant 0 : i32
    %c0_i32_0 = arith.constant 0 : i32
    %c0_i32_1 = arith.constant 0 : i32
    %c0_i32_2 = arith.constant 0 : i32
    return %c0_i32, %c0_i32_0, %c0_i32_1 : i32, i32, i32
  }
  func.func @transform_4(%arg0: i32) -> (i32, i32) {
    %c0_i32 = arith.constant 0 : i32
    %c0_i32_0 = arith.constant 0 : i32
    %c0_i32_1 = arith.constant 0 : i32
    return %c0_i32, %c0_i32_0 : i32, i32
  }
  func.func @transform_5(%arg0: i32) -> (i32, i32) {
    %c0_i32 = arith.constant 0 : i32
    %c0_i32_0 = arith.constant 0 : i32
    %c0_i32_1 = arith.constant 0 : i32
    return %c0_i32, %c0_i32_0 : i32, i32
  }
  func.func @transform_6(%arg0: i32) -> (i32, i32) {
    %c0_i32 = arith.constant 0 : i32
    %c0_i32_0 = arith.constant 0 : i32
    %c0_i32_1 = arith.constant 0 : i32
    return %c0_i32, %c0_i32_0 : i32, i32
  }
  func.func @transform_7(%arg0: i32) -> (i32, i32) {
    %c0_i32 = arith.constant 0 : i32
    %c0_i32_0 = arith.constant 0 : i32
    %c0_i32_1 = arith.constant 0 : i32
    return %c0_i32, %c0_i32_0 : i32, i32
  }
  func.func @transform_8(%arg0: i32) -> (i32, i32) {
    %c0_i32 = arith.constant 0 : i32
    %c0_i32_0 = arith.constant 0 : i32
    %c0_i32_1 = arith.constant 0 : i32
    return %c0_i32, %c0_i32_0 : i32, i32
  }
  func.func @transform_9(%arg0: i32) -> (i32, i32, i32, i32) {
    %c0_i32 = arith.constant 0 : i32
    %c0_i32_0 = arith.constant 0 : i32
    %c0_i32_1 = arith.constant 0 : i32
    %c0_i32_2 = arith.constant 0 : i32
    return %arg0, %c0_i32, %c0_i32_0, %c0_i32_1 : i32, i32, i32, i32
  }
}

</mosaic_0001>

<bundles_post_ra>
// kernel: bottleneck_forward.1
= control target key start
LH: loop header
LB: loop body
LE: loop exit
PB: predicated region body
PF: predicated region fallthrough
CT: control target
= control target key end

     0   :  { %14 = vsyncpa [#allocation3], 0  ;;  %s9243_s0 = inlined_call_operand.vmem [shape: f32[2,18,24,128], index: 0, kind: input, shape index: {}]   ;;  %s9244_s1 = inlined_call_operand.vmem [shape: f32[128,128], index: 1, kind: input, shape index: {}]   ;;  %s9245_s2 = inlined_call_operand.vmem [shape: f32[1,128], index: 2, kind: input, shape index: {}]   ;;  %s9246_s3 = inlined_call_operand.vmem [shape: f32[9,128,128], index: 3, kind: input, shape index: {}]   ;;  %s9247_s4 = inlined_call_operand.vmem [shape: f32[1,128], index: 4, kind: input, shape index: {}]   ;;  %s9248_s5 = inlined_call_operand.vmem [shape: f32[128,128], index: 5, kind: input, shape index: {}]   ;;  %s9249_s6 = inlined_call_operand.vmem [shape: f32[1,128], index: 6, kind: input, shape index: {}]   ;;  %s9250_s7 = inlined_call_operand.vmem [shape: f32[128,128], index: 7, kind: input, shape index: {}]   ;;  %s9251_s8 = inlined_call_operand.vmem [shape: f32[1,128], index: 8, kind: input, shape index: {}]   ;;  %s9252_s9 = inlined_call_operand.hbm [shape: f32[2,16,16,128], index: 9, kind: output, shape index: {}]  }
   0x1   :  { %16 = vsyncpa [#allocation3 + $0x1], 0  ;;  %s7224_s30 = smov 0   ;;  %s7226_s10 = smov 0  }
   0x2   :  { %s7228_s11 = smov 0   ;;  %s7230_s12 = smov 0  }
   0x3 LB: > { %s7245_s13 = sadd.s32 4294967295, %s7168_s12   ;;  %s4481_s14 = sadd.s32 4294967294, %s7168_s12   ;;  %s7168_s12 = sphi %s7230_s12, %s9556_s12   ;;  %s7164_s11 = sphi %s7228_s11, %s9555_s11   ;;  %s7160_s10 = sphi %s7226_s10, %s9554_s10   ;;  %s7156_s30 = sphi %s7224_s30, %s9553_s30  }
   0x4   : > { %s7249_s15 = sadd.s32 1, %s7168_s12   ;;  %s223_s16 = sadd.s32 1, %s7164_s11 }
   0x5   : > { %s220_s17 = ssub.s32 %s7168_s12, %s7249_s15  ;;  %p233_p0 = scmp.ne.s32.totalorder %s7164_s11, %s7160_s10 }
   0x6   : > { %p221_p1 = scmp.eq.s32.totalorder %s220_s17, 0  ;;  %p234_p2 = scmp.eq.s32.totalorder %s7245_s13, 1 }
   0x7   : > { %p239_p3 = scmp.ne.s32.totalorder %s7160_s10, %s7156_s30  ;;  %p240_p4 = scmp.eq.s32.totalorder %s4481_s14, 1 }
   0x8   : > { %s7260_s18 = scalar_select %p221_p1, %s7164_s11, %s223_s16  }
   0x9   : > { %p7262_p5 = por %p234_p2, %p233_p0  ;;  %p7266_p6 = por %p240_p4, %p239_p3 }
   0xa   : > { %p4484_p7 = scmp.ge.s32.totalorder %s7168_s12, 1  ;;  %p290_p8 = scmp.lt.s32.totalorder %s7168_s12, 3 }
   0xc   : > { %p291_p9 = pnand %p4484_p7, %p290_p8 }
   0xe   : > { %294 = sbr.rel (%p291_p9) target bundleno = 1229 (0x4cd), region = 56 }
  0x15   : > { %v385_v0 = vld [vmem:[%s9244_s1] sm:$0xff]  ;;  %v386_v1 = vld [vmem:[%s9244_s1 + $0x8] sm:$0xff]  ;;  %v387_v2 = vld [vmem:[%s9244_s1 + $0x10] sm:$0xff]  ;;  %p326_p10 = scmp.lt.s32.totalorder %s7245_s13, 1  ;;  %vm937_vm2 = vcmask 1046528   ;;  %vm1517_vm3 = vcmask 1045504  }
  0x16   : > { %v6262_v3 = vpack.c.bf16 %v386_v1, %v385_v0  ;;  %v388_v4 = vld [vmem:[%s9244_s1 + $0x18] sm:$0xff]  ;;  %v389_v6 = vld [vmem:[%s9244_s1 + $0x20] sm:$0xff]  ;;  %v390_v7 = vld [vmem:[%s9244_s1 + $0x28] sm:$0xff]  ;;  %s323_s14 = sand.u32 1, %s7160_s10   ;;  %s4670_s24 = sshll.u32 %s7245_s13, 12 }
  0x17   : > { %v6266_v5 = vpack.c.bf16 %v388_v4, %v387_v2  ;;  %s327_s21 = scalar_select %p326_p10, %s7245_s13, 1  ;;  %v6270_v8 = vpack.c.bf16 %v390_v7, %v389_v6  ;;  %v391_v9 = vld [vmem:[%s9244_s1 + $0x30] sm:$0xff]  ;;  %v392_v10 = vld [vmem:[%s9244_s1 + $0x38] sm:$0xff]  ;;  %v393_v13 = vld [vmem:[%s9244_s1 + $0x40] sm:$0xff] }
  0x18   : > { %6263 = vmatprep.subr.bf16.mxu0 %v6262_v3  ;;  %v6274_v12 = vpack.c.bf16 %v392_v10, %v391_v9  ;;  %v394_v14 = vld [vmem:[%s9244_s1 + $0x48] sm:$0xff]  ;;  %v395_v16 = vld [vmem:[%s9244_s1 + $0x50] sm:$0xff]  ;;  %v396_v17 = vld [vmem:[%s9244_s1 + $0x58] sm:$0xff]  ;;  %s9194_s28 = scalar_lea.hbm %s9252_s9, %s4670_s24  ;;  %s9202_s13 = scalar_lea.sflag [#allocation3], %s323_s14 }
  0x19   : > { %6265 = vmatpush3.bf16.msra.mxu0 %v6262_v3  ;;  %s7014_s22 = smul.u32 432, %s327_s21  ;;  %v6278_v15 = vpack.c.bf16 %v394_v14, %v393_v13  ;;  %v6282_v18 = vpack.c.bf16 %v396_v17, %v395_v16  ;;  %v397_v19 = vld [vmem:[%s9244_s1 + $0x60] sm:$0xff]  ;;  %v398_v20 = vld [vmem:[%s9244_s1 + $0x68] sm:$0xff]  ;;  %v399_v22 = vld [vmem:[%s9244_s1 + $0x70] sm:$0xff]  ;;  %s7171_s17 = smov [#allocation2]  }
  0x1a   : > { %6267 = vmatprep.subr.bf16.mxu0 %v6266_v5  ;;  %v6286_v21 = vpack.c.bf16 %v398_v20, %v397_v19  ;;  %v400_v23 = vld [vmem:[%s9244_s1 + $0x78] sm:$0xff]  ;;  %v4488_v25 = vld [vmem:[%s9246_s3 + $0x80] sm:$0xff]  ;;  %v4520_v27 = vld [vmem:[%s9246_s3 + $0x108] sm:$0xff]  ;;  %s7110_s21 = sshll.u32 %s7171_s17, 4  ;;  %s7111_s21 = int_to_ptr.vmem [resolvable:$false] %s7110_s21 }
  0x1b   : > { %s7301_s29 = scalar_lea.vmem %s9243_s0, %s7014_s22  ;;  %v6290_v24 = vpack.c.bf16 %v400_v23, %v399_v22  ;;  %v4519_v26 = vld [vmem:[%s9246_s3 + $0x100] sm:$0xff]  ;;  %v4489_v28 = vld [vmem:[%s9246_s3 + $0x88] sm:$0xff]  ;;  %v4521_v30 = vld [vmem:[%s9246_s3 + $0x110] sm:$0xff]  ;;  %s7112_s23 = scalar_lea.vmem %s7111_s21, 8192 }
  0x1c   : > { %v331_v11 = vld [vmem:[%s7301_s29] sm:$0xff]  ;;  %v6358_v29 = vpack.c.bf16 %v4520_v27, %v4519_v26  ;;  %v4522_v31 = vld [vmem:[%s9246_s3 + $0x118] sm:$0xff]  ;;  %v4524_v34 = vld [vmem:[%s9246_s3 + $0x128] sm:$0xff]  ;;  %v6294_v35 = vpack.c.bf16 %v4489_v28, %v4488_v25 }
  0x1d   : > { %6269 = vmatpush3.bf16.msra.mxu0 %v6266_v5  ;;  %5301 = vmatprep.mubr.f32.mxu0 %v331_v11  ;;  %v6362_v32 = vpack.c.bf16 %v4522_v31, %v4521_v30  ;;  %v4523_v33 = vld [vmem:[%s9246_s3 + $0x120] sm:$0xff]  ;;  %v4490_v36 = vld [vmem:[%s9246_s3 + $0x90] sm:$0xff]  ;;  %v4491_v37 = vld [vmem:[%s9246_s3 + $0x98] sm:$0xff] }
  0x1e   : > { %6271 = vmatprep.subr.bf16.mxu0 %v6270_v8  ;;  %6359 = vmatprep.subr.bf16.mxu1 %v6358_v29  ;;  %v6366_v38 = vpack.c.bf16 %v4524_v34, %v4523_v33  ;;  %v4525_v39 = vld [vmem:[%s9246_s3 + $0x130] sm:$0xff]  ;;  %v4526_v40 = vld [vmem:[%s9246_s3 + $0x138] sm:$0xff]  ;;  %v332_v41 = vld [vmem:[%s7301_s29 + $0x8] sm:$0xff]  ;;  %v6298_v43 = vpack.c.bf16 %v4491_v37, %v4490_v36 }
  0x1f   : > { %6361 = vmatpush3.bf16.msra.mxu1 %v6358_v29  ;;  %v333_v42 = vld [vmem:[%s7301_s29 + $0x10] sm:$0xff]  ;;  %v4492_v44 = vld [vmem:[%s9246_s3 + $0xa0] sm:$0xff]  ;;  %v4493_v45 = vld [vmem:[%s9246_s3 + $0xa8] sm:$0xff]  ;;  %v6370_v46 = vpack.c.bf16 %v4526_v40, %v4525_v39 }
  0x20   : > { %6363 = vmatprep.subr.bf16.mxu1 %v6362_v32  ;;  %v4527_v47 = vld [vmem:[%s9246_s3 + $0x140] sm:$0xff]  ;;  %v4528_v48 = vld [vmem:[%s9246_s3 + $0x148] sm:$0xff]  ;;  %v334_v49 = vld [vmem:[%s7301_s29 + $0x18] sm:$0xff]  ;;  %v6302_v51 = vpack.c.bf16 %v4493_v45, %v4492_v44 }
  0x21   : > { %6273 = vmatpush3.bf16.msra.mxu0 %v6270_v8  ;;  %v335_v50 = vld [vmem:[%s7301_s29 + $0x20] sm:$0xff]  ;;  %v4494_v52 = vld [vmem:[%s9246_s3 + $0xb0] sm:$0xff]  ;;  %v4495_v53 = vld [vmem:[%s9246_s3 + $0xb8] sm:$0xff]  ;;  %v6374_v54 = vpack.c.bf16 %v4528_v48, %v4527_v47 }
  0x22   : > { %6275 = vmatprep.subr.bf16.mxu0 %v6274_v12  ;;  %v336_v55 = vld [vmem:[%s7301_s29 + $0x28] sm:$0xff]  ;;  %v337_v56 = vld [vmem:[%s7301_s29 + $0x30] sm:$0xff]  ;;  %v6306_v57 = vpack.c.bf16 %v4495_v53, %v4494_v52  ;;  %v4496_v58 = vld [vmem:[%s9246_s3 + $0xc0] sm:$0xff] }
  0x23   : > { %6365 = vmatpush3.bf16.msra.mxu1 %v6362_v32  ;;  %v4497_v59 = vld [vmem:[%s9246_s3 + $0xc8] sm:$0xff]  ;;  %v338_v60 = vld [vmem:[%s7301_s29 + $0x38] sm:$0xff]  ;;  %v339_v61 = vld [vmem:[%s7301_s29 + $0x40] sm:$0xff] }
  0x24   : > { %6367 = vmatprep.subr.bf16.mxu1 %v6366_v38  ;;  %v6310_v62 = vpack.c.bf16 %v4497_v59, %v4496_v58  ;;  %v340_v63 = vld [vmem:[%s7301_s29 + $0x48] sm:$0xff]  ;;  %v341_v0 = vld [vmem:[%s7301_s29 + $0x50] sm:$0xff]  ;;  %v342_v1 = vld [vmem:[%s7301_s29 + $0x58] sm:$0xff]  ;;  %v9253_v59 = vmov 0.0  }
  0x25   : > { %6277 = vmatpush3.bf16.msra.mxu0 %v6274_v12  ;;  %v343_v2 = vld [vmem:[%s7301_s29 + $0x60] sm:$0xff]  ;;  %v344_v3 = vld [vmem:[%s7301_s29 + $0x68] sm:$0xff]  ;;  %v345_v4 = vld [vmem:[%s7301_s29 + $0x70] sm:$0xff] }
  0x26   : > { %6279 = vmatprep.subr.bf16.mxu0 %v6278_v15  ;;  %v346_v5 = vld [vmem:[%s7301_s29 + $0x78] sm:$0xff]  ;;  %v347_v6 = vld [vmem:[%s7301_s29 + $0x80] sm:$0xff]  ;;  %v348_v7 = vld [vmem:[%s7301_s29 + $0x88] sm:$0xff] }
  0x27   : > { %6369 = vmatpush3.bf16.msra.mxu1 %v6366_v38  ;;  %v349_v8 = vld [vmem:[%s7301_s29 + $0x90] sm:$0xff]  ;;  %v350_v9 = vld [vmem:[%s7301_s29 + $0x98] sm:$0xff]  ;;  %v351_v10 = vld [vmem:[%s7301_s29 + $0xa0] sm:$0xff] }
  0x28   : > { %6371 = vmatprep.subr.bf16.mxu1 %v6370_v46  ;;  %v352_v11 = vld [vmem:[%s7301_s29 + $0xa8] sm:$0xff]  ;;  %v353_v12 = vld [vmem:[%s7301_s29 + $0xb0] sm:$0xff]  ;;  %v354_v13 = vld [vmem:[%s7301_s29 + $0xb8] sm:$0xff] }
  0x29   : > { %6281 = vmatpush3.bf16.msra.mxu0 %v6278_v15  ;;  %v355_v14 = vld [vmem:[%s7301_s29 + $0xc0] sm:$0xff]  ;;  %v356_v15 = vld [vmem:[%s7301_s29 + $0xc8] sm:$0xff]  ;;  %v357_v16 = vld [vmem:[%s7301_s29 + $0xd0] sm:$0xff] }
  0x2a   : > { %6283 = vmatprep.subr.bf16.mxu0 %v6282_v18  ;;  %v358_v17 = vld [vmem:[%s7301_s29 + $0xd8] sm:$0xff]  ;;  %v360_v19 = vld [vmem:[%s7301_s29 + $0xe8] sm:$0xff]  ;;  %v361_v20 = vld [vmem:[%s7301_s29 + $0xf0] sm:$0xff] }
  0x2b   : > { %6373 = vmatpush3.bf16.msra.mxu1 %v6370_v46  ;;  %v363_v22 = vld [vmem:[%s7301_s29 + $0x100] sm:$0xff]  ;;  %v364_v23 = vld [vmem:[%s7301_s29 + $0x108] sm:$0xff]  ;;  %v366_v25 = vld [vmem:[%s7301_s29 + $0x118] sm:$0xff] }
  0x2c   : > { %6375 = vmatprep.subr.bf16.mxu1 %v6374_v54  ;;  %v367_v26 = vld [vmem:[%s7301_s29 + $0x120] sm:$0xff]  ;;  %v368_v27 = vld [vmem:[%s7301_s29 + $0x128] sm:$0xff]  ;;  %v369_v28 = vld [vmem:[%s7301_s29 + $0x130] sm:$0xff] }
  0x2d   : > { %6285 = vmatpush3.bf16.msra.mxu0 %v6282_v18  ;;  %v359_v18 = vld [vmem:[%s7301_s29 + $0xe0] sm:$0xff]  ;;  %v370_v29 = vld [vmem:[%s7301_s29 + $0x138] sm:$0xff]  ;;  %v372_v31 = vld [vmem:[%s7301_s29 + $0x148] sm:$0xff] }
  0x2e   : > { %6287 = vmatprep.subr.bf16.mxu0 %v6286_v21  ;;  %v371_v30 = vld [vmem:[%s7301_s29 + $0x140] sm:$0xff]  ;;  %v373_v32 = vld [vmem:[%s7301_s29 + $0x150] sm:$0xff]  ;;  %v374_v33 = vld [vmem:[%s7301_s29 + $0x158] sm:$0xff] }
  0x2f   : > { %6377 = vmatpush3.bf16.msra.mxu1 %v6374_v54  ;;  %v375_v34 = vld [vmem:[%s7301_s29 + $0x160] sm:$0xff]  ;;  %v4499_v36 = vld [vmem:[%s9246_s3 + $0xd8] sm:$0xff]  ;;  %v4529_v37 = vld [vmem:[%s9246_s3 + $0x150] sm:$0xff] }
  0x30   : > { %v4530_v39 = vld [vmem:[%s9246_s3 + $0x158] sm:$0xff]  ;;  %v4501_v44 = vld [vmem:[%s9246_s3 + $0xe8] sm:$0xff]  ;;  %v4531_v45 = vld [vmem:[%s9246_s3 + $0x160] sm:$0xff] }
  0x31   : > { %6289 = vmatpush3.bf16.msra.mxu0 %v6286_v21  ;;  %v362_v21 = vld [vmem:[%s7301_s29 + $0xf8] sm:$0xff]  ;;  %v6378_v40 = vpack.c.bf16 %v4530_v39, %v4529_v37  ;;  %v4532_v47 = vld [vmem:[%s9246_s3 + $0x168] sm:$0xff]  ;;  %v4533_v53 = vld [vmem:[%s9246_s3 + $0x170] sm:$0xff] }
  0x32   : > { %6291 = vmatprep.subr.bf16.mxu0 %v6290_v24  ;;  %v6382_v48 = vpack.c.bf16 %v4532_v47, %v4531_v45  ;;  %v4503_v52 = vld [vmem:[%s9246_s3 + $0xf8] sm:$0xff]  ;;  %v381_v58 = vld [vmem:[%s7301_s29 + $0x190] sm:$0xff]  ;;  %v4547_v37 = vld [vmem:[%s9246_s3 + $0x1e0] sm:$0xff] }
  0x33   : > { %6379 = vmatprep.subr.bf16.mxu1 %v6378_v40  ;;  %v888_v47 = vld [vmem:[%s9246_s3 + $0x78] sm:$0xff] }
  0x34   : > { %6381 = vmatpush3.bf16.msra.mxu1 %v6378_v40  ;;  %v885_v40 = vld [vmem:[%s9246_s3 + $0x60] sm:$0xff] }
  0x35   : > { %6293 = vmatpush3.bf16.msra.mxu0 %v6290_v24  ;;  %v365_v24 = vld [vmem:[%s7301_s29 + $0x110] sm:$0xff]  ;;  %6383 = vmatprep.subr.bf16.mxu1 %v6382_v48 }
  0x36   : > { %6295 = vmatprep.subr.bf16.mxu0 %v6294_v35 }
  0x38   : > { %5302 = vmatmul.mubr.f32.vlgmr.msra.gmra.mrb[0].mxu0 %v332_v41  ;;  %v376_v41 = vld [vmem:[%s7301_s29 + $0x168] sm:$0xff]  ;;  %6385 = vmatpush3.bf16.msra.mxu1 %v6382_v48 }
  0x39   : > { %5304 = vmatprep.mubr.f32.mxu0 %v333_v42  ;;  %6297 = vmatpush3.bf16.msra.mxu0 %v6294_v35  ;;  %v4498_v35 = vld [vmem:[%s9246_s3 + $0xd0] sm:$0xff] }
  0x3a   : > { %6299 = vmatprep.subr.bf16.mxu0 %v6298_v43  ;;  %v6314_v38 = vpack.c.bf16 %v4499_v36, %v4498_v35  ;;  %v377_v42 = vld [vmem:[%s7301_s29 + $0x170] sm:$0xff]  ;;  %v884_v35 = vld [vmem:[%s9246_s3 + $0x58] sm:$0xff] }
  0x3c   : > { %5305 = vmatmul.mubr.f32.gmra.mrb[2].mxu0 %v334_v49  ;;  %v378_v49 = vld [vmem:[%s7301_s29 + $0x178] sm:$0xff] }
  0x3d   : > { %5307 = vmatprep.mubr.f32.mxu0 %v335_v50  ;;  %6301 = vmatpush3.bf16.msra.mxu0 %v6298_v43  ;;  %v4500_v43 = vld [vmem:[%s9246_s3 + $0xe0] sm:$0xff] }
  0x3e   : > { %6303 = vmatprep.subr.bf16.mxu0 %v6302_v51  ;;  %v6318_v46 = vpack.c.bf16 %v4501_v44, %v4500_v43  ;;  %v379_v50 = vld [vmem:[%s7301_s29 + $0x180] sm:$0xff]  ;;  %v4549_v43 = vld [vmem:[%s9246_s3 + $0x1f0] sm:$0xff]  ;;  %v4550_v44 = vld [vmem:[%s9246_s3 + $0x1f8] sm:$0xff] }
  0x3f   : > { %v6418_v45 = vpack.c.bf16 %v4550_v44, %v4549_v43 }
  0x40   : > { %5308 = vmatmul.mubr.f32.gmra.mrb[4].mxu0 %v336_v55  ;;  %v4534_v55 = vld [vmem:[%s9246_s3 + $0x178] sm:$0xff] }
  0x41   : > { %5310 = vmatprep.mubr.f32.mxu0 %v337_v56  ;;  %6305 = vmatpush3.bf16.msra.mxu0 %v6302_v51  ;;  %v4502_v51 = vld [vmem:[%s9246_s3 + $0xf0] sm:$0xff]  ;;  %v6386_v56 = vpack.c.bf16 %v4534_v55, %v4533_v53  ;;  %v7595_v55 = vld [vmem:[%s9245_s2] ss:$0 sm:$0xff] }
  0x42   : > { %6307 = vmatprep.subr.bf16.mxu0 %v6306_v57  ;;  %v6322_v54 = vpack.c.bf16 %v4503_v52, %v4502_v51  ;;  %v797_v52 = vlaneseq }
  0x43   : > { %6387 = vmatprep.subr.bf16.mxu1 %v6386_v56 }
  0x44   : > { %5311 = vmatmul.mubr.f32.gmra.mrb[6].mxu0 %v338_v60  ;;  %v7475_v60 = vrot.slane %v9253_v59, 2  ;;  %6389 = vmatpush3.bf16.msra.mxu1 %v6386_v56  ;;  %v7597_v56 = vshrl.u32 %v797_v52, 7 }
  0x45   : > { %5313 = vmatprep.mubr.f32.mxu0 %v339_v61  ;;  %6309 = vmatpush3.bf16.msra.mxu0 %v6306_v57  ;;  %v380_v57 = vld [vmem:[%s7301_s29 + $0x188] sm:$0xff]  ;;  %v382_v61 = vld [vmem:[%s7301_s29 + $0x198] sm:$0xff] }
  0x46   : > { %6311 = vmatprep.subr.bf16.mxu0 %v6310_v62  ;;  %9373 = vst [vmem:[#allocation5_spill] sm:$0xff] %v7475_v60  ;;  %5574 = vmatprep.mubr.f32.mxu1 %v7475_v60  ;;  %vm801_vm0 = vcmp.ge.s32.totalorder %v7597_v56, 1 }
  0x47   : > { %5575 = vmatmul.mubr.f32.vlgmr.msra.gmra.mrb[0].mxu1 %v7475_v60 }
  0x48   : > { %5314 = vmatmul.mubr.f32.gmra.mrb[8].mxu0 %v340_v63  ;;  %v384_v63 = vld [vmem:[%s7301_s29 + $0x1a8] sm:$0xff] }
  0x49   : > { %5316 = vmatprep.mubr.f32.mxu0 %v341_v0  ;;  %6313 = vmatpush3.bf16.msra.mxu0 %v6310_v62  ;;  %v383_v62 = vld [vmem:[%s7301_s29 + $0x1a0] sm:$0xff]  ;;  %v7483_v0 = vrot.slane %v9253_v59, 1 }
  0x4a   : > { %6315 = vmatprep.subr.bf16.mxu0 %v6314_v38 }
  0x4b   : > { %9374 = vst [vmem:[#allocation6_spill] sm:$0xff] %v7483_v0 }
  0x4c   : > { %5317 = vmatmul.mubr.f32.gmra.mrb[10].mxu0 %v342_v1  ;;  %v4535_v1 = vld [vmem:[%s9246_s3 + $0x180] sm:$0xff] }
  0x4d   : > { %5319 = vmatprep.mubr.f32.mxu0 %v343_v2  ;;  %6317 = vmatpush3.bf16.msra.mxu0 %v6314_v38  ;;  %v4536_v2 = vld [vmem:[%s9246_s3 + $0x188] sm:$0xff] }
  0x4e   : > { %6319 = vmatprep.subr.bf16.mxu0 %v6318_v46  ;;  %v4548_v38 = vld [vmem:[%s9246_s3 + $0x1e8] sm:$0xff] }
  0x4f   : > { %v6414_v39 = vpack.c.bf16 %v4548_v38, %v4547_v37 }
  0x50   : > { %5320 = vmatmul.mubr.f32.gmra.mrb[12].mxu0 %v344_v3  ;;  %v6390_v3 = vpack.c.bf16 %v4536_v2, %v4535_v1  ;;  %v4646_v2 = vld [vmem:[%s9246_s3 + $0x400] sm:$0xff] }
  0x51   : > { %5322 = vmatprep.mubr.f32.mxu0 %v345_v4  ;;  %6321 = vmatpush3.bf16.msra.mxu0 %v6318_v46  ;;  %v4537_v4 = vld [vmem:[%s9246_s3 + $0x190] sm:$0xff] }
  0x52   : > { %6323 = vmatprep.subr.bf16.mxu0 %v6322_v54  ;;  %6391 = vmatprep.subr.bf16.mxu1 %v6390_v3  ;;  %v887_v46 = vld [vmem:[%s9246_s3 + $0x70] sm:$0xff] }
  0x53   : > { %6393 = vmatpush3.bf16.msra.mxu1 %v6390_v3  ;;  %v6354_v48 = vpack.c.bf16 %v888_v47, %v887_v46  ;;  %v4647_v3 = vld [vmem:[%s9246_s3 + $0x408] sm:$0xff] }
  0x54   : > { %5323 = vmatmul.mubr.f32.gmra.mrb[14].mxu0 %v346_v5  ;;  %v4538_v5 = vld [vmem:[%s9246_s3 + $0x198] sm:$0xff] }
  0x55   : > { %5325 = vmatprep.mubr.f32.mxu0 %v347_v6  ;;  %6325 = vmatpush3.bf16.msra.mxu0 %v6322_v54  ;;  %v6394_v6 = vpack.c.bf16 %v4538_v5, %v4537_v4 }
  0x57   : > { %6395 = vmatprep.subr.bf16.mxu1 %v6394_v6 }
  0x58   : > { %5326 = vmatmul.mubr.f32.gmra.mrb[16].mxu0 %v348_v7  ;;  %6397 = vmatpush3.bf16.msra.mxu1 %v6394_v6  ;;  %v4539_v7 = vld [vmem:[%s9246_s3 + $0x1a0] sm:$0xff]  ;;  %v7613_v6 = vpack.c.bf16 %v4647_v3, %v4646_v2 }
  0x59   : > { %5328 = vmatprep.mubr.f32.mxu0 %v349_v8  ;;  %v4540_v8 = vld [vmem:[%s9246_s3 + $0x1a8] sm:$0xff] }
  0x5c   : > { %5329 = vmatmul.mubr.f32.gmra.mrb[18].mxu0 %v350_v9  ;;  %v6398_v9 = vpack.c.bf16 %v4540_v8, %v4539_v7 }
  0x5d   : > { %5331 = vmatprep.mubr.f32.mxu0 %v351_v10  ;;  %v4541_v10 = vld [vmem:[%s9246_s3 + $0x1b0] sm:$0xff] }
  0x5e   : > { %6399 = vmatprep.subr.bf16.mxu1 %v6398_v9 }
  0x5f   : > { %6401 = vmatpush3.bf16.msra.mxu1 %v6398_v9 }
  0x60   : > { %5332 = vmatmul.mubr.f32.gmra.mrb[20].mxu0 %v352_v11  ;;  %v4542_v11 = vld [vmem:[%s9246_s3 + $0x1b8] sm:$0xff] }
  0x61   : > { %5334 = vmatprep.mubr.f32.mxu0 %v353_v12  ;;  %v6402_v12 = vpack.c.bf16 %v4542_v11, %v4541_v10 }
  0x63   : > { %6403 = vmatprep.subr.bf16.mxu1 %v6402_v12 }
  0x64   : > { %5335 = vmatmul.mubr.f32.gmra.mrb[22].mxu0 %v354_v13  ;;  %v873_v13 = vld [vmem:[%s9246_s3] sm:$0xff]  ;;  %6405 = vmatpush3.bf16.msra.mxu1 %v6402_v12 }
  0x65   : > { %5337 = vmatprep.mubr.f32.mxu0 %v355_v14  ;;  %v874_v14 = vld [vmem:[%s9246_s3 + $0x8] sm:$0xff] }
  0x68   : > { %5338 = vmatmul.mubr.f32.gmra.mrb[24].mxu0 %v356_v15  ;;  %v6326_v15 = vpack.c.bf16 %v874_v14, %v873_v13 }
  0x69   : > { %5340 = vmatprep.mubr.f32.mxu0 %v357_v16  ;;  %v4543_v16 = vld [vmem:[%s9246_s3 + $0x1c0] sm:$0xff] }
  0x6a   : > { %6327 = vmatprep.subr.bf16.mxu0 %v6326_v15 }
  0x6c   : > { %5341 = vmatmul.mubr.f32.gmra.mrb[26].mxu0 %v358_v17  ;;  %v4544_v17 = vld [vmem:[%s9246_s3 + $0x1c8] sm:$0xff] }
  0x6d   : > { %5343 = vmatprep.mubr.f32.mxu0 %v359_v18  ;;  %v875_v18 = vld [vmem:[%s9246_s3 + $0x10] sm:$0xff] }
  0x70   : > { %5344 = vmatmul.mubr.f32.gmra.mrb[28].mxu0 %v360_v19  ;;  %v6406_v19 = vpack.c.bf16 %v4544_v17, %v4543_v16 }
  0x71   : > { %5346 = vmatprep.mubr.f32.mxu0 %v361_v20  ;;  %v876_v20 = vld [vmem:[%s9246_s3 + $0x18] sm:$0xff] }
  0x72   : > { %6407 = vmatprep.subr.bf16.mxu1 %v6406_v19 }
  0x73   : > { %6409 = vmatpush3.bf16.msra.mxu1 %v6406_v19 }
  0x74   : > { %5347 = vmatmul.mubr.f32.gmra.mrb[30].mxu0 %v362_v21  ;;  %v6330_v21 = vpack.c.bf16 %v876_v20, %v875_v18 }
  0x75   : > { %5349 = vmatprep.mubr.f32.mxu0 %v363_v22  ;;  %v877_v22 = vld [vmem:[%s9246_s3 + $0x20] sm:$0xff] }
  0x78   : > { %5350 = vmatmul.mubr.f32.gmra.mrb[32].mxu0 %v364_v23  ;;  %v878_v23 = vld [vmem:[%s9246_s3 + $0x28] sm:$0xff] }
  0x79   : > { %5352 = vmatprep.mubr.f32.mxu0 %v365_v24  ;;  %v6334_v24 = vpack.c.bf16 %v878_v23, %v877_v22 }
  0x7c   : > { %5353 = vmatmul.mubr.f32.gmra.mrb[34].mxu0 %v366_v25  ;;  %v879_v25 = vld [vmem:[%s9246_s3 + $0x30] sm:$0xff] }
  0x7d   : > { %5355 = vmatprep.mubr.f32.mxu0 %v367_v26  ;;  %v880_v26 = vld [vmem:[%s9246_s3 + $0x38] sm:$0xff] }
  0x80   : > { %5356 = vmatmul.mubr.f32.gmra.mrb[36].mxu0 %v368_v27  ;;  %v6338_v27 = vpack.c.bf16 %v880_v26, %v879_v25 }
  0x81   : > { %5358 = vmatprep.mubr.f32.mxu0 %v369_v28  ;;  %v4545_v28 = vld [vmem:[%s9246_s3 + $0x1d0] sm:$0xff] }
  0x84   : > { %5359 = vmatmul.mubr.f32.gmra.mrb[38].mxu0 %v370_v29  ;;  %v4546_v29 = vld [vmem:[%s9246_s3 + $0x1d8] sm:$0xff] }
  0x85   : > { %5361 = vmatprep.mubr.f32.mxu0 %v371_v30  ;;  %v6410_v30 = vpack.c.bf16 %v4546_v29, %v4545_v28 }
  0x87   : > { %6411 = vmatprep.subr.bf16.mxu1 %v6410_v30 }
  0x88   : > { %5362 = vmatmul.mubr.f32.gmra.mrb[40].mxu0 %v372_v31  ;;  %v881_v31 = vld [vmem:[%s9246_s3 + $0x40] sm:$0xff]  ;;  %6413 = vmatpush3.bf16.msra.mxu1 %v6410_v30 }
  0x89   : > { %5364 = vmatprep.mubr.f32.mxu0 %v373_v32  ;;  %v882_v32 = vld [vmem:[%s9246_s3 + $0x48] sm:$0xff]  ;;  %6415 = vmatprep.subr.bf16.mxu1 %v6414_v39 }
  0x8c   : > { %5365 = vmatmul.mubr.f32.gmra.mrb[42].mxu0 %v374_v33  ;;  %v6342_v33 = vpack.c.bf16 %v882_v32, %v881_v31  ;;  %6417 = vmatpush3.bf16.msra.mxu1 %v6414_v39 }
  0x8d   : > { %5367 = vmatprep.mubr.f32.mxu0 %v375_v34  ;;  %v883_v34 = vld [vmem:[%s9246_s3 + $0x50] sm:$0xff]  ;;  %6419 = vmatprep.subr.bf16.mxu1 %v6418_v45 }
  0x8e   : > { %v6346_v36 = vpack.c.bf16 %v884_v35, %v883_v34 }
  0x90   : > { %5368 = vmatmul.mubr.f32.gmra.mrb[44].mxu0 %v376_v41  ;;  %v886_v41 = vld [vmem:[%s9246_s3 + $0x68] sm:$0xff]  ;;  %6421 = vmatpush3.bf16.msra.mxu1 %v6418_v45 }
  0x91   : > { %5370 = vmatprep.mubr.f32.mxu0 %v377_v42  ;;  %v6350_v42 = vpack.c.bf16 %v886_v41, %v885_v40 }
  0x94   : > { %5371 = vmatmul.mubr.f32.gmra.mrb[46].mxu0 %v378_v49  ;;  %v4567_v49 = vld [vmem:[%s9246_s3 + $0x200] sm:$0xff] }
  0x95   : > { %5373 = vmatprep.mubr.f32.mxu0 %v379_v50  ;;  %v4568_v50 = vld [vmem:[%s9246_s3 + $0x208] sm:$0xff] }
  0x96   : > { %v7589_v51 = vpack.c.bf16 %v4568_v50, %v4567_v49 }
  0x98   : > { %5374 = vmatmul.mubr.f32.gmra.mrb[48].mxu0 %v380_v57  ;;  %6423 = vmatprep.subr.bf16.mxu1 %v7589_v51 }
  0x99   : > { %5376 = vmatprep.mubr.f32.mxu0 %v381_v58 }
  0x9c   : > { %5377 = vmatmul.mubr.f32.gmra.mrb[50].mxu0 %v382_v61 }
  0x9d   : > { %5379 = vmatprep.mubr.f32.mxu0 %v383_v62  ;;  %v7601_v62 = vadd.s32 16, %v7597_v56 }
  0x9f   : > { %vm812_vm1 = vcmp.le.s32.totalorder %v7601_v62, 16 }
  0xa0   : > { %5380 = vmatmul.mubr.f32.gmra.mrb[52].mxu0 %v384_v63 }
  0xa1   : > { %5414 = vmatprep.mubr.f32.mxu0 %v7483_v0 }
  0xa4   : > { %5415 = vmatmul.mubr.f32.vlgmr.msra.gmra.mrb[54].mxu0 %v7483_v0 }
  0xa5   : > { %6329 = vmatpush3.bf16.msra.mxu0 %v6326_v15 }
  0xa6   : > { %6331 = vmatprep.subr.bf16.mxu0 %v6330_v21 }
  0xa9   : > { %6333 = vmatpush3.bf16.msra.mxu0 %v6330_v21 }
  0xaa   : > { %6335 = vmatprep.subr.bf16.mxu0 %v6334_v24 }
  0xad   : > { %6337 = vmatpush3.bf16.msra.mxu0 %v6334_v24 }
  0xae   : > { %6339 = vmatprep.subr.bf16.mxu0 %v6338_v27 }
  0xb1   : > { %6341 = vmatpush3.bf16.msra.mxu0 %v6338_v27 }
  0xb2   : > { %6343 = vmatprep.subr.bf16.mxu0 %v6342_v33 }
  0xb5   : > { %6345 = vmatpush3.bf16.msra.mxu0 %v6342_v33 }
  0xb6   : > { %6347 = vmatprep.subr.bf16.mxu0 %v6346_v36 }
  0xb9   : > { %6349 = vmatpush3.bf16.msra.mxu0 %v6346_v36 }
  0xba   : > { %6351 = vmatprep.subr.bf16.mxu0 %v6350_v42 }
  0xbd   : > { %6353 = vmatpush3.bf16.msra.mxu0 %v6350_v42 }
  0xbe   : > { %6355 = vmatprep.subr.bf16.mxu0 %v6354_v48 }
  0xc1   : > { %6357 = vmatpush3.bf16.msra.mxu0 %v6354_v48 }
  0xc2   : > { %6551 = vmatprep.subr.bf16.mxu0 %v7613_v6 }
 0x10b   : > { %v5303_v53 = vpop.f32.mrb[0].mxu0 }
 0x10c   : > { %v474_v54 = vpop.f32.mrb[1].mxu0 }
 0x10f   : > { %v5306_v57 = vpop.f32.mrb[2].mxu0 }
 0x110   : > { %v490_v58 = vadd.f32 %v5306_v57, %v7595_v55  ;;  %v484_v61 = vpop.f32.mrb[3].mxu0 }
 0x112   : > { %v7603_v63 = vmax.f32 %v490_v58, 0.0 }
 0x113   : > { %v5309_v1 = vpop.f32.mrb[4].mxu0 }
 0x114   : > { %v500_v4 = vadd.f32 %v5309_v1, %v7595_v55  ;;  %v494_v5 = vpop.f32.mrb[5].mxu0  ;;  %v822_v7 = vsel %vm801_vm0, %v7603_v63, 0.0 }
 0x115   : > { %v495_v8 = vadd.f32 %v7595_v55, %v494_v5  ;;  %v943_v15 = vrot.slane %v822_v7, 1  ;;  %v1523_v21 = vrot.slane %v822_v7, 2 }
 0x116   : > { %v748_v9 = vmax.f32 %v500_v4, 0.0 }
 0x117   : > { %v7621_v10 = vmax.f32 %v495_v8, 0.0  ;;  %v5312_v11 = vpop.f32.mrb[6].mxu0 }
 0x118   : > { %v824_v12 = vsel %vm812_vm1, %v748_v9, 0.0  ;;  %v510_v13 = vadd.f32 %v5312_v11, %v7595_v55  ;;  %v504_v14 = vpop.f32.mrb[7].mxu0 }
 0x119   : > { %v946_v16 = vrot.slane %v824_v12, 1  ;;  %v1526_v17 = vrot.slane %v824_v12, 2  ;;  %v505_v18 = vadd.f32 %v7595_v55, %v504_v14  ;;  %v944_v19 = vrot.slane %v7621_v10, 1 }
 0x11a   : > { %v7628_v20 = vmax.f32 %v510_v13, 0.0  ;;  %v1524_v22 = vrot.slane %v7621_v10, 2 }
 0x11b   : > { %v7631_v23 = vmax.f32 %v505_v18, 0.0  ;;  %v5315_v24 = vpop.f32.mrb[8].mxu0  ;;  %v7634_v25 = vsel %vm937_vm2, %v943_v15, %v944_v19  ;;  %v7637_v26 = vsel %vm937_vm2, %v944_v19, %v946_v16 }
 0x11c   : > { %v520_v27 = vadd.f32 %v5315_v24, %v7595_v55  ;;  %v514_v28 = vpop.f32.mrb[9].mxu0  ;;  %5417 = vmatprep.mubr.f32.mxu0 %v7634_v25  ;;  %v7642_v29 = vsel %vm1517_vm3, %v1523_v21, %v1524_v22  ;;  %v7645_v30 = vsel %vm1517_vm3, %v1524_v22, %v1526_v17  ;;  %v949_v33 = vrot.slane %v7628_v20, 1 }
 0x11d   : > { %9375 = vst [vmem:[#allocation7_spill] sm:$0xff] %v7642_v29  ;;  %9376 = vst [vmem:[#allocation8_spill] sm:$0xff] %v7645_v30  ;;  %v515_v31 = vadd.f32 %v7595_v55, %v514_v28  ;;  %5577 = vmatprep.mubr.f32.mxu1 %v7642_v29  ;;  %5418 = vmatmul.mubr.f32.gmra.mrb[56].mxu0 %v7637_v26  ;;  %v825_v32 = vsel %vm801_vm0, %v7631_v23, 0.0  ;;  %v1529_v37 = vrot.slane %v7628_v20, 2 }
 0x11e   : > { %v7654_v34 = vmax.f32 %v520_v27, 0.0  ;;  %5578 = vmatmul.mubr.f32.gmra.mrb[2].mxu1 %v7645_v30  ;;  %v948_v35 = vrot.slane %v825_v32, 1  ;;  %v1528_v36 = vrot.slane %v825_v32, 2 }
 0x11f   : > { %v751_v38 = vmax.f32 %v515_v31, 0.0  ;;  %v5318_v39 = vpop.f32.mrb[10].mxu0 }
 0x120   : > { %v530_v40 = vadd.f32 %v5318_v39, %v7595_v55  ;;  %v524_v41 = vpop.f32.mrb[11].mxu0  ;;  %v7660_v42 = vsel %vm937_vm2, %v948_v35, %v949_v33  ;;  %v7663_v43 = vsel %vm1517_vm3, %v1528_v36, %v1529_v37  ;;  %v828_v44 = vsel %vm801_vm0, %v7654_v34, 0.0 }
 0x121   : > { %9377 = vst [vmem:[#allocation9_spill] sm:$0xff] %v7660_v42  ;;  %v827_v45 = vsel %vm812_vm1, %v751_v38, 0.0  ;;  %v525_v46 = vadd.f32 %v7595_v55, %v524_v41  ;;  %5420 = vmatprep.mubr.f32.mxu0 %v7660_v42  ;;  %5580 = vmatprep.mubr.f32.mxu1 %v7663_v43  ;;  %v953_v53 = vrot.slane %v828_v44, 1  ;;  %v1533_v8 = vrot.slane %v828_v44, 2 }
 0x122   : > { %v951_v47 = vrot.slane %v827_v45, 1  ;;  %v1531_v48 = vrot.slane %v827_v45, 2  ;;  %v754_v49 = vmax.f32 %v530_v40, 0.0 }
 0x123   : > { %v7673_v50 = vmax.f32 %v525_v46, 0.0  ;;  %v5321_v52 = vpop.f32.mrb[12].mxu0 }
 0x124   : > { %v830_v54 = vsel %vm812_vm1, %v754_v49, 0.0  ;;  %v540_v57 = vadd.f32 %v5321_v52, %v7595_v55  ;;  %v534_v58 = vpop.f32.mrb[13].mxu0  ;;  %v7679_v61 = vsel %vm937_vm2, %v949_v33, %v951_v47  ;;  %v7682_v1 = vsel %vm1517_vm3, %v1529_v37, %v1531_v48 }
 0x125   : > { %9378 = vst [vmem:[#allocation10_spill] sm:$0xff] %v7679_v61  ;;  %v956_v2 = vrot.slane %v830_v54, 1  ;;  %v1536_v3 = vrot.slane %v830_v54, 2  ;;  %v535_v4 = vadd.f32 %v7595_v55, %v534_v58  ;;  %5421 = vmatmul.mubr.f32.gmra.mrb[58].mxu0 %v7679_v61  ;;  %5581 = vmatmul.mubr.f32.gmra.mrb[4].mxu1 %v7682_v1  ;;  %v954_v5 = vrot.slane %v7673_v50, 1 }
 0x126   : > { %v7688_v7 = vmax.f32 %v540_v57, 0.0  ;;  %v1534_v9 = vrot.slane %v7673_v50, 2 }
 0x127   : > { %v7691_v11 = vmax.f32 %v535_v4, 0.0  ;;  %v5324_v12 = vpop.f32.mrb[14].mxu0  ;;  %v7694_v13 = vsel %vm937_vm2, %v953_v53, %v954_v5  ;;  %v7697_v14 = vsel %vm937_vm2, %v954_v5, %v956_v2 }
 0x128   : > { %9379 = vst [vmem:[#allocation11_spill] sm:$0xff] %v7694_v13  ;;  %9380 = vst [vmem:[#allocation12_spill] sm:$0xff] %v7697_v14  ;;  %v550_v15 = vadd.f32 %v5324_v12, %v7595_v55  ;;  %v544_v16 = vpop.f32.mrb[15].mxu0  ;;  %5423 = vmatprep.mubr.f32.mxu0 %v7694_v13  ;;  %v7702_v17 = vsel %vm1517_vm3, %v1533_v8, %v1534_v9  ;;  %v7705_v18 = vsel %vm1517_vm3, %v1534_v9, %v1536_v3 }
 0x129   : > { %v545_v19 = vadd.f32 %v7595_v55, %v544_v16  ;;  %5583 = vmatprep.mubr.f32.mxu1 %v7702_v17  ;;  %5424 = vmatmul.mubr.f32.gmra.mrb[60].mxu0 %v7697_v14  ;;  %v831_v21 = vsel %vm801_vm0, %v7691_v11, 0.0  ;;  %v959_v22 = vrot.slane %v7688_v7, 1  ;;  %v1539_v31 = vrot.slane %v7688_v7, 2 }
 0x12a   : > { %v7714_v24 = vmax.f32 %v550_v15, 0.0  ;;  %5584 = vmatmul.mubr.f32.gmra.mrb[6].mxu1 %v7705_v18  ;;  %v958_v27 = vrot.slane %v831_v21, 1  ;;  %v1538_v28 = vrot.slane %v831_v21, 2 }
 0x12b   : > { %v757_v32 = vmax.f32 %v545_v19, 0.0  ;;  %v5327_v33 = vpop.f32.mrb[16].mxu0 }
 0x12c   : > { %v560_v35 = vadd.f32 %v5327_v33, %v7595_v55  ;;  %v554_v36 = vpop.f32.mrb[17].mxu0  ;;  %v7720_v37 = vsel %vm937_vm2, %v958_v27, %v959_v22  ;;  %v7723_v38 = vsel %vm1517_vm3, %v1538_v28, %v1539_v31  ;;  %v834_v39 = vsel %vm801_vm0, %v7714_v24, 0.0 }
 0x12d   : > { %9381 = vst [vmem:[#allocation13_spill] sm:$0xff] %v7720_v37  ;;  %v833_v40 = vsel %vm812_vm1, %v757_v32, 0.0  ;;  %v555_v41 = vadd.f32 %v7595_v55, %v554_v36  ;;  %5426 = vmatprep.mubr.f32.mxu0 %v7720_v37  ;;  %5586 = vmatprep.mubr.f32.mxu1 %v7723_v38  ;;  %v963_v49 = vrot.slane %v834_v39, 1  ;;  %v1543_v9 = vrot.slane %v834_v39, 2 }
 0x12e   : > { %v961_v44 = vrot.slane %v833_v40, 1  ;;  %v1541_v45 = vrot.slane %v833_v40, 2  ;;  %v760_v46 = vmax.f32 %v560_v35, 0.0 }
 0x12f   : > { %v7733_v47 = vmax.f32 %v555_v41, 0.0  ;;  %v5330_v48 = vpop.f32.mrb[18].mxu0 }
 0x130   : > { %v836_v52 = vsel %vm812_vm1, %v760_v46, 0.0  ;;  %v570_v53 = vadd.f32 %v5330_v48, %v7595_v55  ;;  %v564_v54 = vpop.f32.mrb[19].mxu0  ;;  %v7739_v57 = vsel %vm937_vm2, %v959_v22, %v961_v44  ;;  %v7742_v58 = vsel %vm1517_vm3, %v1539_v31, %v1541_v45 }
 0x131   : > { %9382 = vst [vmem:[#allocation14_spill] sm:$0xff] %v7739_v57  ;;  %v966_v2 = vrot.slane %v836_v52, 1  ;;  %v1546_v3 = vrot.slane %v836_v52, 2  ;;  %v565_v4 = vadd.f32 %v7595_v55, %v564_v54  ;;  %5427 = vmatmul.mubr.f32.gmra.mrb[62].mxu0 %v7739_v57  ;;  %5587 = vmatmul.mubr.f32.gmra.mrb[8].mxu1 %v7742_v58  ;;  %v964_v5 = vrot.slane %v7733_v47, 1 }
 0x132   : > { %v7748_v8 = vmax.f32 %v570_v53, 0.0  ;;  %v1544_v12 = vrot.slane %v7733_v47, 2 }
 0x133   : > { %v7751_v15 = vmax.f32 %v565_v4, 0.0  ;;  %v5333_v16 = vpop.f32.mrb[20].mxu0  ;;  %v7754_v19 = vsel %vm937_vm2, %v963_v49, %v964_v5  ;;  %v7757_v21 = vsel %vm937_vm2, %v964_v5, %v966_v2 }
 0x134   : > { %9383 = vst [vmem:[#allocation15_spill] sm:$0xff] %v7754_v19  ;;  %9384 = vst [vmem:[#allocation16_spill] sm:$0xff] %v7757_v21  ;;  %v580_v22 = vadd.f32 %v5333_v16, %v7595_v55  ;;  %v574_v27 = vpop.f32.mrb[21].mxu0  ;;  %5429 = vmatprep.mubr.f32.mxu0 %v7754_v19  ;;  %v7762_v28 = vsel %vm1517_vm3, %v1543_v9, %v1544_v12  ;;  %v7765_v31 = vsel %vm1517_vm3, %v1544_v12, %v1546_v3 }
 0x135   : > { %9385 = vst [vmem:[#allocation17_spill] sm:$0xff] %v7762_v28  ;;  %9386 = vst [vmem:[#allocation18_spill] sm:$0xff] %v7765_v31  ;;  %v575_v32 = vadd.f32 %v7595_v55, %v574_v27  ;;  %5589 = vmatprep.mubr.f32.mxu1 %v7762_v28  ;;  %5430 = vmatmul.mubr.f32.gmra.mrb[64].mxu0 %v7757_v21  ;;  %v837_v33 = vsel %vm801_vm0, %v7751_v15, 0.0  ;;  %v969_v35 = vrot.slane %v7748_v8, 1  ;;  %v1549_v41 = vrot.slane %v7748_v8, 2 }
 0x136   : > { %v7774_v36 = vmax.f32 %v580_v22, 0.0  ;;  %5590 = vmatmul.mubr.f32.gmra.mrb[10].mxu1 %v7765_v31  ;;  %v968_v39 = vrot.slane %v837_v33, 1  ;;  %v1548_v40 = vrot.slane %v837_v33, 2 }
 0x137   : > { %v763_v44 = vmax.f32 %v575_v32, 0.0  ;;  %v5336_v45 = vpop.f32.mrb[22].mxu0 }
 0x138   : > { %v590_v46 = vadd.f32 %v5336_v45, %v7595_v55  ;;  %v584_v48 = vpop.f32.mrb[23].mxu0  ;;  %v7780_v49 = vsel %vm937_vm2, %v968_v39, %v969_v35  ;;  %v7783_v52 = vsel %vm1517_vm3, %v1548_v40, %v1549_v41  ;;  %v840_v53 = vsel %vm801_vm0, %v7774_v36, 0.0 }
 0x139   : > { %9387 = vst [vmem:[#allocation19_spill] sm:$0xff] %v7780_v49  ;;  %9388 = vst [vmem:[#allocation20_spill] sm:$0xff] %v7783_v52  ;;  %v839_v54 = vsel %vm812_vm1, %v763_v44, 0.0  ;;  %v585_v2 = vadd.f32 %v7595_v55, %v584_v48  ;;  %5432 = vmatprep.mubr.f32.mxu0 %v7780_v49  ;;  %5592 = vmatprep.mubr.f32.mxu1 %v7783_v52  ;;  %v973_v16 = vrot.slane %v840_v53, 1 }
 0x13a   : > { %v971_v3 = vrot.slane %v839_v54, 1  ;;  %v1551_v4 = vrot.slane %v839_v54, 2  ;;  %v766_v5 = vmax.f32 %v590_v46, 0.0  ;;  %v1553_v54 = vrot.slane %v840_v53, 2 }
 0x13b   : > { %v7793_v9 = vmax.f32 %v585_v2, 0.0  ;;  %v5339_v12 = vpop.f32.mrb[24].mxu0 }
 0x13c   : > { %v842_v22 = vsel %vm812_vm1, %v766_v5, 0.0  ;;  %v600_v27 = vadd.f32 %v5339_v12, %v7595_v55  ;;  %v594_v32 = vpop.f32.mrb[25].mxu0  ;;  %v7799_v33 = vsel %vm937_vm2, %v969_v35, %v971_v3  ;;  %v7802_v39 = vsel %vm1517_vm3, %v1549_v41, %v1551_v4 }
 0x13d   : > { %9389 = vst [vmem:[#allocation21_spill] sm:$0xff] %v7799_v33  ;;  %9390 = vst [vmem:[#allocation22_spill] sm:$0xff] %v7802_v39  ;;  %v976_v40 = vrot.slane %v842_v22, 1  ;;  %v1556_v44 = vrot.slane %v842_v22, 2  ;;  %v595_v45 = vadd.f32 %v7595_v55, %v594_v32  ;;  %5433 = vmatmul.mubr.f32.gmra.mrb[66].mxu0 %v7799_v33  ;;  %5593 = vmatmul.mubr.f32.gmra.mrb[12].mxu1 %v7802_v39  ;;  %v974_v46 = vrot.slane %v7793_v9, 1 }
 0x13e   : > { %v7808_v48 = vmax.f32 %v600_v27, 0.0  ;;  %v1554_v2 = vrot.slane %v7793_v9, 2 }
 0x13f   : > { %v7811_v35 = vmax.f32 %v595_v45, 0.0  ;;  %v5342_v3 = vpop.f32.mrb[26].mxu0  ;;  %v7814_v41 = vsel %vm937_vm2, %v973_v16, %v974_v46  ;;  %v7817_v4 = vsel %vm937_vm2, %v974_v46, %v976_v40 }
 0x140   : > { %9391 = vst [vmem:[#allocation23_spill] sm:$0xff] %v7814_v41  ;;  %9392 = vst [vmem:[#allocation24_spill] sm:$0xff] %v7817_v4  ;;  %v610_v5 = vadd.f32 %v5342_v3, %v7595_v55  ;;  %v604_v12 = vpop.f32.mrb[27].mxu0  ;;  %5435 = vmatprep.mubr.f32.mxu0 %v7814_v41  ;;  %v7822_v22 = vsel %vm1517_vm3, %v1553_v54, %v1554_v2  ;;  %v7825_v53 = vsel %vm1517_vm3, %v1554_v2, %v1556_v44 }
 0x141   : > { %9393 = vst [vmem:[#allocation25_spill] sm:$0xff] %v7822_v22  ;;  %9394 = vst [vmem:[#allocation26_spill] sm:$0xff] %v7825_v53  ;;  %v605_v27 = vadd.f32 %v7595_v55, %v604_v12  ;;  %5595 = vmatprep.mubr.f32.mxu1 %v7822_v22  ;;  %5436 = vmatmul.mubr.f32.gmra.mrb[68].mxu0 %v7817_v4  ;;  %v843_v16 = vsel %vm801_vm0, %v7811_v35, 0.0  ;;  %v979_v32 = vrot.slane %v7808_v48, 1  ;;  %v1559_v44 = vrot.slane %v7808_v48, 2 }
 0x142   : > { %v7834_v40 = vmax.f32 %v610_v5, 0.0  ;;  %5596 = vmatmul.mubr.f32.gmra.mrb[14].mxu1 %v7825_v53  ;;  %v978_v45 = vrot.slane %v843_v16, 1  ;;  %v1558_v46 = vrot.slane %v843_v16, 2 }
 0x143   : > { %v769_v54 = vmax.f32 %v605_v27, 0.0  ;;  %v5345_v2 = vpop.f32.mrb[28].mxu0 }
 0x144   : > { %v620_v3 = vadd.f32 %v5345_v2, %v7595_v55  ;;  %v614_v12 = vpop.f32.mrb[29].mxu0  ;;  %v7840_v59 = vsel %vm937_vm2, %v978_v45, %v979_v32  ;;  %v7843_v60 = vsel %vm1517_vm3, %v1558_v46, %v1559_v44  ;;  %v846_v5 = vsel %vm801_vm0, %v7834_v40, 0.0 }
 0x145   : > { %9395 = vst [vmem:[#allocation27_spill] sm:$0xff] %v7840_v59  ;;  %9396 = vst [vmem:[#allocation28_spill] sm:$0xff] %v7843_v60  ;;  %v845_v16 = vsel %vm812_vm1, %v769_v54, 0.0  ;;  %v615_v0 = vadd.f32 %v7595_v55, %v614_v12  ;;  %5438 = vmatprep.mubr.f32.mxu0 %v7840_v59  ;;  %5598 = vmatprep.mubr.f32.mxu1 %v7843_v60  ;;  %v983_v29 = vrot.slane %v846_v5, 1 }
 0x146   : > { %v981_v27 = vrot.slane %v845_v16, 1  ;;  %v1561_v2 = vrot.slane %v845_v16, 2  ;;  %v772_v45 = vmax.f32 %v620_v3, 0.0 }
 0x147   : > { %v7853_v30 = vmax.f32 %v615_v0, 0.0  ;;  %v5348_v46 = vpop.f32.mrb[30].mxu0 }
 0x148   : > { %v848_v4 = vsel %vm812_vm1, %v772_v45, 0.0  ;;  %v630_v41 = vadd.f32 %v5348_v46, %v7595_v55  ;;  %v624_v53 = vpop.f32.mrb[31].mxu0  ;;  %v7859_v54 = vsel %vm937_vm2, %v979_v32, %v981_v27  ;;  %v7862_v12 = vsel %vm1517_vm3, %v1559_v44, %v1561_v2 }
 0x149   : > { %9397 = vst [vmem:[#allocation29_spill] sm:$0xff] %v7859_v54  ;;  %9398 = vst [vmem:[#allocation30_spill] sm:$0xff] %v7862_v12  ;;  %v986_v59 = vrot.slane %v848_v4, 1  ;;  %v1566_v60 = vrot.slane %v848_v4, 2  ;;  %v625_v3 = vadd.f32 %v7595_v55, %v624_v53  ;;  %5439 = vmatmul.mubr.f32.gmra.mrb[70].mxu0 %v7859_v54  ;;  %5599 = vmatmul.mubr.f32.gmra.mrb[16].mxu1 %v7862_v12  ;;  %v984_v0 = vrot.slane %v7853_v30, 1 }
 0x14a   : > { %v7868_v16 = vmax.f32 %v630_v41, 0.0  ;;  %v1563_v45 = vrot.slane %v846_v5, 2  ;;  %v1564_v46 = vrot.slane %v7853_v30, 2 }
 0x14b   : > { %v7871_v32 = vmax.f32 %v625_v3, 0.0  ;;  %v5351_v27 = vpop.f32.mrb[32].mxu0  ;;  %v7874_v44 = vsel %vm937_vm2, %v983_v29, %v984_v0  ;;  %v7877_v4 = vsel %vm937_vm2, %v984_v0, %v986_v59 }
 0x14c   : > { %9399 = vst [vmem:[#allocation31_spill] sm:$0xff] %v7874_v44  ;;  %9400 = vst [vmem:[#allocation32_spill] sm:$0xff] %v7877_v4  ;;  %v640_v53 = vadd.f32 %v5351_v27, %v7595_v55  ;;  %v634_v2 = vpop.f32.mrb[33].mxu0  ;;  %5441 = vmatprep.mubr.f32.mxu0 %v7874_v44  ;;  %v7882_v41 = vsel %vm1517_vm3, %v1563_v45, %v1564_v46  ;;  %v7885_v5 = vsel %vm1517_vm3, %v1564_v46, %v1566_v60 }
 0x14d   : > { %9401 = vst [vmem:[#allocation33_spill] sm:$0xff] %v7882_v41  ;;  %9402 = vst [vmem:[#allocation34_spill] sm:$0xff] %v7885_v5  ;;  %v635_v3 = vadd.f32 %v7595_v55, %v634_v2  ;;  %5601 = vmatprep.mubr.f32.mxu1 %v7882_v41  ;;  %5442 = vmatmul.mubr.f32.gmra.mrb[72].mxu0 %v7877_v4  ;;  %v849_v59 = vsel %vm801_vm0, %v7871_v32, 0.0  ;;  %v989_v29 = vrot.slane %v7868_v16, 1  ;;  %v1569_v60 = vrot.slane %v7868_v16, 2 }
 0x14e   : > { %v7894_v0 = vmax.f32 %v640_v53, 0.0  ;;  %5602 = vmatmul.mubr.f32.gmra.mrb[18].mxu1 %v7885_v5  ;;  %v988_v45 = vrot.slane %v849_v59, 1  ;;  %v1568_v27 = vrot.slane %v849_v59, 2 }
 0x14f   : > { %v775_v46 = vmax.f32 %v635_v3, 0.0  ;;  %v5354_v2 = vpop.f32.mrb[34].mxu0 }
 0x150   : > { %v650_v44 = vadd.f32 %v5354_v2, %v7595_v55  ;;  %v644_v54 = vpop.f32.mrb[35].mxu0  ;;  %v7900_v4 = vsel %vm937_vm2, %v988_v45, %v989_v29  ;;  %v7903_v41 = vsel %vm1517_vm3, %v1568_v27, %v1569_v60  ;;  %v852_v53 = vsel %vm801_vm0, %v7894_v0, 0.0 }
 0x151   : > { %9403 = vst [vmem:[#allocation35_spill] sm:$0xff] %v7900_v4  ;;  %9404 = vst [vmem:[#allocation36_spill] sm:$0xff] %v7903_v41  ;;  %v851_v59 = vsel %vm812_vm1, %v775_v46, 0.0  ;;  %v645_v5 = vadd.f32 %v7595_v55, %v644_v54  ;;  %5444 = vmatprep.mubr.f32.mxu0 %v7900_v4  ;;  %5604 = vmatprep.mubr.f32.mxu1 %v7903_v41  ;;  %v993_v33 = vrot.slane %v852_v53, 1 }
 0x152   : > { %v991_v3 = vrot.slane %v851_v59, 1  ;;  %v1571_v2 = vrot.slane %v851_v59, 2  ;;  %v778_v45 = vmax.f32 %v650_v44, 0.0 }
 0x153   : > { %v7913_v12 = vmax.f32 %v645_v5, 0.0  ;;  %v5357_v27 = vpop.f32.mrb[36].mxu0 }
 0x154   : > { %v854_v22 = vsel %vm812_vm1, %v778_v45, 0.0  ;;  %v660_v49 = vadd.f32 %v5357_v27, %v7595_v55  ;;  %v654_v39 = vpop.f32.mrb[37].mxu0  ;;  %v7919_v46 = vsel %vm937_vm2, %v989_v29, %v991_v3  ;;  %v7922_v54 = vsel %vm1517_vm3, %v1569_v60, %v1571_v2 }
 0x155   : > { %9405 = vst [vmem:[#allocation37_spill] sm:$0xff] %v7919_v46  ;;  %9406 = vst [vmem:[#allocation38_spill] sm:$0xff] %v7922_v54  ;;  %v996_v4 = vrot.slane %v854_v22, 1  ;;  %v1576_v41 = vrot.slane %v854_v22, 2  ;;  %v655_v44 = vadd.f32 %v7595_v55, %v654_v39  ;;  %5445 = vmatmul.mubr.f32.gmra.mrb[74].mxu0 %v7919_v46  ;;  %5605 = vmatmul.mubr.f32.gmra.mrb[20].mxu1 %v7922_v54  ;;  %v994_v5 = vrot.slane %v7913_v12, 1 }
 0x156   : > { %v7928_v59 = vmax.f32 %v660_v49, 0.0  ;;  %v1573_v45 = vrot.slane %v852_v53, 2  ;;  %v1574_v27 = vrot.slane %v7913_v12, 2 }
 0x157   : > { %v7931_v29 = vmax.f32 %v655_v44, 0.0  ;;  %v5360_v3 = vpop.f32.mrb[38].mxu0  ;;  %v7934_v60 = vsel %vm937_vm2, %v993_v33, %v994_v5  ;;  %v7937_v22 = vsel %vm937_vm2, %v994_v5, %v996_v4 }
 0x158   : > { %9407 = vst [vmem:[#allocation39_spill] sm:$0xff] %v7928_v59  ;;  %9408 = vst [vmem:[#allocation40_spill] sm:$0xff] %v7934_v60  ;;  %v670_v39 = vadd.f32 %v5360_v3, %v7595_v55  ;;  %v664_v2 = vpop.f32.mrb[39].mxu0  ;;  %5447 = vmatprep.mubr.f32.mxu0 %v7934_v60  ;;  %v7942_v49 = vsel %vm1517_vm3, %v1573_v45, %v1574_v27  ;;  %v7945_v53 = vsel %vm1517_vm3, %v1574_v27, %v1576_v41 }
 0x159   : > { %9409 = vst [vmem:[#allocation41_spill] sm:$0xff] %v7937_v22  ;;  %9410 = vst [vmem:[#allocation42_spill] sm:$0xff] %v7942_v49  ;;  %v665_v44 = vadd.f32 %v7595_v55, %v664_v2  ;;  %5607 = vmatprep.mubr.f32.mxu1 %v7942_v49  ;;  %5448 = vmatmul.mubr.f32.gmra.mrb[76].mxu0 %v7937_v22  ;;  %v855_v33 = vsel %vm801_vm0, %v7931_v29, 0.0  ;;  %v999_v4 = vrot.slane %v7928_v59, 1  ;;  %v1579_v41 = vrot.slane %v7928_v59, 2 }
 0x15a   : > { %9411 = vst [vmem:[#allocation43_spill] sm:$0xff] %v7945_v53  ;;  %v7954_v5 = vmax.f32 %v670_v39, 0.0  ;;  %5608 = vmatmul.mubr.f32.gmra.mrb[22].mxu1 %v7945_v53  ;;  %v998_v45 = vrot.slane %v855_v33, 1  ;;  %v1578_v3 = vrot.slane %v855_v33, 2 }
 0x15b   : > { %v781_v27 = vmax.f32 %v665_v44, 0.0  ;;  %v5363_v2 = vpop.f32.mrb[40].mxu0 }
 0x15c   : > { %9412 = vst [vmem:[#allocation44_spill] sm:$0xff] %v7954_v5  ;;  %v680_v60 = vadd.f32 %v5363_v2, %v7595_v55  ;;  %v674_v46 = vpop.f32.mrb[41].mxu0  ;;  %v7960_v22 = vsel %vm937_vm2, %v998_v45, %v999_v4  ;;  %v7963_v49 = vsel %vm1517_vm3, %v1578_v3, %v1579_v41  ;;  %v858_v39 = vsel %vm801_vm0, %v7954_v5, 0.0 }
 0x15d   : > { %9413 = vst [vmem:[#allocation45_spill] sm:$0xff] %v7960_v22  ;;  %9414 = vst [vmem:[#allocation46_spill] sm:$0xff] %v7963_v49  ;;  %v857_v33 = vsel %vm812_vm1, %v781_v27, 0.0  ;;  %v675_v53 = vadd.f32 %v7595_v55, %v674_v46  ;;  %5450 = vmatprep.mubr.f32.mxu0 %v7960_v22  ;;  %5610 = vmatprep.mubr.f32.mxu1 %v7963_v49  ;;  %v1003_v21 = vrot.slane %v858_v39, 1 }
 0x15e   : > { %v1001_v44 = vrot.slane %v857_v33, 1  ;;  %v1581_v2 = vrot.slane %v857_v33, 2  ;;  %v784_v45 = vmax.f32 %v680_v60, 0.0 }
 0x15f   : > { %v7973_v54 = vmax.f32 %v675_v53, 0.0  ;;  %v5366_v3 = vpop.f32.mrb[42].mxu0 }
 0x160   : > { %v860_v52 = vsel %vm812_vm1, %v784_v45, 0.0  ;;  %v690_v19 = vadd.f32 %v5366_v3, %v7595_v55  ;;  %v684_v31 = vpop.f32.mrb[43].mxu0  ;;  %v7979_v27 = vsel %vm937_vm2, %v999_v4, %v1001_v44  ;;  %v7982_v46 = vsel %vm1517_vm3, %v1579_v41, %v1581_v2 }
 0x161   : > { %9415 = vst [vmem:[#allocation47_spill] sm:$0xff] %v7973_v54  ;;  %9416 = vst [vmem:[#allocation48_spill] sm:$0xff] %v7979_v27  ;;  %v1006_v49 = vrot.slane %v860_v52, 1  ;;  %v1586_v22 = vrot.slane %v860_v52, 2  ;;  %v685_v60 = vadd.f32 %v7595_v55, %v684_v31  ;;  %5451 = vmatmul.mubr.f32.gmra.mrb[78].mxu0 %v7979_v27  ;;  %5611 = vmatmul.mubr.f32.gmra.mrb[24].mxu1 %v7982_v46  ;;  %v1004_v53 = vrot.slane %v7973_v54, 1 }
 0x162   : > { %9417 = vst [vmem:[#allocation49_spill] sm:$0xff] %v7982_v46  ;;  %v7988_v33 = vmax.f32 %v690_v19, 0.0  ;;  %v1583_v45 = vrot.slane %v858_v39, 2  ;;  %v1584_v3 = vrot.slane %v7973_v54, 2 }
 0x163   : > { %v7991_v4 = vmax.f32 %v685_v60, 0.0  ;;  %v5369_v44 = vpop.f32.mrb[44].mxu0  ;;  %v7994_v41 = vsel %vm937_vm2, %v1003_v21, %v1004_v53  ;;  %v7997_v52 = vsel %vm937_vm2, %v1004_v53, %v1006_v49 }
 0x164   : > { %9418 = vst [vmem:[#allocation50_spill] sm:$0xff] %v7988_v33  ;;  %9420 = vst [vmem:[#allocation52_spill] sm:$0xff] %v7994_v41  ;;  %v700_v31 = vadd.f32 %v5369_v44, %v7595_v55  ;;  %v694_v2 = vpop.f32.mrb[45].mxu0  ;;  %5453 = vmatprep.mubr.f32.mxu0 %v7994_v41  ;;  %v8002_v19 = vsel %vm1517_vm3, %v1583_v45, %v1584_v3  ;;  %v8005_v39 = vsel %vm1517_vm3, %v1584_v3, %v1586_v22 }
 0x165   : > { %9419 = vst [vmem:[#allocation51_spill] sm:$0xff] %v7991_v4  ;;  %9421 = vst [vmem:[#allocation53_spill] sm:$0xff] %v7997_v52  ;;  %v695_v60 = vadd.f32 %v7595_v55, %v694_v2  ;;  %5613 = vmatprep.mubr.f32.mxu1 %v8002_v19  ;;  %5454 = vmatmul.mubr.f32.gmra.mrb[80].mxu0 %v7997_v52  ;;  %v861_v21 = vsel %vm801_vm0, %v7991_v4, 0.0  ;;  %v1009_v49 = vrot.slane %v7988_v33, 1  ;;  %v1589_v22 = vrot.slane %v7988_v33, 2 }
 0x166   : > { %9422 = vst [vmem:[#allocation54_spill] sm:$0xff] %v8002_v19  ;;  %9423 = vst [vmem:[#allocation55_spill] sm:$0xff] %v8005_v39  ;;  %v8014_v53 = vmax.f32 %v700_v31, 0.0  ;;  %5614 = vmatmul.mubr.f32.gmra.mrb[26].mxu1 %v8005_v39  ;;  %v1008_v45 = vrot.slane %v861_v21, 1  ;;  %v1588_v44 = vrot.slane %v861_v21, 2 }
 0x167   : > { %v787_v3 = vmax.f32 %v695_v60, 0.0  ;;  %v5372_v2 = vpop.f32.mrb[46].mxu0 }
 0x168   : > { %9424 = vst [vmem:[#allocation56_spill] sm:$0xff] %v8014_v53  ;;  %v710_v19 = vadd.f32 %v5372_v2, %v7595_v55  ;;  %v704_v46 = vpop.f32.mrb[47].mxu0  ;;  %v8020_v52 = vsel %vm937_vm2, %v1008_v45, %v1009_v49  ;;  %v8023_v41 = vsel %vm1517_vm3, %v1588_v44, %v1589_v22  ;;  %v864_v31 = vsel %vm801_vm0, %v8014_v53, 0.0 }
 0x169   : > { %9425 = vst [vmem:[#allocation57_spill] sm:$0xff] %v8023_v41  ;;  %v863_v21 = vsel %vm812_vm1, %v787_v3, 0.0  ;;  %v705_v39 = vadd.f32 %v7595_v55, %v704_v46  ;;  %5456 = vmatprep.mubr.f32.mxu0 %v8020_v52  ;;  %5616 = vmatprep.mubr.f32.mxu1 %v8023_v41  ;;  %v1013_v44 = vrot.slane %v864_v31, 1  ;;  %v1593_v46 = vrot.slane %v864_v31, 2 }
 0x16a   : > { %v1011_v60 = vrot.slane %v863_v21, 1  ;;  %v1591_v2 = vrot.slane %v863_v21, 2  ;;  %v790_v45 = vmax.f32 %v710_v19, 0.0 }
 0x16b   : > { %v8033_v27 = vmax.f32 %v705_v39, 0.0  ;;  %v8035_v57 = vpop.f32.mrb[48].mxu0 }
 0x16c   : > { %v866_v28 = vsel %vm812_vm1, %v790_v45, 0.0  ;;  %v8040_v37 = vsel %vm937_vm2, %v1009_v49, %v1011_v60  ;;  %v8043_v55 = vsel %vm1517_vm3, %v1589_v22, %v1591_v2  ;;  %v8045_v3 = vpop.f32.mrb[49].mxu0  ;;  %v4569_v60 = vld [vmem:[%s9246_s3 + $0x210] sm:$0xff]  ;;  %v4570_v2 = vld [vmem:[%s9246_s3 + $0x218] sm:$0xff] }
 0x16d   : > { %9426 = vst [vmem:[#allocation58_spill] sm:$0xff] %v8033_v27  ;;  %9427 = vst [vmem:[#allocation59_spill] sm:$0xff] %v8040_v37  ;;  %v1016_v41 = vrot.slane %v866_v28, 1  ;;  %v1596_v21 = vrot.slane %v866_v28, 2  ;;  %5457 = vmatmul.mubr.f32.gmra.mrb[82].mxu0 %v8040_v37  ;;  %5617 = vmatmul.mubr.f32.gmra.mrb[28].mxu1 %v8043_v55  ;;  %v1014_v19 = vrot.slane %v8033_v27, 1  ;;  %v1594_v39 = vrot.slane %v8033_v27, 2 }
 0x16f   : > { %v8052_v45 = vsel %vm937_vm2, %v1013_v44, %v1014_v19  ;;  %v8055_v49 = vsel %vm1517_vm3, %v1593_v46, %v1594_v39  ;;  %v8058_v22 = vsel %vm937_vm2, %v1014_v19, %v1016_v41  ;;  %v8061_v31 = vsel %vm1517_vm3, %v1594_v39, %v1596_v21  ;;  %v5378_v28 = vpop.f32.mrb[50].mxu0  ;;  %v4648_v19 = vld [vmem:[%s9246_s3 + $0x410] sm:$0xff]  ;;  %v4649_v39 = vld [vmem:[%s9246_s3 + $0x418] sm:$0xff] }
 0x170   : > { %9428 = vst [vmem:[#allocation60_spill] sm:$0xff] %v8052_v45  ;;  %9429 = vst [vmem:[#allocation61_spill] sm:$0xff] %v8058_v22  ;;  %5459 = vmatprep.mubr.f32.mxu0 %v8052_v45  ;;  %5619 = vmatprep.mubr.f32.mxu1 %v8055_v49  ;;  %v8071_v44 = vpop.f32.mrb[51].mxu0  ;;  %v9431_v41 = vmov 0.0   ;;  %v6426_v46 = vpack.c.bf16 %v4570_v2, %v4569_v60  ;;  %v4572_v60 = vld [vmem:[%s9246_s3 + $0x228] sm:$0xff]  ;;  %v8100_v2 = vpack.c.bf16 %v4649_v39, %v4648_v19  ;;  %v4652_v39 = vld [vmem:[%s9246_s3 + $0x430] sm:$0xff] }
 0x171   : > { %9430 = vst [vmem:[#allocation62_spill] sm:$0xff] %v8061_v31  ;;  %5460 = vmatmul.mubr.f32.gmra.mrb[84].mxu0 %v8058_v22  ;;  %5620 = vmatmul.mubr.f32.gmra.mrb[30].mxu1 %v8061_v31  ;;  %v4571_v31 = vld [vmem:[%s9246_s3 + $0x220] sm:$0xff] }
 0x172   : > { %5654 = vmatprep.mubr.msk.f32.mxu1 %vm801_vm0, %v7603_v63  ;;  %5494 = vmatprep.mubr.f32.mxu0 %v9431_v41  ;;  %9432 = vst [vmem:[#allocation63_spill] sm:$0xff] %v8100_v2 }
 0x173   : > { %v5381_v21 = vpop.f32.mrb[52].mxu0 }
 0x174   : > { %v734_v28 = vpop.f32.mrb[53].mxu0  ;;  %v6430_v21 = vpack.c.bf16 %v4572_v60, %v4571_v31  ;;  %v4574_v31 = vld [vmem:[%s9246_s3 + $0x238] sm:$0xff] }
 0x175   : > { %5495 = vmatmul.mubr.f32.vlgmr.msra.gmra.mrb[54].mxu0 %v9431_v41  ;;  %5655 = vmatmul.mubr.f32.vlgmr.msra.gmra.mrb[0].mxu1 %v7621_v10  ;;  %v4650_v28 = vld [vmem:[%s9246_s3 + $0x420] sm:$0xff]  ;;  %v4653_v60 = vld [vmem:[%s9246_s3 + $0x438] sm:$0xff]  ;;  %v4600_v41 = vld [vmem:[%s9246_s3 + $0x308] sm:$0xff] }
 0x176   : > { %6425 = vmatpush3.bf16.msra.mxu1 %v7589_v51  ;;  %5497 = vmatprep.mubr.msk.f32.mxu0 %vm801_vm0, %v7603_v63  ;;  %v4651_v51 = vld [vmem:[%s9246_s3 + $0x428] sm:$0xff]  ;;  %v4573_v63 = vld [vmem:[%s9246_s3 + $0x230] sm:$0xff] }
 0x177   : > { %5657 = vmatprep.mubr.msk.f32.mxu1 %vm801_vm0, %v7631_v23  ;;  %6427 = vmatprep.subr.bf16.mxu1 %v6426_v46  ;;  %v6434_v19 = vpack.c.bf16 %v4574_v31, %v4573_v63  ;;  %v4654_v31 = vld [vmem:[%s9246_s3 + $0x440] sm:$0xff] }
 0x178   : > { %6553 = vmatpush3.bf16.msra.mxu0 %v7613_v6 }
 0x179   : > { %5498 = vmatmul.mubr.f32.gmra.mrb[56].mxu0 %v7621_v10  ;;  %5658 = vmatmul.mubr.f32.gmra.mrb[2].mxu1 %v7628_v20  ;;  %v8124_v10 = vpack.c.bf16 %v4651_v51, %v4650_v28  ;;  %v4576_v28 = vld [vmem:[%s9246_s3 + $0x248] sm:$0xff]  ;;  %v8148_v51 = vpack.c.bf16 %v4653_v60, %v4652_v39  ;;  %v4578_v39 = vld [vmem:[%s9246_s3 + $0x258] sm:$0xff] }
 0x17a   : > { %5500 = vmatprep.mubr.msk.f32.mxu0 %vm801_vm0, %v7631_v23  ;;  %5660 = vmatprep.mubr.msk.f32.mxu1 %vm801_vm0, %v7654_v34 }
 0x17b   : > { %6429 = vmatpush3.bf16.msra.mxu1 %v6426_v46  ;;  %6555 = vmatprep.subr.bf16.mxu0 %v8100_v2  ;;  %9433 = vst [vmem:[#allocation64_spill] sm:$0xff] %v8124_v10  ;;  %v4575_v46 = vld [vmem:[%s9246_s3 + $0x240] sm:$0xff]  ;;  %9434 = vst [vmem:[#allocation65_spill] sm:$0xff] %v8148_v51 }
 0x17c   : > { %6431 = vmatprep.subr.bf16.mxu1 %v6430_v21  ;;  %6557 = vmatpush3.bf16.msra.mxu0 %v8100_v2  ;;  %v6438_v63 = vpack.c.bf16 %v4576_v28, %v4575_v46  ;;  %v4655_v2 = vld [vmem:[%s9246_s3 + $0x448] sm:$0xff]  ;;  %v4656_v28 = vld [vmem:[%s9246_s3 + $0x450] sm:$0xff] }
 0x17d   : > { %5501 = vmatmul.mubr.f32.gmra.mrb[58].mxu0 %v7628_v20  ;;  %5661 = vmatmul.mubr.f32.gmra.mrb[4].mxu1 %v7673_v50  ;;  %v8172_v60 = vpack.c.bf16 %v4655_v2, %v4654_v31  ;;  %v4579_v2 = vld [vmem:[%s9246_s3 + $0x260] sm:$0xff] }
 0x17e   : > { %5503 = vmatprep.mubr.msk.f32.mxu0 %vm801_vm0, %v7654_v34  ;;  %5663 = vmatprep.mubr.msk.f32.mxu1 %vm801_vm0, %v7691_v11 }
 0x17f   : > { %6433 = vmatpush3.bf16.msra.mxu1 %v6430_v21  ;;  %6559 = vmatprep.subr.bf16.mxu0 %v8124_v10  ;;  %v4577_v21 = vld [vmem:[%s9246_s3 + $0x250] sm:$0xff]  ;;  %9435 = vst [vmem:[#allocation66_spill] sm:$0xff] %v8172_v60 }
 0x180   : > { %6435 = vmatprep.subr.bf16.mxu1 %v6434_v19  ;;  %6561 = vmatpush3.bf16.msra.mxu0 %v8124_v10  ;;  %v6442_v46 = vpack.c.bf16 %v4578_v39, %v4577_v21  ;;  %v4657_v10 = vld [vmem:[%s9246_s3 + $0x458] sm:$0xff]  ;;  %v4658_v39 = vld [vmem:[%s9246_s3 + $0x460] sm:$0xff] }
 0x181   : > { %5504 = vmatmul.mubr.f32.gmra.mrb[60].mxu0 %v7673_v50  ;;  %5664 = vmatmul.mubr.f32.gmra.mrb[6].mxu1 %v7688_v7  ;;  %v8196_v31 = vpack.c.bf16 %v4657_v10, %v4656_v28  ;;  %v4581_v10 = vld [vmem:[%s9246_s3 + $0x270] sm:$0xff] }
 0x182   : > { %5506 = vmatprep.mubr.msk.f32.mxu0 %vm801_vm0, %v7691_v11  ;;  %5666 = vmatprep.mubr.msk.f32.mxu1 %vm801_vm0, %v7714_v24 }
 0x183   : > { %6437 = vmatpush3.bf16.msra.mxu1 %v6434_v19  ;;  %6563 = vmatprep.subr.bf16.mxu0 %v8148_v51  ;;  %v4580_v19 = vld [vmem:[%s9246_s3 + $0x268] sm:$0xff]  ;;  %9436 = vst [vmem:[#allocation67_spill] sm:$0xff] %v8196_v31 }
 0x184   : > { %6439 = vmatprep.subr.bf16.mxu1 %v6438_v63  ;;  %6565 = vmatpush3.bf16.msra.mxu0 %v8148_v51  ;;  %v6446_v21 = vpack.c.bf16 %v4580_v19, %v4579_v2  ;;  %v4659_v51 = vld [vmem:[%s9246_s3 + $0x468] sm:$0xff]  ;;  %v4660_v19 = vld [vmem:[%s9246_s3 + $0x470] sm:$0xff] }
 0x185   : > { %5507 = vmatmul.mubr.f32.gmra.mrb[62].mxu0 %v7688_v7  ;;  %5667 = vmatmul.mubr.f32.gmra.mrb[8].mxu1 %v7733_v47  ;;  %v8220_v28 = vpack.c.bf16 %v4659_v51, %v4658_v39  ;;  %v4583_v51 = vld [vmem:[%s9246_s3 + $0x280] sm:$0xff] }
 0x186   : > { %5509 = vmatprep.mubr.msk.f32.mxu0 %vm801_vm0, %v7714_v24  ;;  %5669 = vmatprep.mubr.msk.f32.mxu1 %vm801_vm0, %v7751_v15 }
 0x187   : > { %6441 = vmatpush3.bf16.msra.mxu1 %v6438_v63  ;;  %6567 = vmatprep.subr.bf16.mxu0 %v8172_v60  ;;  %v4582_v63 = vld [vmem:[%s9246_s3 + $0x278] sm:$0xff]  ;;  %9437 = vst [vmem:[#allocation68_spill] sm:$0xff] %v8220_v28 }
 0x188   : > { %6443 = vmatprep.subr.bf16.mxu1 %v6442_v46  ;;  %6569 = vmatpush3.bf16.msra.mxu0 %v8172_v60  ;;  %v6450_v2 = vpack.c.bf16 %v4582_v63, %v4581_v10  ;;  %v4661_v60 = vld [vmem:[%s9246_s3 + $0x478] sm:$0xff] }
 0x189   : > { %5510 = vmatmul.mubr.f32.gmra.mrb[64].mxu0 %v7733_v47  ;;  %5670 = vmatmul.mubr.f32.gmra.mrb[10].mxu1 %v7748_v8  ;;  %v8244_v39 = vpack.c.bf16 %v4661_v60, %v4660_v19  ;;  %v8300_v60 = vld [vmem:[%s9245_s2] ss:$0 sm:$0xff]  ;;  %v4585_v19 = vld [vmem:[%s9246_s3 + $0x290] sm:$0xff] }
 0x18a   : > { %5512 = vmatprep.mubr.msk.f32.mxu0 %vm801_vm0, %v7751_v15  ;;  %5672 = vmatprep.mubr.msk.f32.mxu1 %vm801_vm0, %v7774_v36 }
 0x18b   : > { %6445 = vmatpush3.bf16.msra.mxu1 %v6442_v46  ;;  %6571 = vmatprep.subr.bf16.mxu0 %v8196_v31  ;;  %v4584_v46 = vld [vmem:[%s9246_s3 + $0x288] sm:$0xff]  ;;  %9438 = vst [vmem:[#allocation69_spill] sm:$0xff] %v8244_v39 }
 0x18c   : > { %6447 = vmatprep.subr.bf16.mxu1 %v6446_v21  ;;  %6573 = vmatpush3.bf16.msra.mxu0 %v8196_v31  ;;  %v6454_v10 = vpack.c.bf16 %v4584_v46, %v4583_v51  ;;  %v4587_v46 = vld [vmem:[%s9246_s3 + $0x2a0] sm:$0xff]  ;;  %v9443_v31 = vld [vmem:[#allocation15_spill] sm:$0xff] }
 0x18d   : > { %5513 = vmatmul.mubr.f32.gmra.mrb[66].mxu0 %v7748_v8  ;;  %5673 = vmatmul.mubr.f32.gmra.mrb[12].mxu1 %v7793_v9 }
 0x18e   : > { %5515 = vmatprep.mubr.msk.f32.mxu0 %vm801_vm0, %v7774_v36  ;;  %5675 = vmatprep.mubr.msk.f32.mxu1 %vm801_vm0, %v7811_v35 }
 0x18f   : > { %6449 = vmatpush3.bf16.msra.mxu1 %v6446_v21  ;;  %6575 = vmatprep.subr.bf16.mxu0 %v8220_v28  ;;  %v715_v21 = vadd.f32 %v8300_v60, %v8045_v3 }
 0x190   : > { %6451 = vmatprep.subr.bf16.mxu1 %v6450_v2  ;;  %6577 = vmatpush3.bf16.msra.mxu0 %v8220_v28  ;;  %v4594_v28 = vld [vmem:[%s9246_s3 + $0x2d8] sm:$0xff] }
 0x191   : > { %5516 = vmatmul.mubr.f32.gmra.mrb[68].mxu0 %v7793_v9  ;;  %5676 = vmatmul.mubr.f32.gmra.mrb[14].mxu1 %v7808_v48  ;;  %v8306_v63 = vmax.f32 %v715_v21, 0.0  ;;  %v4588_v21 = vld [vmem:[%s9246_s3 + $0x2a8] sm:$0xff] }
 0x192   : > { %5518 = vmatprep.mubr.msk.f32.mxu0 %vm801_vm0, %v7811_v35  ;;  %5678 = vmatprep.mubr.msk.f32.mxu1 %vm801_vm0, %v7834_v40 }
 0x193   : > { %6453 = vmatpush3.bf16.msra.mxu1 %v6450_v2  ;;  %6579 = vmatprep.subr.bf16.mxu0 %v8244_v39  ;;  %v720_v2 = vadd.f32 %v8300_v60, %v8035_v57  ;;  %v4586_v57 = vld [vmem:[%s9246_s3 + $0x298] sm:$0xff] }
 0x194   : > { %6581 = vmatpush3.bf16.msra.mxu0 %v8244_v39  ;;  %6455 = vmatprep.subr.bf16.mxu1 %v6454_v10  ;;  %v6458_v51 = vpack.c.bf16 %v4586_v57, %v4585_v19  ;;  %v4591_v19 = vld [vmem:[%s9246_s3 + $0x2c0] sm:$0xff]  ;;  %v4592_v57 = vld [vmem:[%s9246_s3 + $0x2c8] sm:$0xff]  ;;  %v4593_v39 = vld [vmem:[%s9246_s3 + $0x2d0] sm:$0xff] }
 0x195   : > { %5519 = vmatmul.mubr.f32.gmra.mrb[70].mxu0 %v7808_v48  ;;  %5679 = vmatmul.mubr.f32.gmra.mrb[16].mxu1 %v7853_v30  ;;  %v8324_v3 = vmax.f32 %v720_v2, 0.0  ;;  %v4590_v2 = vld [vmem:[%s9246_s3 + $0x2b8] sm:$0xff] }
 0x196   : > { %5521 = vmatprep.mubr.msk.f32.mxu0 %vm801_vm0, %v7834_v40  ;;  %5681 = vmatprep.mubr.msk.f32.mxu1 %vm801_vm0, %v7871_v32 }
 0x199   : > { %5522 = vmatmul.mubr.f32.gmra.mrb[72].mxu0 %v7853_v30  ;;  %5682 = vmatmul.mubr.f32.gmra.mrb[18].mxu1 %v7868_v16 }
 0x19a   : > { %5524 = vmatprep.mubr.msk.f32.mxu0 %vm801_vm0, %v7871_v32  ;;  %5684 = vmatprep.mubr.msk.f32.mxu1 %vm801_vm0, %v7894_v0 }
 0x19d   : > { %5525 = vmatmul.mubr.f32.gmra.mrb[74].mxu0 %v7868_v16  ;;  %5685 = vmatmul.mubr.f32.gmra.mrb[20].mxu1 %v7913_v12 }
 0x19e   : > { %5527 = vmatprep.mubr.msk.f32.mxu0 %vm801_vm0, %v7894_v0  ;;  %5687 = vmatprep.mubr.msk.f32.mxu1 %vm801_vm0, %v7931_v29 }
 0x1a1   : > { %5528 = vmatmul.mubr.f32.gmra.mrb[76].mxu0 %v7913_v12  ;;  %5688 = vmatmul.mubr.f32.gmra.mrb[22].mxu1 %v7928_v59 }
 0x1a2   : > { %5530 = vmatprep.mubr.msk.f32.mxu0 %vm801_vm0, %v7931_v29  ;;  %5690 = vmatprep.mubr.msk.f32.mxu1 %vm801_vm0, %v7954_v5 }
 0x1a5   : > { %5531 = vmatmul.mubr.f32.gmra.mrb[78].mxu0 %v7928_v59  ;;  %5691 = vmatmul.mubr.f32.gmra.mrb[24].mxu1 %v7973_v54  ;;  %v9472_v59 = vld [vmem:[#allocation53_spill] sm:$0xff] }
 0x1a6   : > { %5533 = vmatprep.mubr.msk.f32.mxu0 %vm801_vm0, %v7954_v5  ;;  %5693 = vmatprep.mubr.msk.f32.mxu1 %vm801_vm0, %v7991_v4  ;;  %v9471_v5 = vld [vmem:[#allocation52_spill] sm:$0xff] }
 0x1a9   : > { %5534 = vmatmul.mubr.f32.gmra.mrb[80].mxu0 %v7973_v54  ;;  %5694 = vmatmul.mubr.f32.gmra.mrb[26].mxu1 %v7988_v33  ;;  %v9464_v54 = vld [vmem:[#allocation42_spill] sm:$0xff] }
 0x1aa   : > { %5536 = vmatprep.mubr.msk.f32.mxu0 %vm801_vm0, %v7991_v4  ;;  %5696 = vmatprep.mubr.msk.f32.mxu1 %vm801_vm0, %v8014_v53  ;;  %v9462_v4 = vld [vmem:[#allocation38_spill] sm:$0xff] }
 0x1ad   : > { %5537 = vmatmul.mubr.f32.gmra.mrb[82].mxu0 %v7988_v33  ;;  %5697 = vmatmul.mubr.f32.gmra.mrb[28].mxu1 %v8033_v27  ;;  %v9461_v33 = vld [vmem:[#allocation32_spill] sm:$0xff] }
 0x1ae   : > { %5539 = vmatprep.mubr.msk.f32.mxu0 %vm801_vm0, %v8014_v53  ;;  %5699 = vmatprep.mubr.msk.f32.mxu1 %vm801_vm0, %v8306_v63  ;;  %v9460_v53 = vld [vmem:[#allocation36_spill] sm:$0xff] }
 0x1b1   : > { %5540 = vmatmul.mubr.f32.gmra.mrb[84].mxu0 %v8033_v27  ;;  %5700 = vmatmul.mubr.f32.gmra.mrb[30].mxu1 %v8324_v3  ;;  %v9455_v27 = vld [vmem:[#allocation27_spill] sm:$0xff] }
 0x1b2   : > { %5734 = vmatprep.mubr.f32.mxu1 %v7634_v25  ;;  %6054 = vmatprep.mubr.f32.mxu0 %v7663_v43  ;;  %v6462_v25 = vpack.c.bf16 %v4588_v21, %v4587_v46  ;;  %v9439_v46 = vld [vmem:[#allocation13_spill] sm:$0xff] }
 0x1b3   : > { %v9440_v21 = vld [vmem:[#allocation17_spill] sm:$0xff] }
 0x1b5   : > { %5735 = vmatmul.mubr.f32.vlgmr.msra.gmra.mrb[0].mxu1 %v7637_v26  ;;  %6055 = vmatmul.mubr.f32.vlgmr.msra.gmra.mrb[86].mxu0 %v7682_v1  ;;  %v4589_v26 = vld [vmem:[%s9246_s3 + $0x2b0] sm:$0xff] }
 0x1b6   : > { %6457 = vmatpush3.bf16.msra.mxu1 %v6454_v10  ;;  %5737 = vmatprep.mubr.f32.mxu1 %v7660_v42  ;;  %v6466_v10 = vpack.c.bf16 %v4590_v2, %v4589_v26  ;;  %v9441_v26 = vld [vmem:[#allocation14_spill] sm:$0xff]  ;;  %v9451_v42 = vld [vmem:[#allocation23_spill] sm:$0xff] }
 0x1b7   : > { %6057 = vmatprep.mubr.f32.mxu0 %v7702_v17  ;;  %6459 = vmatprep.subr.bf16.mxu1 %v6458_v51  ;;  %v9442_v2 = vld [vmem:[#allocation18_spill] sm:$0xff] }
 0x1b9   : > { %5738 = vmatmul.mubr.f32.gmra.mrb[2].mxu1 %v7679_v61  ;;  %6058 = vmatmul.mubr.f32.gmra.mrb[88].mxu0 %v7705_v18  ;;  %v4598_v61 = vld [vmem:[%s9246_s3 + $0x2f8] sm:$0xff] }
 0x1ba   : > { %5740 = vmatprep.mubr.f32.mxu1 %v7694_v13  ;;  %6060 = vmatprep.mubr.f32.mxu0 %v7723_v38  ;;  %v9447_v13 = vld [vmem:[#allocation19_spill] sm:$0xff] }
 0x1bb   : > { %6461 = vmatpush3.bf16.msra.mxu1 %v6458_v51  ;;  %v6470_v51 = vpack.c.bf16 %v4592_v57, %v4591_v19  ;;  %v9445_v19 = vld [vmem:[#allocation16_spill] sm:$0xff]  ;;  %v9446_v57 = vld [vmem:[#allocation22_spill] sm:$0xff] }
 0x1bc   : > { %6463 = vmatprep.subr.bf16.mxu1 %v6462_v25 }
 0x1bd   : > { %5741 = vmatmul.mubr.f32.gmra.mrb[4].mxu1 %v7697_v14  ;;  %6061 = vmatmul.mubr.f32.gmra.mrb[90].mxu0 %v7742_v58  ;;  %v4596_v14 = vld [vmem:[%s9246_s3 + $0x2e8] sm:$0xff] }
 0x1be   : > { %5743 = vmatprep.mubr.f32.mxu1 %v9439_v46  ;;  %6063 = vmatprep.mubr.f32.mxu0 %v9440_v21  ;;  %v9444_v46 = vld [vmem:[#allocation20_spill] sm:$0xff] }
 0x1bf   : > { %6465 = vmatpush3.bf16.msra.mxu1 %v6462_v25  ;;  %v6474_v25 = vpack.c.bf16 %v4594_v28, %v4593_v39  ;;  %v9449_v28 = vld [vmem:[#allocation21_spill] sm:$0xff]  ;;  %v9450_v39 = vld [vmem:[#allocation26_spill] sm:$0xff] }
 0x1c0   : > { %6467 = vmatprep.subr.bf16.mxu1 %v6466_v10 }
 0x1c1   : > { %5744 = vmatmul.mubr.f32.gmra.mrb[6].mxu1 %v9441_v26  ;;  %6064 = vmatmul.mubr.f32.gmra.mrb[92].mxu0 %v9442_v2  ;;  %v4595_v26 = vld [vmem:[%s9246_s3 + $0x2e0] sm:$0xff] }
 0x1c2   : > { %5746 = vmatprep.mubr.f32.mxu1 %v9443_v31  ;;  %6066 = vmatprep.mubr.f32.mxu0 %v9444_v46  ;;  %v9448_v31 = vld [vmem:[#allocation25_spill] sm:$0xff] }
 0x1c3   : > { %6469 = vmatpush3.bf16.msra.mxu1 %v6466_v10  ;;  %v6478_v10 = vpack.c.bf16 %v4596_v14, %v4595_v26  ;;  %v9453_v14 = vld [vmem:[#allocation24_spill] sm:$0xff]  ;;  %v9454_v26 = vld [vmem:[#allocation30_spill] sm:$0xff] }
 0x1c4   : > { %6471 = vmatprep.subr.bf16.mxu1 %v6470_v51 }
 0x1c5   : > { %5747 = vmatmul.mubr.f32.gmra.mrb[8].mxu1 %v9445_v19  ;;  %6067 = vmatmul.mubr.f32.gmra.mrb[94].mxu0 %v9446_v57  ;;  %v4597_v19 = vld [vmem:[%s9246_s3 + $0x2f0] sm:$0xff] }
 0x1c6   : > { %5749 = vmatprep.mubr.f32.mxu1 %v9447_v13  ;;  %6069 = vmatprep.mubr.f32.mxu0 %v9448_v31  ;;  %v9452_v13 = vld [vmem:[#allocation28_spill] sm:$0xff] }
 0x1c7   : > { %6473 = vmatpush3.bf16.msra.mxu1 %v6470_v51  ;;  %v6482_v51 = vpack.c.bf16 %v4598_v61, %v4597_v19  ;;  %v9457_v61 = vld [vmem:[#allocation29_spill] sm:$0xff]  ;;  %v9458_v19 = vld [vmem:[#allocation34_spill] sm:$0xff] }
 0x1c8   : > { %6475 = vmatprep.subr.bf16.mxu1 %v6474_v25 }
 0x1c9   : > { %5750 = vmatmul.mubr.f32.gmra.mrb[10].mxu1 %v9449_v28  ;;  %6070 = vmatmul.mubr.f32.gmra.mrb[96].mxu0 %v9450_v39  ;;  %v4599_v28 = vld [vmem:[%s9246_s3 + $0x300] sm:$0xff] }
 0x1ca   : > { %5752 = vmatprep.mubr.f32.mxu1 %v9451_v42  ;;  %6072 = vmatprep.mubr.f32.mxu0 %v9452_v13  ;;  %v9456_v42 = vld [vmem:[#allocation33_spill] sm:$0xff] }
 0x1cb   : > { %6477 = vmatpush3.bf16.msra.mxu1 %v6474_v25  ;;  %v6486_v25 = vpack.c.bf16 %v4600_v41, %v4599_v28  ;;  %v9466_v41 = vld [vmem:[#allocation43_spill] sm:$0xff]  ;;  %v9467_v28 = vld [vmem:[#allocation40_spill] sm:$0xff] }
 0x1cc   : > { %6479 = vmatprep.subr.bf16.mxu1 %v6478_v10 }
 0x1cd   : > { %5753 = vmatmul.mubr.f32.gmra.mrb[12].mxu1 %v9453_v14  ;;  %6073 = vmatmul.mubr.f32.gmra.mrb[98].mxu0 %v9454_v26  ;;  %v9459_v14 = vld [vmem:[#allocation31_spill] sm:$0xff] }
 0x1ce   : > { %5755 = vmatprep.mubr.f32.mxu1 %v9455_v27  ;;  %6075 = vmatprep.mubr.f32.mxu0 %v9456_v42  ;;  %v9463_v27 = vld [vmem:[#allocation35_spill] sm:$0xff] }
 0x1cf   : > { %6481 = vmatpush3.bf16.msra.mxu1 %v6478_v10  ;;  %v9465_v10 = vld [vmem:[#allocation37_spill] sm:$0xff] }
 0x1d0   : > { %6483 = vmatprep.subr.bf16.mxu1 %v6482_v51 }
 0x1d1   : > { %5756 = vmatmul.mubr.f32.gmra.mrb[14].mxu1 %v9457_v61  ;;  %6076 = vmatmul.mubr.f32.gmra.mrb[100].mxu0 %v9458_v19  ;;  %v9468_v61 = vld [vmem:[#allocation41_spill] sm:$0xff] }
 0x1d2   : > { %5758 = vmatprep.mubr.f32.mxu1 %v9459_v14  ;;  %6078 = vmatprep.mubr.f32.mxu0 %v9460_v53  ;;  %v9469_v14 = vld [vmem:[#allocation45_spill] sm:$0xff] }
 0x1d3   : > { %6485 = vmatpush3.bf16.msra.mxu1 %v6482_v51  ;;  %v725_v51 = vadd.f32 %v8300_v60, %v8071_v44  ;;  %v2182_v60 = vrot.slane %v8324_v3, 1 }
 0x1d4   : > { %6487 = vmatprep.subr.bf16.mxu1 %v6486_v25 }
 0x1d5   : > { %5759 = vmatmul.mubr.f32.gmra.mrb[16].mxu1 %v9461_v33  ;;  %6079 = vmatmul.mubr.f32.gmra.mrb[102].mxu0 %v9462_v4  ;;  %v9470_v33 = vld [vmem:[#allocation48_spill] sm:$0xff] }
 0x1d6   : > { %5761 = vmatprep.mubr.f32.mxu1 %v9463_v27  ;;  %6081 = vmatprep.mubr.f32.mxu0 %v9464_v54  ;;  %v793_v27 = vmax.f32 %v725_v51, 0.0 }
 0x1d9   : > { %5762 = vmatmul.mubr.f32.gmra.mrb[18].mxu1 %v9465_v10  ;;  %6082 = vmatmul.mubr.f32.gmra.mrb[104].mxu0 %v9466_v41  ;;  %v8427_v10 = vsel %vm801_vm0, %v8306_v63, 0.0 }
 0x1da   : > { %5764 = vmatprep.mubr.f32.mxu1 %v9467_v28  ;;  %v2181_v44 = vrot.slane %v8427_v10, 1 }
 0x1dd   : > { %5765 = vmatmul.mubr.f32.gmra.mrb[20].mxu1 %v9468_v61 }
 0x1de   : > { %5767 = vmatprep.mubr.f32.mxu1 %v9469_v14  ;;  %v8432_v14 = vsel %vm812_vm1, %v793_v27, 0.0  ;;  %v4601_v27 = vld [vmem:[%s9246_s3 + $0x310] sm:$0xff] }
 0x1df   : > { %v2184_v51 = vrot.slane %v8432_v14, 1 }
 0x1e1   : > { %5768 = vmatmul.mubr.f32.gmra.mrb[22].mxu1 %v9470_v33  ;;  %v8445_v62 = vsel %vm937_vm2, %v2182_v60, %v2184_v51  ;;  %v9475_v51 = vld [vmem:[#allocation8_spill] sm:$0xff] }
 0x1e2   : > { %5770 = vmatprep.mubr.f32.mxu1 %v9471_v5 }
 0x1e5   : > { %5771 = vmatmul.mubr.f32.gmra.mrb[24].mxu1 %v9472_v59  ;;  %v8441_v59 = vsel %vm937_vm2, %v2181_v44, %v2182_v60  ;;  %v4603_v44 = vld [vmem:[%s9246_s3 + $0x320] sm:$0xff]  ;;  %v4604_v60 = vld [vmem:[%s9246_s3 + $0x328] sm:$0xff] }
 0x1e6   : > { %5773 = vmatprep.mubr.f32.mxu1 %v8020_v52  ;;  %9473 = vst [vmem:[#allocation17_spill] sm:$0xff] %v8441_v59 }
 0x1e9   : > { %5774 = vmatmul.mubr.f32.gmra.mrb[26].mxu1 %v8040_v37  ;;  %v9474_v37 = vld [vmem:[#allocation7_spill] sm:$0xff] }
 0x1ea   : > { %5776 = vmatprep.mubr.f32.mxu1 %v8052_v45  ;;  %v4602_v45 = vld [vmem:[%s9246_s3 + $0x318] sm:$0xff] }
 0x1ed   : > { %5777 = vmatmul.mubr.f32.gmra.mrb[28].mxu1 %v8058_v22  ;;  %v6490_v22 = vpack.c.bf16 %v4602_v45, %v4601_v27  ;;  %v4606_v45 = vld [vmem:[%s9246_s3 + $0x338] sm:$0xff] }
 0x1ee   : > { %5779 = vmatprep.mubr.f32.mxu1 %v8441_v59  ;;  %v6494_v59 = vpack.c.bf16 %v4604_v60, %v4603_v44  ;;  %v4614_v44 = vld [vmem:[%s9246_s3 + $0x378] sm:$0xff]  ;;  %v4631_v60 = vld [vmem:[%s9246_s3 + $0x388] sm:$0xff] }
 0x1f1   : > { %5780 = vmatmul.mubr.f32.gmra.mrb[30].mxu1 %v8445_v62 }
 0x1f2   : > { %5814 = vmatprep.mubr.f32.mxu1 %v9474_v37  ;;  %v4605_v37 = vld [vmem:[%s9246_s3 + $0x330] sm:$0xff] }
 0x1f3   : > { %v6498_v27 = vpack.c.bf16 %v4606_v45, %v4605_v37  ;;  %v4633_v37 = vld [vmem:[%s9246_s3 + $0x398] sm:$0xff]  ;;  %v4634_v45 = vld [vmem:[%s9246_s3 + $0x3a0] sm:$0xff] }
 0x1f5   : > { %5815 = vmatmul.mubr.f32.vlgmr.msra.gmra.mrb[0].mxu1 %v9475_v51 }
 0x1f6   : > { %6489 = vmatpush3.bf16.msra.mxu1 %v6486_v25  ;;  %5817 = vmatprep.mubr.f32.mxu1 %v7663_v43  ;;  %v4607_v43 = vld [vmem:[%s9246_s3 + $0x340] sm:$0xff]  ;;  %v4608_v25 = vld [vmem:[%s9246_s3 + $0x348] sm:$0xff] }
 0x1f7   : > { %6491 = vmatprep.subr.bf16.mxu1 %v6490_v22 }
 0x1f9   : > { %5818 = vmatmul.mubr.f32.gmra.mrb[2].mxu1 %v7682_v1  ;;  %v6502_v1 = vpack.c.bf16 %v4608_v25, %v4607_v43  ;;  %v4637_v25 = vld [vmem:[%s9246_s3 + $0x3b8] sm:$0xff] }
 0x1fa   : > { %5820 = vmatprep.mubr.f32.mxu1 %v7702_v17  ;;  %6493 = vmatpush3.bf16.msra.mxu1 %v6490_v22  ;;  %v4609_v17 = vld [vmem:[%s9246_s3 + $0x350] sm:$0xff]  ;;  %v4610_v22 = vld [vmem:[%s9246_s3 + $0x358] sm:$0xff] }
 0x1fb   : > { %6495 = vmatprep.subr.bf16.mxu1 %v6494_v59 }
 0x1fd   : > { %5821 = vmatmul.mubr.f32.gmra.mrb[4].mxu1 %v7705_v18  ;;  %v6506_v18 = vpack.c.bf16 %v4610_v22, %v4609_v17  ;;  %v4641_v17 = vld [vmem:[%s9246_s3 + $0x3d8] sm:$0xff]  ;;  %v4643_v22 = vld [vmem:[%s9246_s3 + $0x3e8] sm:$0xff] }
 0x1fe   : > { %5823 = vmatprep.mubr.f32.mxu1 %v7723_v38  ;;  %6497 = vmatpush3.bf16.msra.mxu1 %v6494_v59  ;;  %v4611_v38 = vld [vmem:[%s9246_s3 + $0x360] sm:$0xff]  ;;  %v4612_v59 = vld [vmem:[%s9246_s3 + $0x368] sm:$0xff] }
 0x1ff   : > { %6499 = vmatprep.subr.bf16.mxu1 %v6498_v27 }
 0x201   : > { %5824 = vmatmul.mubr.f32.gmra.mrb[6].mxu1 %v7742_v58  ;;  %v6510_v58 = vpack.c.bf16 %v4612_v59, %v4611_v38  ;;  %v4645_v38 = vld [vmem:[%s9246_s3 + $0x3f8] sm:$0xff]  ;;  %v3654_v59 = vld [vmem:[%s9248_s5 + $0x8] sm:$0xff] }
 0x202   : > { %5826 = vmatprep.mubr.f32.mxu1 %v9440_v21  ;;  %6501 = vmatpush3.bf16.msra.mxu1 %v6498_v27  ;;  %v4613_v21 = vld [vmem:[%s9246_s3 + $0x370] sm:$0xff]  ;;  %v4635_v27 = vld [vmem:[%s9246_s3 + $0x3a8] sm:$0xff] }
 0x203   : > { %6503 = vmatprep.subr.bf16.mxu1 %v6502_v1  ;;  %v6526_v43 = vpack.c.bf16 %v4635_v27, %v4634_v45  ;;  %v3663_v27 = vld [vmem:[%s9248_s5 + $0x50] sm:$0xff] }
 0x205   : > { %5827 = vmatmul.mubr.f32.gmra.mrb[8].mxu1 %v9442_v2  ;;  %v6514_v2 = vpack.c.bf16 %v4614_v44, %v4613_v21  ;;  %v3656_v21 = vld [vmem:[%s9248_s5 + $0x18] sm:$0xff] }
 0x206   : > { %5829 = vmatprep.mubr.f32.mxu1 %v9444_v46  ;;  %6505 = vmatpush3.bf16.msra.mxu1 %v6502_v1  ;;  %v4630_v46 = vld [vmem:[%s9246_s3 + $0x380] sm:$0xff]  ;;  %v4639_v1 = vld [vmem:[%s9246_s3 + $0x3c8] sm:$0xff] }
 0x207   : > { %6507 = vmatprep.subr.bf16.mxu1 %v6506_v18 }
 0x209   : > { %5830 = vmatmul.mubr.f32.gmra.mrb[10].mxu1 %v9446_v57  ;;  %v6518_v57 = vpack.c.bf16 %v4631_v60, %v4630_v46  ;;  %v3657_v60 = vld [vmem:[%s9248_s5 + $0x20] sm:$0xff] }
 0x20a   : > { %5832 = vmatprep.mubr.f32.mxu1 %v9448_v31  ;;  %6509 = vmatpush3.bf16.msra.mxu1 %v6506_v18  ;;  %v9477_v31 = vld [vmem:[#allocation49_spill] sm:$0xff]  ;;  %v4644_v18 = vld [vmem:[%s9246_s3 + $0x3f0] sm:$0xff] }
 0x20b   : > { %6511 = vmatprep.subr.bf16.mxu1 %v6510_v58  ;;  %v6546_v44 = vpack.c.bf16 %v4645_v38, %v4644_v18  ;;  %v9488_v38 = vld [vmem:[#allocation58_spill] sm:$0xff] }
 0x20d   : > { %5833 = vmatmul.mubr.f32.gmra.mrb[12].mxu1 %v9450_v39  ;;  %v9478_v39 = vld [vmem:[#allocation54_spill] sm:$0xff] }
 0x20e   : > { %5835 = vmatprep.mubr.f32.mxu1 %v9452_v13  ;;  %6513 = vmatpush3.bf16.msra.mxu1 %v6510_v58  ;;  %v9476_v13 = vld [vmem:[#allocation46_spill] sm:$0xff]  ;;  %v3655_v58 = vld [vmem:[%s9248_s5 + $0x10] sm:$0xff] }
 0x20f   : > { %6515 = vmatprep.subr.bf16.mxu1 %v6514_v2 }
 0x211   : > { %5836 = vmatmul.mubr.f32.gmra.mrb[14].mxu1 %v9454_v26  ;;  %v9479_v26 = vld [vmem:[#allocation55_spill] sm:$0xff] }
 0x212   : > { %5838 = vmatprep.mubr.f32.mxu1 %v9456_v42  ;;  %6517 = vmatpush3.bf16.msra.mxu1 %v6514_v2  ;;  %v9480_v42 = vld [vmem:[#allocation57_spill] sm:$0xff]  ;;  %v6586_v2 = vpack.c.bf16 %v3656_v21, %v3655_v58  ;;  %v9489_v58 = vmov 0.0  }
 0x213   : > { %6519 = vmatprep.subr.bf16.mxu1 %v6518_v57 }
 0x215   : > { %5839 = vmatmul.mubr.f32.gmra.mrb[16].mxu1 %v9458_v19  ;;  %v9481_v19 = vld [vmem:[#allocation62_spill] sm:$0xff] }
 0x216   : > { %5841 = vmatprep.mubr.f32.mxu1 %v9460_v53  ;;  %v2462_v53 = vrot.slane %v8427_v10, 2  ;;  %v4632_v10 = vld [vmem:[%s9246_s3 + $0x390] sm:$0xff] }
 0x219   : > { %5842 = vmatmul.mubr.f32.gmra.mrb[18].mxu1 %v9462_v4  ;;  %v2463_v4 = vrot.slane %v8324_v3, 2 }
 0x21a   : > { %5844 = vmatprep.mubr.f32.mxu1 %v9464_v54  ;;  %v2465_v54 = vrot.slane %v8432_v14, 2  ;;  %v6522_v14 = vpack.c.bf16 %v4633_v37, %v4632_v10  ;;  %v3661_v37 = vld [vmem:[%s9248_s5 + $0x40] sm:$0xff] }
 0x21c   : > { %v8534_v51 = vsel %vm1517_vm3, %v2463_v4, %v2465_v54  ;;  %v3660_v54 = vld [vmem:[%s9248_s5 + $0x38] sm:$0xff] }
 0x21d   : > { %5845 = vmatmul.mubr.f32.gmra.mrb[20].mxu1 %v9466_v41  ;;  %v8530_v41 = vsel %vm1517_vm3, %v2462_v53, %v2463_v4  ;;  %v3659_v4 = vld [vmem:[%s9248_s5 + $0x30] sm:$0xff] }
 0x21e   : > { %5847 = vmatprep.mubr.f32.mxu1 %v9476_v13 }
 0x221   : > { %5848 = vmatmul.mubr.f32.gmra.mrb[22].mxu1 %v9477_v31 }
 0x222   : > { %5850 = vmatprep.mubr.f32.mxu1 %v9478_v39 }
 0x225   : > { %5851 = vmatmul.mubr.f32.gmra.mrb[24].mxu1 %v9479_v26 }
 0x226   : > { %5853 = vmatprep.mubr.f32.mxu1 %v9480_v42 }
 0x229   : > { %5854 = vmatmul.mubr.f32.gmra.mrb[26].mxu1 %v8043_v55 }
 0x22a   : > { %5856 = vmatprep.mubr.f32.mxu1 %v8055_v49 }
 0x22d   : > { %5857 = vmatmul.mubr.f32.gmra.mrb[28].mxu1 %v9481_v19 }
 0x22e   : > { %5859 = vmatprep.mubr.f32.mxu1 %v8530_v41 }
 0x231   : > { %5860 = vmatmul.mubr.f32.gmra.mrb[30].mxu1 %v8534_v51 }
 0x232   : > { %5894 = vmatprep.mubr.msk.f32.mxu1 %vm801_vm0, %v7631_v23  ;;  %v4636_v23 = vld [vmem:[%s9246_s3 + $0x3b0] sm:$0xff] }
 0x235   : > { %5895 = vmatmul.mubr.f32.vlgmr.msra.gmra.mrb[0].mxu1 %v7628_v20  ;;  %v6530_v20 = vpack.c.bf16 %v4637_v25, %v4636_v23 }
 0x236   : > { %6521 = vmatpush3.bf16.msra.mxu1 %v6518_v57  ;;  %5897 = vmatprep.mubr.msk.f32.mxu1 %vm801_vm0, %v7654_v34  ;;  %v4638_v34 = vld [vmem:[%s9246_s3 + $0x3c0] sm:$0xff] }
 0x237   : > { %6523 = vmatprep.subr.bf16.mxu1 %v6522_v14 }
 0x239   : > { %5898 = vmatmul.mubr.f32.gmra.mrb[2].mxu1 %v7673_v50  ;;  %v6534_v50 = vpack.c.bf16 %v4639_v1, %v4638_v34  ;;  %v9482_v34 = vld [vmem:[#allocation39_spill] sm:$0xff]  ;;  %v9483_v1 = vld [vmem:[#allocation44_spill] sm:$0xff] }
 0x23a   : > { %5900 = vmatprep.mubr.msk.f32.mxu1 %vm801_vm0, %v7691_v11  ;;  %6525 = vmatpush3.bf16.msra.mxu1 %v6522_v14  ;;  %v4640_v11 = vld [vmem:[%s9246_s3 + $0x3d0] sm:$0xff]  ;;  %v3662_v14 = vld [vmem:[%s9248_s5 + $0x48] sm:$0xff] }
 0x23b   : > { %6527 = vmatprep.subr.bf16.mxu1 %v6526_v43 }
 0x23d   : > { %5901 = vmatmul.mubr.f32.gmra.mrb[4].mxu1 %v7688_v7  ;;  %v6538_v7 = vpack.c.bf16 %v4641_v17, %v4640_v11  ;;  %v9484_v11 = vld [vmem:[#allocation47_spill] sm:$0xff] }
 0x23e   : > { %5903 = vmatprep.mubr.msk.f32.mxu1 %vm801_vm0, %v7714_v24  ;;  %6529 = vmatpush3.bf16.msra.mxu1 %v6526_v43  ;;  %v4642_v24 = vld [vmem:[%s9246_s3 + $0x3e0] sm:$0xff]  ;;  %v3664_v43 = vld [vmem:[%s9248_s5 + $0x58] sm:$0xff] }
 0x23f   : > { %6531 = vmatprep.subr.bf16.mxu1 %v6530_v20 }
 0x241   : > { %5904 = vmatmul.mubr.f32.gmra.mrb[6].mxu1 %v7733_v47  ;;  %v6542_v47 = vpack.c.bf16 %v4643_v22, %v4642_v24  ;;  %v9486_v24 = vld [vmem:[#allocation50_spill] sm:$0xff]  ;;  %v9487_v22 = vld [vmem:[#allocation56_spill] sm:$0xff] }
 0x242   : > { %5906 = vmatprep.mubr.msk.f32.mxu1 %vm801_vm0, %v7751_v15  ;;  %6533 = vmatpush3.bf16.msra.mxu1 %v6530_v20 }
 0x243   : > { %6535 = vmatprep.subr.bf16.mxu1 %v6534_v50 }
 0x245   : > { %5907 = vmatmul.mubr.f32.gmra.mrb[8].mxu1 %v7748_v8 }
 0x246   : > { %5909 = vmatprep.mubr.msk.f32.mxu1 %vm801_vm0, %v7774_v36  ;;  %6537 = vmatpush3.bf16.msra.mxu1 %v6534_v50  ;;  %v3653_v36 = vld [vmem:[%s9248_s5] sm:$0xff] }
 0x247   : > { %6539 = vmatprep.subr.bf16.mxu1 %v6538_v7 }
 0x248   : > { %v8596_v15 = vpop.f32.mrb[54].mxu0 }
 0x249   : > { %5910 = vmatmul.mubr.f32.gmra.mrb[10].mxu1 %v7793_v9  ;;  %v8605_v8 = vpop.f32.mrb[55].mxu0  ;;  %v6582_v9 = vpack.c.bf16 %v3654_v59, %v3653_v36 }
 0x24a   : > { %5912 = vmatprep.mubr.msk.f32.mxu1 %vm801_vm0, %v7811_v35  ;;  %6541 = vmatpush3.bf16.msra.mxu1 %v6538_v7  ;;  %v3658_v35 = vld [vmem:[%s9248_s5 + $0x28] sm:$0xff] }
 0x24b   : > { %6543 = vmatprep.subr.bf16.mxu1 %v6542_v47  ;;  %6583 = vmatprep.subr.bf16.mxu0 %v6582_v9  ;;  %v6590_v53 = vpack.c.bf16 %v3658_v35, %v3657_v60  ;;  %v9492_v60 = vld [vmem:[#allocation11_spill] sm:$0xff] }
 0x24c   : > { %v8622_v46 = vpop.f32.mrb[56].mxu0  ;;  %6585 = vmatpush3.bf16.msra.mxu0 %v6582_v9 }
 0x24d   : > { %v8630_v57 = vpop.f32.mrb[57].mxu0  ;;  %5913 = vmatmul.mubr.f32.gmra.mrb[12].mxu1 %v7808_v48  ;;  %6587 = vmatprep.subr.bf16.mxu0 %v6586_v2 }
 0x24e   : > { %5915 = vmatprep.mubr.msk.f32.mxu1 %vm801_vm0, %v7834_v40  ;;  %6545 = vmatpush3.bf16.msra.mxu1 %v6542_v47  ;;  %v6594_v40 = vpack.c.bf16 %v3660_v54, %v3659_v4  ;;  %v9496_v4 = vld [vmem:[#allocation12_spill] sm:$0xff]  ;;  %v9497_v54 = vld [vmem:[#allocation13_spill] sm:$0xff] }
 0x24f   : > { %6547 = vmatprep.subr.bf16.mxu1 %v6546_v44 }
 0x250   : > { %v8642_v10 = vpop.f32.mrb[58].mxu0  ;;  %6589 = vmatpush3.bf16.msra.mxu0 %v6586_v2 }
 0x251   : > { %v8644_v48 = vpop.f32.mrb[59].mxu0  ;;  %5916 = vmatmul.mubr.f32.gmra.mrb[14].mxu1 %v7853_v30  ;;  %6591 = vmatprep.subr.bf16.mxu0 %v6590_v53 }
 0x252   : > { %5918 = vmatprep.mubr.msk.f32.mxu1 %vm801_vm0, %v7871_v32  ;;  %6549 = vmatpush3.bf16.msra.mxu1 %v6546_v44  ;;  %v6598_v32 = vpack.c.bf16 %v3662_v14, %v3661_v37  ;;  %v9490_v44 = vld [vmem:[#allocation9_spill] sm:$0xff] }
 0x253   : > { %6646 = vmatprep.subr.bf16.mxu1 %v7613_v6 }
 0x254   : > { %v8657_v45 = vpop.f32.mrb[60].mxu0  ;;  %6593 = vmatpush3.bf16.msra.mxu0 %v6590_v53 }
 0x255   : > { %v8659_v30 = vpop.f32.mrb[61].mxu0  ;;  %5919 = vmatmul.mubr.f32.gmra.mrb[16].mxu1 %v7868_v16  ;;  %6595 = vmatprep.subr.bf16.mxu0 %v6594_v40  ;;  %v6602_v16 = vpack.c.bf16 %v3664_v43, %v3663_v27  ;;  %v9503_v27 = vld [vmem:[#allocation65_spill] sm:$0xff] }
 0x256   : > { %5921 = vmatprep.mubr.msk.f32.mxu1 %vm801_vm0, %v7894_v0 }
 0x258   : > { %v8671_v23 = vpop.f32.mrb[62].mxu0  ;;  %6597 = vmatpush3.bf16.msra.mxu0 %v6594_v40  ;;  %v9498_v40 = vld [vmem:[#allocation64_spill] sm:$0xff] }
 0x259   : > { %v8673_v25 = vpop.f32.mrb[63].mxu0  ;;  %5922 = vmatmul.mubr.f32.gmra.mrb[18].mxu1 %v7913_v12  ;;  %6599 = vmatprep.subr.bf16.mxu0 %v6598_v32 }
 0x25a   : > { %5924 = vmatprep.mubr.msk.f32.mxu1 %vm801_vm0, %v7931_v29  ;;  %v9485_v29 = vld [vmem:[#allocation51_spill] sm:$0xff] }
 0x25c   : > { %v8679_v0 = vpop.f32.mrb[64].mxu0  ;;  %6601 = vmatpush3.bf16.msra.mxu0 %v6598_v32  ;;  %v9502_v32 = vld [vmem:[#allocation15_spill] sm:$0xff] }
 0x25d   : > { %v8681_v20 = vpop.f32.mrb[65].mxu0  ;;  %5925 = vmatmul.mubr.f32.gmra.mrb[20].mxu1 %v9482_v34  ;;  %6603 = vmatprep.subr.bf16.mxu0 %v6602_v16  ;;  %v9506_v34 = vld [vmem:[#allocation16_spill] sm:$0xff] }
 0x25e   : > { %5927 = vmatprep.mubr.msk.f32.mxu1 %vm801_vm0, %v9483_v1  ;;  %v9507_v1 = vld [vmem:[#allocation19_spill] sm:$0xff] }
 0x260   : > { %v8687_v12 = vpop.f32.mrb[66].mxu0  ;;  %6605 = vmatpush3.bf16.msra.mxu0 %v6602_v16 }
 0x261   : > { %v8689_v50 = vpop.f32.mrb[67].mxu0  ;;  %5928 = vmatmul.mubr.f32.gmra.mrb[22].mxu1 %v9484_v11  ;;  %v9508_v11 = vld [vmem:[#allocation66_spill] sm:$0xff] }
 0x262   : > { %5930 = vmatprep.mubr.msk.f32.mxu1 %vm801_vm0, %v9485_v29 }
 0x264   : > { %v8695_v17 = vpop.f32.mrb[68].mxu0 }
 0x265   : > { %v8697_v7 = vpop.f32.mrb[69].mxu0  ;;  %5931 = vmatmul.mubr.f32.gmra.mrb[24].mxu1 %v9486_v24 }
 0x266   : > { %5933 = vmatprep.mubr.msk.f32.mxu1 %vm801_vm0, %v9487_v22  ;;  %v9511_v22 = vld [vmem:[#allocation21_spill] sm:$0xff] }
 0x268   : > { %v8703_v47 = vpop.f32.mrb[70].mxu0 }
 0x269   : > { %v8705_v18 = vpop.f32.mrb[71].mxu0  ;;  %5934 = vmatmul.mubr.f32.gmra.mrb[26].mxu1 %v9488_v38  ;;  %v9512_v38 = vld [vmem:[#allocation23_spill] sm:$0xff] }
 0x26a   : > { %5936 = vmatprep.mubr.msk.f32.mxu1 %vm801_vm0, %v8306_v63  ;;  %v9491_v63 = vld [vmem:[#allocation10_spill] sm:$0xff] }
 0x26c   : > { %v8711_v36 = vpop.f32.mrb[72].mxu0 }
 0x26d   : > { %v8713_v59 = vpop.f32.mrb[73].mxu0  ;;  %5937 = vmatmul.mubr.f32.gmra.mrb[28].mxu1 %v8324_v3  ;;  %v9493_v3 = vld [vmem:[#allocation63_spill] sm:$0xff] }
 0x26e   : > { %5939 = vmatprep.mubr.f32.mxu1 %v9489_v58 }
 0x270   : > { %v8717_v9 = vpop.f32.mrb[74].mxu0 }
 0x271   : > { %v8719_v21 = vpop.f32.mrb[75].mxu0  ;;  %5940 = vmatmul.mubr.f32.gmra.mrb[30].mxu1 %v9489_v58  ;;  %v9513_v58 = vld [vmem:[#allocation67_spill] sm:$0xff] }
 0x272   : > { %5974 = vmatprep.mubr.f32.mxu1 %v9490_v44 }
 0x274   : > { %v8723_v2 = vpop.f32.mrb[76].mxu0 }
 0x275   : > { %v8725_v56 = vpop.f32.mrb[77].mxu0  ;;  %5975 = vmatmul.mubr.f32.vlgmr.msra.gmra.mrb[0].mxu1 %v9491_v63  ;;  %v9514_v63 = vld [vmem:[#allocation24_spill] sm:$0xff] }
 0x276   : > { %6654 = vmatpush3.bf16.msra.mxu1 %v7613_v6  ;;  %5977 = vmatprep.mubr.f32.mxu1 %v9492_v60  ;;  %v9501_v6 = vld [vmem:[#allocation14_spill] sm:$0xff] }
 0x277   : > { %6647 = vmatprep.subr.bf16.mxu1 %v9493_v3 }
 0x278   : > { %v8731_v35 = vpop.f32.mrb[78].mxu0 }
 0x279   : > { %9494 = vst [vmem:[#allocation18_spill] sm:$0xff] %v8731_v35  ;;  %v8733_v53 = vpop.f32.mrb[79].mxu0  ;;  %5978 = vmatmul.mubr.f32.gmra.mrb[2].mxu1 %v9496_v4  ;;  %v9516_v4 = vld [vmem:[#allocation68_spill] sm:$0xff] }
 0x27a   : > { %9495 = vst [vmem:[#allocation20_spill] sm:$0xff] %v8733_v53  ;;  %5980 = vmatprep.mubr.f32.mxu1 %v9497_v54  ;;  %6655 = vmatpush3.bf16.msra.mxu1 %v9493_v3  ;;  %v9515_v3 = vld [vmem:[#allocation27_spill] sm:$0xff] }
 0x27b   : > { %6648 = vmatprep.subr.bf16.mxu1 %v9498_v40  ;;  %v7077_v53 = vld [vmem:[%s7301_s29 + $0xb0] sm:$0xff] }
 0x27c   : > { %v8739_v37 = vpop.f32.mrb[80].mxu0  ;;  %v3980_v35 = vrot.slane %v7077_v53, 1  ;;  %v8929_v53 = vld [vmem:[%s9247_s4] ss:$0 sm:$0xff] }
 0x27d   : > { %9499 = vst [vmem:[#allocation22_spill] sm:$0xff] %v8739_v37  ;;  %v8741_v14 = vpop.f32.mrb[81].mxu0  ;;  %5981 = vmatmul.mubr.f32.gmra.mrb[4].mxu1 %v9501_v6  ;;  %v7074_v37 = vld [vmem:[%s7301_s29 + $0x98] sm:$0xff] }
 0x27e   : > { %9500 = vst [vmem:[#allocation25_spill] sm:$0xff] %v8741_v14  ;;  %5983 = vmatprep.mubr.f32.mxu1 %v9502_v32  ;;  %6656 = vmatpush3.bf16.msra.mxu1 %v9498_v40  ;;  %v9517_v40 = vld [vmem:[#allocation29_spill] sm:$0xff]  ;;  %v9518_v32 = vld [vmem:[#allocation31_spill] sm:$0xff]  ;;  %v7066_v14 = vld [vmem:[%s7301_s29 + $0x58] sm:$0xff] }
 0x27f   : > { %6649 = vmatprep.subr.bf16.mxu1 %v9503_v27 }
 0x280   : > { %v8747_v43 = vpop.f32.mrb[82].mxu0 }
 0x281   : > { %9504 = vst [vmem:[#allocation26_spill] sm:$0xff] %v8747_v43  ;;  %v8749_v16 = vpop.f32.mrb[83].mxu0  ;;  %5984 = vmatmul.mubr.f32.gmra.mrb[6].mxu1 %v9506_v34  ;;  %v9529_v43 = vld [vmem:[#allocation6_spill] sm:$0xff] }
 0x282   : > { %9505 = vst [vmem:[#allocation28_spill] sm:$0xff] %v8749_v16  ;;  %5986 = vmatprep.mubr.f32.mxu1 %v9507_v1  ;;  %6657 = vmatpush3.bf16.msra.mxu1 %v9503_v27  ;;  %v9519_v27 = vld [vmem:[#allocation69_spill] sm:$0xff]  ;;  %v9520_v1 = vld [vmem:[#allocation32_spill] sm:$0xff] }
 0x283   : > { %6650 = vmatprep.subr.bf16.mxu1 %v9508_v11  ;;  %v9528_v16 = vld [vmem:[#allocation17_spill] sm:$0xff] }
 0x284   : > { %v8755_v29 = vpop.f32.mrb[84].mxu0 }
 0x285   : > { %9509 = vst [vmem:[#allocation30_spill] sm:$0xff] %v8755_v29  ;;  %v8757_v24 = vpop.f32.mrb[85].mxu0  ;;  %5987 = vmatmul.mubr.f32.gmra.mrb[8].mxu1 %v9511_v22  ;;  %v9521_v22 = vld [vmem:[#allocation35_spill] sm:$0xff]  ;;  %v9527_v29 = vld [vmem:[#allocation61_spill] sm:$0xff] }
 0x286   : > { %9510 = vst [vmem:[#allocation33_spill] sm:$0xff] %v8757_v24  ;;  %5989 = vmatprep.mubr.f32.mxu1 %v9512_v38  ;;  %6658 = vmatpush3.bf16.msra.mxu1 %v9508_v11  ;;  %v9526_v24 = vld [vmem:[#allocation60_spill] sm:$0xff] }
 0x287   : > { %6651 = vmatprep.subr.bf16.mxu1 %v9513_v58 }
 0x288   : > { %v8763_v44 = vpop.f32.mrb[86].mxu0 }
 0x289   : > { %5990 = vmatmul.mubr.f32.gmra.mrb[10].mxu1 %v9514_v63  ;;  %v8766_v60 = vpop.f32.mrb[87].mxu0 }
 0x28a   : > { %5992 = vmatprep.mubr.f32.mxu1 %v9515_v3  ;;  %6659 = vmatpush3.bf16.msra.mxu1 %v9513_v58  ;;  %v9522_v58 = vld [vmem:[#allocation37_spill] sm:$0xff] }
 0x28b   : > { %6652 = vmatprep.subr.bf16.mxu1 %v9516_v4 }
 0x28c   : > { %v8771_v54 = vpop.f32.mrb[88].mxu0 }
 0x28d   : > { %5993 = vmatmul.mubr.f32.gmra.mrb[12].mxu1 %v9517_v40  ;;  %v8774_v6 = vpop.f32.mrb[89].mxu0  ;;  %v9523_v40 = vld [vmem:[#allocation45_spill] sm:$0xff] }
 0x28e   : > { %5995 = vmatprep.mubr.f32.mxu1 %v9518_v32  ;;  %6660 = vmatpush3.bf16.msra.mxu1 %v9516_v4 }
 0x28f   : > { %6653 = vmatprep.subr.bf16.mxu1 %v9519_v27 }
 0x290   : > { %v8779_v34 = vpop.f32.mrb[90].mxu0 }
 0x291   : > { %5996 = vmatmul.mubr.f32.gmra.mrb[14].mxu1 %v9520_v1  ;;  %v8782_v11 = vpop.f32.mrb[91].mxu0 }
 0x292   : > { %5998 = vmatprep.mubr.f32.mxu1 %v9521_v22  ;;  %6661 = vmatpush3.bf16.msra.mxu1 %v9519_v27  ;;  %v9524_v22 = vld [vmem:[#allocation53_spill] sm:$0xff] }
 0x294   : > { %v8786_v38 = vpop.f32.mrb[92].mxu0 }
 0x295   : > { %5999 = vmatmul.mubr.f32.gmra.mrb[16].mxu1 %v9522_v58  ;;  %v8789_v63 = vpop.f32.mrb[93].mxu0  ;;  %v9525_v58 = vld [vmem:[#allocation59_spill] sm:$0xff] }
 0x296   : > { %6001 = vmatprep.mubr.f32.mxu1 %v9467_v28 }
 0x298   : > { %v8792_v3 = vpop.f32.mrb[94].mxu0 }
 0x299   : > { %6002 = vmatmul.mubr.f32.gmra.mrb[18].mxu1 %v9468_v61  ;;  %v8795_v4 = vpop.f32.mrb[95].mxu0 }
 0x29a   : > { %6004 = vmatprep.mubr.f32.mxu1 %v9523_v40 }
 0x29c   : > { %v8798_v32 = vpop.f32.mrb[96].mxu0 }
 0x29d   : > { %6005 = vmatmul.mubr.f32.gmra.mrb[20].mxu1 %v9470_v33  ;;  %v8801_v27 = vpop.f32.mrb[97].mxu0 }
 0x29e   : > { %6007 = vmatprep.mubr.f32.mxu1 %v9471_v5 }
 0x2a0   : > { %v8804_v1 = vpop.f32.mrb[98].mxu0 }
 0x2a1   : > { %6008 = vmatmul.mubr.f32.gmra.mrb[22].mxu1 %v9524_v22  ;;  %v8807_v28 = vpop.f32.mrb[99].mxu0 }
 0x2a2   : > { %6010 = vmatprep.mubr.f32.mxu1 %v8020_v52 }
 0x2a4   : > { %v8810_v61 = vpop.f32.mrb[100].mxu0 }
 0x2a5   : > { %6011 = vmatmul.mubr.f32.gmra.mrb[24].mxu1 %v9525_v58  ;;  %v8813_v40 = vpop.f32.mrb[101].mxu0 }
 0x2a6   : > { %6013 = vmatprep.mubr.f32.mxu1 %v9526_v24  ;;  %v7060_v24 = vld [vmem:[%s7301_s29 + $0x28] sm:$0xff] }
 0x2a7   : > { %v3952_v58 = vrot.slane %v7060_v24, 1 }
 0x2a8   : > { %v8816_v33 = vpop.f32.mrb[102].mxu0 }
 0x2a9   : > { %6014 = vmatmul.mubr.f32.gmra.mrb[26].mxu1 %v9527_v29  ;;  %v8819_v5 = vpop.f32.mrb[103].mxu0 }
 0x2aa   : > { %6016 = vmatprep.mubr.f32.mxu1 %v9528_v16  ;;  %v7059_v16 = vld [vmem:[%s7301_s29 + $0x20] sm:$0xff] }
 0x2ab   : > { %v3950_v29 = vrot.slane %v7059_v16, 1  ;;  %v7065_v16 = vld [vmem:[%s7301_s29 + $0x50] sm:$0xff] }
 0x2ac   : > { %v8822_v22 = vpop.f32.mrb[104].mxu0  ;;  %v3960_v24 = vrot.slane %v7065_v16, 1 }
 0x2ad   : > { %6017 = vmatmul.mubr.f32.gmra.mrb[28].mxu1 %v8445_v62  ;;  %v8825_v52 = vpop.f32.mrb[105].mxu0  ;;  %v9530_v62 = vld [vmem:[#allocation5_spill] sm:$0xff] }
 0x2ae   : > { %6019 = vmatprep.mubr.f32.mxu1 %v9529_v43 }
 0x2b1   : > { %6020 = vmatmul.mubr.f32.gmra.mrb[30].mxu1 %v9529_v43 }
 0x2b2   : > { %6084 = vmatprep.mubr.f32.mxu1 %v9476_v13  ;;  %v3665_v13 = vld [vmem:[%s9248_s5 + $0x60] sm:$0xff] }
 0x2b5   : > { %6085 = vmatmul.mubr.f32.vlgmr.msra.gmra.mrb[20].mxu1 %v9477_v31  ;;  %v3667_v31 = vld [vmem:[%s9248_s5 + $0x70] sm:$0xff] }
 0x2b6   : > { %6087 = vmatprep.mubr.f32.mxu1 %v9478_v39  ;;  %v3668_v39 = vld [vmem:[%s9248_s5 + $0x78] sm:$0xff] }
 0x2b9   : > { %6088 = vmatmul.mubr.f32.gmra.mrb[22].mxu1 %v9479_v26  ;;  %v6610_v26 = vpack.c.bf16 %v3668_v39, %v3667_v31  ;;  %v7063_v39 = vld [vmem:[%s7301_s29 + $0x40] sm:$0xff] }
 0x2ba   : > { %6090 = vmatprep.mubr.f32.mxu1 %v9480_v42  ;;  %v4061_v42 = vld [vmem:[%s9250_s7] sm:$0xff] }
 0x2bd   : > { %6091 = vmatmul.mubr.f32.gmra.mrb[24].mxu1 %v8043_v55  ;;  %v3666_v55 = vld [vmem:[%s9248_s5 + $0x68] sm:$0xff] }
 0x2be   : > { %6093 = vmatprep.mubr.f32.mxu1 %v8055_v49  ;;  %v6606_v49 = vpack.c.bf16 %v3666_v55, %v3665_v13  ;;  %v7062_v55 = vld [vmem:[%s7301_s29 + $0x38] sm:$0xff] }
 0x2c0   : > { %6607 = vmatprep.subr.bf16.mxu0 %v6606_v49 }
 0x2c1   : > { %6094 = vmatmul.mubr.f32.gmra.mrb[26].mxu1 %v9481_v19  ;;  %6609 = vmatpush3.bf16.msra.mxu0 %v6606_v49  ;;  %v4062_v19 = vld [vmem:[%s9250_s7 + $0x8] sm:$0xff]  ;;  %v3955_v49 = vrot.slane %v7062_v55, 1  ;;  %v3962_v55 = vrot.slane %v7066_v14, 1 }
 0x2c2   : > { %6096 = vmatprep.mubr.f32.mxu1 %v8530_v41  ;;  %6611 = vmatprep.subr.bf16.mxu0 %v6610_v26  ;;  %v8859_v41 = vpack.c.bf16 %v4062_v19, %v4061_v42  ;;  %v8872_v42 = vsel %vm937_vm2, %v3950_v29, %v3952_v58  ;;  %v7064_v19 = vld [vmem:[%s7301_s29 + $0x48] sm:$0xff] }
 0x2c3   : > { %9532 = vst [vmem:[#allocation36_spill] sm:$0xff] %v8872_v42  ;;  %v7069_v42 = vld [vmem:[%s7301_s29 + $0x70] sm:$0xff] }
 0x2c4   : > { %v3967_v16 = vrot.slane %v7069_v42, 1 }
 0x2c5   : > { %6097 = vmatmul.mubr.f32.gmra.mrb[28].mxu1 %v8534_v51  ;;  %6613 = vmatpush3.bf16.msra.mxu0 %v6610_v26  ;;  %v7058_v51 = vld [vmem:[%s7301_s29 + $0x18] sm:$0xff]  ;;  %v3957_v26 = vrot.slane %v7063_v39, 1 }
 0x2c6   : > { %6099 = vmatprep.mubr.f32.mxu1 %v9530_v62  ;;  %6615 = vmatprep.subr.bf16.mxu0 %v8859_v41  ;;  %v3949_v43 = vrot.slane %v7058_v51, 1  ;;  %v3959_v51 = vrot.slane %v7064_v19, 1 }
 0x2c8   : > { %v8868_v31 = vsel %vm937_vm2, %v3949_v43, %v3950_v29  ;;  %v8881_v43 = vsel %vm937_vm2, %v3955_v49, %v3957_v26  ;;  %v7068_v29 = vld [vmem:[%s7301_s29 + $0x68] sm:$0xff]  ;;  %v8886_v19 = vsel %vm937_vm2, %v3959_v51, %v3960_v24 }
 0x2c9   : > { %6100 = vmatmul.mubr.f32.gmra.mrb[30].mxu1 %v9530_v62  ;;  %v7061_v62 = vld [vmem:[%s7301_s29 + $0x30] sm:$0xff]  ;;  %9531 = vst [vmem:[#allocation34_spill] sm:$0xff] %v8868_v31  ;;  %9534 = vst [vmem:[#allocation42_spill] sm:$0xff] %v8881_v43  ;;  %v7067_v31 = vld [vmem:[%s7301_s29 + $0x60] sm:$0xff]  ;;  %v3965_v58 = vrot.slane %v7068_v29, 1 }
 0x2ca   : > { %v3954_v13 = vrot.slane %v7061_v62, 1  ;;  %v3964_v39 = vrot.slane %v7067_v31, 1  ;;  %9535 = vst [vmem:[#allocation43_spill] sm:$0xff] %v8886_v19  ;;  %v7072_v43 = vld [vmem:[%s7301_s29 + $0x88] sm:$0xff]  ;;  %v7073_v19 = vld [vmem:[%s7301_s29 + $0x90] sm:$0xff] }
 0x2cb   : > { %v3972_v29 = vrot.slane %v7072_v43, 1  ;;  %v8899_v51 = vsel %vm937_vm2, %v3965_v58, %v3967_v16  ;;  %v3974_v42 = vrot.slane %v7073_v19, 1 }
 0x2cc   : > { %v8877_v62 = vsel %vm937_vm2, %v3954_v13, %v3955_v49  ;;  %v8890_v13 = vsel %vm937_vm2, %v3960_v24, %v3962_v55  ;;  %v7071_v49 = vld [vmem:[%s7301_s29 + $0x80] sm:$0xff]  ;;  %v8895_v31 = vsel %vm937_vm2, %v3964_v39, %v3965_v58  ;;  %v3975_v24 = vrot.slane %v7074_v37, 1  ;;  %v7076_v39 = vld [vmem:[%s7301_s29 + $0xa8] sm:$0xff]  ;;  %v7078_v58 = vld [vmem:[%s7301_s29 + $0xb8] sm:$0xff] }
 0x2cd   : > { %9533 = vst [vmem:[#allocation38_spill] sm:$0xff] %v8877_v62  ;;  %9536 = vst [vmem:[#allocation40_spill] sm:$0xff] %v8890_v13  ;;  %v7070_v62 = vld [vmem:[%s7301_s29 + $0x78] sm:$0xff]  ;;  %v3970_v26 = vrot.slane %v7071_v49, 1  ;;  %v3982_v16 = vrot.slane %v7078_v58, 1 }
 0x2ce   : > { %v3969_v14 = vrot.slane %v7070_v62, 1  ;;  %9537 = vst [vmem:[#allocation41_spill] sm:$0xff] %v8895_v31  ;;  %v7075_v62 = vld [vmem:[%s7301_s29 + $0xa0] sm:$0xff]  ;;  %v3979_v31 = vrot.slane %v7076_v39, 1  ;;  %v8913_v43 = vsel %vm937_vm2, %v3974_v42, %v3975_v24 }
 0x2cf   : > { %v3977_v13 = vrot.slane %v7075_v62, 1  ;;  %v8908_v49 = vsel %vm937_vm2, %v3970_v26, %v3972_v29 }
 0x2d0   : > { %v8904_v55 = vsel %vm937_vm2, %v3969_v14, %v3970_v26  ;;  %v8920_v37 = vsel %vm937_vm2, %v3979_v31, %v3980_v35  ;;  %v8923_v14 = vsel %vm937_vm2, %v3980_v35, %v3982_v16 }
 0x2d1   : > { %v8917_v19 = vsel %vm937_vm2, %v3975_v24, %v3977_v13 }
 0x348   : > { %v5976_v26 = vpop.f32.mrb[0].mxu1 }
 0x349   : > { %v6662_v29 = vadd.f32 %v5976_v26, %v8596_v15  ;;  %v3110_v62 = vpop.f32.mrb[1].mxu1  ;;  %v4063_v26 = vld [vmem:[%s9250_s7 + $0x10] sm:$0xff] }
 0x34a   : > { %v6664_v42 = vadd.f32 %v3110_v62, %v8605_v8  ;;  %v4064_v8 = vld [vmem:[%s9250_s7 + $0x18] sm:$0xff] }
 0x34b   : > { %v6663_v13 = vadd.f32 %v6662_v29, %v8763_v44 }
 0x34c   : > { %v6665_v24 = vadd.f32 %v6664_v42, %v8766_v60  ;;  %v5979_v31 = vpop.f32.mrb[2].mxu1 }
 0x34d   : > { %v3590_v39 = vadd.f32 %v6663_v13, %v8929_v53  ;;  %v6666_v35 = vadd.f32 %v5979_v31, %v8622_v46  ;;  %v3120_v58 = vpop.f32.mrb[3].mxu1 }
 0x34e   : > { %v6668_v15 = vadd.f32 %v3120_v58, %v8630_v57  ;;  %v3589_v16 = vadd.f32 %v6665_v24, %v8929_v53  ;;  %v6618_v24 = vpack.c.bf16 %v4064_v8, %v4063_v26 }
 0x34f   : > { %v6667_v44 = vadd.f32 %v6666_v35, %v8771_v54  ;;  %v3622_v46 = vmax.f32 %v3590_v39, 0.0  ;;  %v4065_v54 = vld [vmem:[%s9250_s7 + $0x20] sm:$0xff] }
 0x350   : > { %v6669_v60 = vadd.f32 %v6668_v15, %v8774_v6  ;;  %v5982_v29 = vpop.f32.mrb[4].mxu1  ;;  %v3621_v62 = vmax.f32 %v3589_v16, 0.0  ;;  %v4066_v6 = vld [vmem:[%s9250_s7 + $0x28] sm:$0xff] }
 0x351   : > { %v6670_v42 = vadd.f32 %v5982_v29, %v8642_v10  ;;  %v3130_v57 = vpop.f32.mrb[5].mxu1  ;;  %v3592_v13 = vadd.f32 %v6667_v44, %v8929_v53  ;;  %v6622_v44 = vpack.c.bf16 %v4066_v6, %v4065_v54 }
 0x352   : > { %v6672_v31 = vadd.f32 %v3130_v57, %v8644_v48  ;;  %6134 = vmatprep.mubr.f32.mxu0 %v3621_v62  ;;  %v3591_v58 = vadd.f32 %v6669_v60, %v8929_v53 }
 0x353   : > { %v6671_v39 = vadd.f32 %v6670_v42, %v8779_v34  ;;  %6135 = vmatmul.mubr.f32.vlgmr.msra.gmra.mrb[106].mxu0 %v3622_v46  ;;  %v3624_v26 = vmax.f32 %v3592_v13, 0.0 }
 0x354   : > { %v6673_v10 = vadd.f32 %v6672_v31, %v8782_v11  ;;  %v5985_v35 = vpop.f32.mrb[6].mxu1  ;;  %v3623_v15 = vmax.f32 %v3591_v58, 0.0  ;;  %6617 = vmatpush3.bf16.msra.mxu0 %v8859_v41  ;;  %v4067_v11 = vld [vmem:[%s9250_s7 + $0x30] sm:$0xff]  ;;  %v4068_v41 = vld [vmem:[%s9250_s7 + $0x38] sm:$0xff] }
 0x355   : > { %v6674_v48 = vadd.f32 %v5985_v35, %v8657_v45  ;;  %v3140_v16 = vpop.f32.mrb[7].mxu1  ;;  %v3594_v8 = vadd.f32 %v6671_v39, %v8929_v53  ;;  %6619 = vmatprep.subr.bf16.mxu0 %v6618_v24  ;;  %v6626_v31 = vpack.c.bf16 %v4068_v41, %v4067_v11 }
 0x356   : > { %v6676_v60 = vadd.f32 %v3140_v16, %v8659_v30  ;;  %6137 = vmatprep.mubr.f32.mxu0 %v3623_v15  ;;  %v3593_v34 = vadd.f32 %v6673_v10, %v8929_v53 }
 0x357   : > { %v6675_v45 = vadd.f32 %v6674_v48, %v8786_v38  ;;  %6138 = vmatmul.mubr.f32.gmra.mrb[108].mxu0 %v3624_v26  ;;  %v3626_v57 = vmax.f32 %v3594_v8, 0.0  ;;  %v4069_v38 = vld [vmem:[%s9250_s7 + $0x40] sm:$0xff] }
 0x358   : > { %v6677_v29 = vadd.f32 %v6676_v60, %v8789_v63  ;;  %v5988_v62 = vpop.f32.mrb[8].mxu1  ;;  %v3625_v46 = vmax.f32 %v3593_v34, 0.0  ;;  %6621 = vmatpush3.bf16.msra.mxu0 %v6618_v24  ;;  %v4070_v63 = vld [vmem:[%s9250_s7 + $0x48] sm:$0xff] }
 0x359   : > { %v6678_v30 = vadd.f32 %v5988_v62, %v8671_v23  ;;  %v3150_v42 = vpop.f32.mrb[9].mxu1  ;;  %v3596_v13 = vadd.f32 %v6675_v45, %v8929_v53  ;;  %6623 = vmatprep.subr.bf16.mxu0 %v6622_v44  ;;  %v6630_v48 = vpack.c.bf16 %v4070_v63, %v4069_v38 }
 0x35a   : > { %v6680_v58 = vadd.f32 %v3150_v42, %v8673_v25  ;;  %6140 = vmatprep.mubr.f32.mxu0 %v3625_v46  ;;  %v3595_v54 = vadd.f32 %v6677_v29, %v8929_v53 }
 0x35b   : > { %v6679_v23 = vadd.f32 %v6678_v30, %v8792_v3  ;;  %6141 = vmatmul.mubr.f32.gmra.mrb[110].mxu0 %v3626_v57  ;;  %v3628_v35 = vmax.f32 %v3596_v13, 0.0  ;;  %v4071_v3 = vld [vmem:[%s9250_s7 + $0x50] sm:$0xff] }
 0x35c   : > { %v6681_v24 = vadd.f32 %v6680_v58, %v8795_v4  ;;  %v5991_v6 = vpop.f32.mrb[10].mxu1  ;;  %v3627_v39 = vmax.f32 %v3595_v54, 0.0  ;;  %6625 = vmatpush3.bf16.msra.mxu0 %v6622_v44  ;;  %v4072_v4 = vld [vmem:[%s9250_s7 + $0x58] sm:$0xff] }
 0x35d   : > { %v6682_v25 = vadd.f32 %v5991_v6, %v8679_v0  ;;  %v3160_v10 = vpop.f32.mrb[11].mxu1  ;;  %v3598_v15 = vadd.f32 %v6679_v23, %v8929_v53  ;;  %6627 = vmatprep.subr.bf16.mxu0 %v6626_v31  ;;  %v6634_v45 = vpack.c.bf16 %v4072_v4, %v4071_v3 }
 0x35e   : > { %v6684_v16 = vadd.f32 %v3160_v10, %v8681_v20  ;;  %6143 = vmatprep.mubr.f32.mxu0 %v3627_v39  ;;  %v3597_v26 = vadd.f32 %v6681_v24, %v8929_v53 }
 0x35f   : > { %v6683_v0 = vadd.f32 %v6682_v25, %v8798_v32  ;;  %6144 = vmatmul.mubr.f32.gmra.mrb[112].mxu0 %v3628_v35  ;;  %v3630_v11 = vmax.f32 %v3598_v15, 0.0  ;;  %v4073_v32 = vld [vmem:[%s9250_s7 + $0x60] sm:$0xff] }
 0x360   : > { %v6685_v8 = vadd.f32 %v6684_v16, %v8801_v27  ;;  %v5994_v44 = vpop.f32.mrb[12].mxu1  ;;  %v3629_v60 = vmax.f32 %v3597_v26, 0.0  ;;  %6629 = vmatpush3.bf16.msra.mxu0 %v6626_v31  ;;  %v4074_v27 = vld [vmem:[%s9250_s7 + $0x68] sm:$0xff] }
 0x361   : > { %v6686_v20 = vadd.f32 %v5994_v44, %v8687_v12  ;;  %v3170_v34 = vpop.f32.mrb[13].mxu1  ;;  %v3600_v41 = vadd.f32 %v6683_v0, %v8929_v53  ;;  %6631 = vmatprep.subr.bf16.mxu0 %v6630_v48  ;;  %v6638_v58 = vpack.c.bf16 %v4074_v27, %v4073_v32 }
 0x362   : > { %v6688_v29 = vadd.f32 %v3170_v34, %v8689_v50  ;;  %6146 = vmatprep.mubr.f32.mxu0 %v3629_v60  ;;  %v3599_v62 = vadd.f32 %v6685_v8, %v8929_v53 }
 0x363   : > { %v6687_v12 = vadd.f32 %v6686_v20, %v8804_v1  ;;  %6147 = vmatmul.mubr.f32.gmra.mrb[114].mxu0 %v3630_v11  ;;  %v3632_v13 = vmax.f32 %v3600_v41, 0.0  ;;  %v4075_v1 = vld [vmem:[%s9250_s7 + $0x70] sm:$0xff] }
 0x364   : > { %v6689_v46 = vadd.f32 %v6688_v29, %v8807_v28  ;;  %v5997_v30 = vpop.f32.mrb[14].mxu1  ;;  %v3631_v42 = vmax.f32 %v3599_v62, 0.0  ;;  %6633 = vmatpush3.bf16.msra.mxu0 %v6630_v48  ;;  %v4076_v28 = vld [vmem:[%s9250_s7 + $0x78] sm:$0xff] }
 0x365   : > { %v6690_v50 = vadd.f32 %v5997_v30, %v8695_v17  ;;  %v3180_v57 = vpop.f32.mrb[15].mxu1  ;;  %v3602_v31 = vadd.f32 %v6687_v12, %v8929_v53  ;;  %6635 = vmatprep.subr.bf16.mxu0 %v6634_v45  ;;  %v6642_v10 = vpack.c.bf16 %v4076_v28, %v4075_v1  ;;  %v9540_v1 = vld [vmem:[#allocation22_spill] sm:$0xff] }
 0x366   : > { %v6692_v54 = vadd.f32 %v3180_v57, %v8697_v7  ;;  %6149 = vmatprep.mubr.f32.mxu0 %v3631_v42  ;;  %v3601_v38 = vadd.f32 %v6689_v46, %v8929_v53 }
 0x367   : > { %v6691_v17 = vadd.f32 %v6690_v50, %v8810_v61  ;;  %6150 = vmatmul.mubr.f32.gmra.mrb[116].mxu0 %v3632_v13  ;;  %v3634_v39 = vmax.f32 %v3602_v31, 0.0  ;;  %v9538_v50 = vld [vmem:[#allocation18_spill] sm:$0xff]  ;;  %v9539_v31 = vld [vmem:[#allocation20_spill] sm:$0xff] }
 0x368   : > { %v6693_v63 = vadd.f32 %v6692_v54, %v8813_v40  ;;  %v6000_v23 = vpop.f32.mrb[16].mxu1  ;;  %v3633_v24 = vmax.f32 %v3601_v38, 0.0  ;;  %6637 = vmatpush3.bf16.msra.mxu0 %v6634_v45 }
 0x369   : > { %v6694_v7 = vadd.f32 %v6000_v23, %v8703_v47  ;;  %v3190_v6 = vpop.f32.mrb[17].mxu1  ;;  %v3604_v25 = vadd.f32 %v6691_v17, %v8929_v53  ;;  %6639 = vmatprep.subr.bf16.mxu0 %v6638_v58  ;;  %v9541_v23 = vld [vmem:[#allocation25_spill] sm:$0xff] }
 0x36a   : > { %v6696_v35 = vadd.f32 %v3190_v6, %v8705_v18  ;;  %6152 = vmatprep.mubr.f32.mxu0 %v3633_v24  ;;  %v3603_v15 = vadd.f32 %v6693_v63, %v8929_v53 }
 0x36b   : > { %v6695_v61 = vadd.f32 %v6694_v7, %v8816_v33  ;;  %6153 = vmatmul.mubr.f32.gmra.mrb[118].mxu0 %v3634_v39  ;;  %v3636_v3 = vmax.f32 %v3604_v25, 0.0 }
 0x36c   : > { %v6697_v40 = vadd.f32 %v6696_v35, %v8819_v5  ;;  %v6003_v48 = vpop.f32.mrb[18].mxu1  ;;  %v3635_v16 = vmax.f32 %v3603_v15, 0.0  ;;  %6641 = vmatpush3.bf16.msra.mxu0 %v6638_v58 }
 0x36d   : > { %v6698_v47 = vadd.f32 %v6003_v48, %v8711_v36  ;;  %v3200_v26 = vpop.f32.mrb[19].mxu1  ;;  %v3606_v4 = vadd.f32 %v6695_v61, %v8929_v53  ;;  %6643 = vmatprep.subr.bf16.mxu0 %v6642_v10 }
 0x36e   : > { %v6700_v18 = vadd.f32 %v3200_v26, %v8713_v59  ;;  %6155 = vmatprep.mubr.f32.mxu0 %v3635_v16  ;;  %v3605_v0 = vadd.f32 %v6697_v40, %v8929_v53  ;;  %v9543_v40 = vld [vmem:[#allocation28_spill] sm:$0xff] }
 0x36f   : > { %v6699_v33 = vadd.f32 %v6698_v47, %v8822_v22  ;;  %6156 = vmatmul.mubr.f32.gmra.mrb[120].mxu0 %v3636_v3  ;;  %v3638_v44 = vmax.f32 %v3606_v4, 0.0  ;;  %v9544_v4 = vld [vmem:[#allocation30_spill] sm:$0xff] }
 0x370   : > { %v6701_v5 = vadd.f32 %v6700_v18, %v8825_v52  ;;  %v3637_v8 = vmax.f32 %v3605_v0, 0.0  ;;  %6645 = vmatpush3.bf16.msra.mxu0 %v6642_v10  ;;  %v9542_v10 = vld [vmem:[#allocation26_spill] sm:$0xff] }
 0x371   : > { %v3608_v36 = vadd.f32 %v6699_v33, %v8929_v53 }
 0x372   : > { %6158 = vmatprep.mubr.f32.mxu0 %v3637_v8  ;;  %v3607_v60 = vadd.f32 %v6701_v5, %v8929_v53  ;;  %v9545_v5 = vld [vmem:[#allocation33_spill] sm:$0xff] }
 0x373   : > { %6159 = vmatmul.mubr.f32.gmra.mrb[122].mxu0 %v3638_v44  ;;  %v3640_v34 = vmax.f32 %v3608_v36, 0.0 }
 0x374   : > { %v3639_v20 = vmax.f32 %v3607_v60, 0.0 }
 0x376   : > { %6161 = vmatprep.mubr.f32.mxu0 %v3639_v20 }
 0x377   : > { %6162 = vmatmul.mubr.f32.gmra.mrb[124].mxu0 %v3640_v34 }
 0x388   : > { %v6086_v59 = vpop.f32.mrb[20].mxu1 }
 0x389   : > { %v6702_v11 = vadd.f32 %v6086_v59, %v8717_v9  ;;  %v3491_v22 = vpop.f32.mrb[21].mxu1  ;;  %v9546_v59 = vld [vmem:[#allocation34_spill] sm:$0xff] }
 0x38a   : > { %v6703_v41 = vadd.f32 %v3491_v22, %v8719_v21  ;;  %v9548_v22 = vld [vmem:[#allocation38_spill] sm:$0xff] }
 0x38b   : > { %v3610_v52 = vadd.f32 %v6702_v11, %v8929_v53  ;;  %v9547_v11 = vld [vmem:[#allocation36_spill] sm:$0xff] }
 0x38c   : > { %v3609_v45 = vadd.f32 %v6703_v41, %v8929_v53  ;;  %v6089_v29 = vpop.f32.mrb[22].mxu1  ;;  %v9549_v41 = vld [vmem:[#allocation42_spill] sm:$0xff] }
 0x38d   : > { %v6704_v62 = vadd.f32 %v6089_v29, %v8723_v2  ;;  %v3501_v32 = vpop.f32.mrb[23].mxu1  ;;  %v3642_v46 = vmax.f32 %v3610_v52, 0.0  ;;  %v9550_v52 = vld [vmem:[#allocation43_spill] sm:$0xff]  ;;  %v7079_v29 = vld [vmem:[%s7301_s29 + $0xc0] sm:$0xff] }
 0x38e   : > { %v3641_v27 = vmax.f32 %v3609_v45, 0.0  ;;  %v6705_v12 = vadd.f32 %v3501_v32, %v8725_v56  ;;  %v9552_v45 = vld [vmem:[#allocation41_spill] sm:$0xff]  ;;  %v7080_v32 = vld [vmem:[%s7301_s29 + $0xc8] sm:$0xff] }
 0x38f   : > { %v3612_v30 = vadd.f32 %v6704_v62, %v8929_v53  ;;  %v3984_v62 = vrot.slane %v7079_v29, 1  ;;  %v7104_v29 = vld [vmem:[%s7301_s29 + $0x188] sm:$0xff] }
 0x390   : > { %v3611_v42 = vadd.f32 %v6705_v12, %v8929_v53  ;;  %v6092_v9 = vpop.f32.mrb[24].mxu1  ;;  %6164 = vmatprep.mubr.f32.mxu0 %v3641_v27  ;;  %v3985_v27 = vrot.slane %v7080_v32, 1  ;;  %v7081_v12 = vld [vmem:[%s7301_s29 + $0xd0] sm:$0xff] }
 0x391   : > { %v6706_v21 = vadd.f32 %v6092_v9, %v9538_v50  ;;  %v3511_v57 = vpop.f32.mrb[25].mxu1  ;;  %6165 = vmatmul.mubr.f32.gmra.mrb[126].mxu0 %v3642_v46  ;;  %v3644_v54 = vmax.f32 %v3612_v30, 0.0  ;;  %v3987_v46 = vrot.slane %v7081_v12, 1  ;;  %v7083_v30 = vld [vmem:[%s7301_s29 + $0xe0] sm:$0xff]  ;;  %v7085_v50 = vld [vmem:[%s7301_s29 + $0xf0] sm:$0xff] }
 0x392   : > { %v3643_v13 = vmax.f32 %v3611_v42, 0.0  ;;  %v6707_v58 = vadd.f32 %v3511_v57, %v9539_v31  ;;  %v3986_v42 = vsel %vm937_vm2, %v3984_v62, %v3985_v27  ;;  %v7087_v31 = vld [vmem:[%s7301_s29 + $0x100] sm:$0xff]  ;;  %v4025_v62 = vrot.slane %v7104_v29, 1 }
 0x393   : > { %v3614_v2 = vadd.f32 %v6706_v21, %v8929_v53  ;;  %v3994_v21 = vrot.slane %v7085_v50, 1 }
 0x394   : > { %v3613_v38 = vadd.f32 %v6707_v58, %v8929_v53  ;;  %v6095_v56 = vpop.f32.mrb[26].mxu1  ;;  %6167 = vmatprep.mubr.f32.mxu0 %v3643_v13  ;;  %v3997_v58 = vrot.slane %v7087_v31, 1 }
 0x395   : > { %v6708_v28 = vadd.f32 %v6095_v56, %v9540_v1  ;;  %v3521_v17 = vpop.f32.mrb[27].mxu1  ;;  %6168 = vmatmul.mubr.f32.gmra.mrb[128].mxu0 %v3644_v54  ;;  %v3646_v7 = vmax.f32 %v3614_v2, 0.0  ;;  %v7088_v54 = vld [vmem:[%s7301_s29 + $0x108] sm:$0xff] }
 0x396   : > { %v3645_v63 = vmax.f32 %v3613_v38, 0.0  ;;  %v6709_v24 = vadd.f32 %v3521_v17, %v9541_v23  ;;  %v3999_v2 = vrot.slane %v7088_v54, 1  ;;  %v7089_v38 = vld [vmem:[%s7301_s29 + $0x110] sm:$0xff]  ;;  %v7091_v23 = vld [vmem:[%s7301_s29 + $0x120] sm:$0xff] }
 0x397   : > { %v3616_v6 = vadd.f32 %v6708_v28, %v8929_v53  ;;  %v4000_v56 = vrot.slane %v7089_v38, 1  ;;  %v7090_v28 = vld [vmem:[%s7301_s29 + $0x118] sm:$0xff] }
 0x398   : > { %v3615_v39 = vadd.f32 %v6709_v24, %v8929_v53  ;;  %v6098_v25 = vpop.f32.mrb[28].mxu1  ;;  %6170 = vmatprep.mubr.f32.mxu0 %v3645_v63  ;;  %v4002_v17 = vrot.slane %v7090_v28, 1  ;;  %v4004_v24 = vrot.slane %v7091_v23, 1 }
 0x399   : > { %v6710_v35 = vadd.f32 %v6098_v25, %v9542_v10  ;;  %v3531_v15 = vpop.f32.mrb[29].mxu1  ;;  %6171 = vmatmul.mubr.f32.gmra.mrb[130].mxu0 %v3646_v7  ;;  %v3648_v16 = vmax.f32 %v3616_v6, 0.0  ;;  %v7092_v7 = vld [vmem:[%s7301_s29 + $0x128] sm:$0xff]  ;;  %v7093_v25 = vld [vmem:[%s7301_s29 + $0x130] sm:$0xff] }
 0x39a   : > { %v3647_v61 = vmax.f32 %v3615_v39, 0.0  ;;  %v6711_v48 = vadd.f32 %v3531_v15, %v9543_v40  ;;  %v4005_v6 = vrot.slane %v7092_v7, 1  ;;  %v4001_v39 = vsel %vm937_vm2, %v3999_v2, %v4000_v56  ;;  %v7094_v15 = vld [vmem:[%s7301_s29 + $0x138] sm:$0xff]  ;;  %v7095_v40 = vld [vmem:[%s7301_s29 + $0x140] sm:$0xff] }
 0x39b   : > { %v3618_v47 = vadd.f32 %v6710_v35, %v8929_v53  ;;  %v4007_v10 = vrot.slane %v7093_v25, 1  ;;  %v4003_v35 = vsel %vm937_vm2, %v4000_v56, %v4002_v17 }
 0x39c   : > { %v3617_v26 = vadd.f32 %v6711_v48, %v8929_v53  ;;  %v6101_v3 = vpop.f32.mrb[30].mxu1  ;;  %6173 = vmatprep.mubr.f32.mxu0 %v3647_v61  ;;  %v4009_v61 = vrot.slane %v7094_v15, 1  ;;  %v4010_v48 = vrot.slane %v7095_v40, 1 }
 0x39d   : > { %v6712_v18 = vadd.f32 %v6101_v3, %v9544_v4  ;;  %v3541_v0 = vpop.f32.mrb[31].mxu1  ;;  %6174 = vmatmul.mubr.f32.gmra.mrb[132].mxu0 %v3648_v16  ;;  %v3650_v44 = vmax.f32 %v3618_v47, 0.0  ;;  %v4006_v16 = vsel %vm937_vm2, %v4004_v24, %v4005_v6  ;;  %v7096_v47 = vld [vmem:[%s7301_s29 + $0x148] sm:$0xff]  ;;  %v4008_v3 = vsel %vm937_vm2, %v4005_v6, %v4007_v10  ;;  %v7097_v4 = vld [vmem:[%s7301_s29 + $0x150] sm:$0xff] }
 0x39e   : > { %v3649_v33 = vmax.f32 %v3617_v26, 0.0  ;;  %v6713_v8 = vadd.f32 %v3541_v0, %v9545_v5  ;;  %v4012_v26 = vrot.slane %v7096_v47, 1  ;;  %v7098_v0 = vld [vmem:[%s7301_s29 + $0x158] sm:$0xff]  ;;  %v4011_v5 = vsel %vm937_vm2, %v4009_v61, %v4010_v48 }
 0x39f   : > { %v3620_v36 = vadd.f32 %v6712_v18, %v8929_v53  ;;  %v4014_v18 = vrot.slane %v7097_v4, 1 }
 0x3a0   : > { %v3619_v60 = vadd.f32 %v6713_v8, %v8929_v53  ;;  %6176 = vmatprep.mubr.f32.mxu0 %v3649_v33  ;;  %v9551_v53 = vld [vmem:[#allocation40_spill] sm:$0xff]  ;;  %v4015_v33 = vrot.slane %v7098_v0, 1  ;;  %v7099_v8 = vld [vmem:[%s7301_s29 + $0x160] sm:$0xff] }
 0x3a1   : > { %6177 = vmatmul.mubr.f32.gmra.mrb[134].mxu0 %v3650_v44  ;;  %v3652_v34 = vmax.f32 %v3620_v36, 0.0  ;;  %v4017_v44 = vrot.slane %v7099_v8, 1  ;;  %v4013_v36 = vsel %vm937_vm2, %v4010_v48, %v4012_v26 }
 0x3a2   : > { %v3651_v20 = vmax.f32 %v3619_v60, 0.0  ;;  %v7100_v60 = vld [vmem:[%s7301_s29 + $0x168] sm:$0xff] }
 0x3a4   : > { %6179 = vmatprep.mubr.f32.mxu0 %v3651_v20  ;;  %v4019_v20 = vrot.slane %v7100_v60, 1 }
 0x3a5   : > { %6180 = vmatmul.mubr.f32.gmra.mrb[136].mxu0 %v3652_v34  ;;  %v7101_v34 = vld [vmem:[%s7301_s29 + $0x170] sm:$0xff] }
 0x3a6   : > { %6214 = vmatprep.mubr.f32.mxu0 %v9546_v59  ;;  %v4020_v59 = vrot.slane %v7101_v34, 1 }
 0x3a8   : > { %v4021_v32 = vsel %vm937_vm2, %v4019_v20, %v4020_v59 }
 0x3a9   : > { %6215 = vmatmul.mubr.f32.vlgmr.msra.gmra.mrb[106].mxu0 %v9547_v11  ;;  %v4016_v11 = vsel %vm937_vm2, %v4014_v18, %v4015_v33 }
 0x3aa   : > { %6217 = vmatprep.mubr.f32.mxu0 %v9548_v22  ;;  %v7102_v22 = vld [vmem:[%s7301_s29 + $0x178] sm:$0xff] }
 0x3ad   : > { %6218 = vmatmul.mubr.f32.gmra.mrb[108].mxu0 %v9549_v41  ;;  %v4022_v41 = vrot.slane %v7102_v22, 1 }
 0x3ae   : > { %6220 = vmatprep.mubr.f32.mxu0 %v9550_v52  ;;  %v4018_v52 = vsel %vm937_vm2, %v4015_v33, %v4017_v44 }
 0x3b1   : > { %6221 = vmatmul.mubr.f32.gmra.mrb[110].mxu0 %v9551_v53  ;;  %v7103_v53 = vld [vmem:[%s7301_s29 + $0x180] sm:$0xff] }
 0x3b2   : > { %6223 = vmatprep.mubr.f32.mxu0 %v9552_v45  ;;  %v4024_v45 = vrot.slane %v7103_v53, 1 }
 0x3b5   : > { %6224 = vmatmul.mubr.f32.gmra.mrb[112].mxu0 %v8899_v51  ;;  %v7082_v51 = vld [vmem:[%s7301_s29 + $0xd8] sm:$0xff] }
 0x3b6   : > { %6226 = vmatprep.mubr.f32.mxu0 %v8904_v55  ;;  %v3989_v55 = vrot.slane %v7082_v51, 1  ;;  %v4026_v51 = vsel %vm937_vm2, %v4024_v45, %v4025_v62 }
 0x3b9   : > { %6227 = vmatmul.mubr.f32.gmra.mrb[114].mxu0 %v8908_v49  ;;  %v3990_v49 = vrot.slane %v7083_v30, 1  ;;  %v4663_v30 = vld [vmem:[%s9249_s6] ss:$0 sm:$0xff] }
 0x3ba   : > { %6229 = vmatprep.mubr.f32.mxu0 %v8913_v43  ;;  %v7084_v43 = vld [vmem:[%s7301_s29 + $0xe8] sm:$0xff] }
 0x3bb   : > { %v3992_v9 = vrot.slane %v7084_v43, 1  ;;  %v3991_v13 = vsel %vm937_vm2, %v3989_v55, %v3990_v49 }
 0x3bd   : > { %6230 = vmatmul.mubr.f32.gmra.mrb[116].mxu0 %v8917_v19  ;;  %v3988_v19 = vsel %vm937_vm2, %v3985_v27, %v3987_v46  ;;  %v7105_v27 = vld [vmem:[%s7301_s29 + $0x190] sm:$0xff]  ;;  %v4023_v46 = vsel %vm937_vm2, %v4020_v59, %v4022_v41 }
 0x3be   : > { %6232 = vmatprep.mubr.f32.mxu0 %v8920_v37  ;;  %v7086_v37 = vld [vmem:[%s7301_s29 + $0xf8] sm:$0xff]  ;;  %v4027_v12 = vrot.slane %v7105_v27, 1  ;;  %s4485_s29 = sshll.u32 %s323_s14, 8 }
 0x3bf   : > { %v3995_v57 = vrot.slane %v7086_v37, 1  ;;  %s9129_s22 = scalar_lea.vmem [#allocation2], %s4485_s29 }
 0x3c0   : > { %v4028_v55 = vsel %vm937_vm2, %v4025_v62, %v4027_v12  ;;  %s4419_s25 = sshll.u32 %s9129_s22, 4  ;;  %s9196_s25 = int_to_ptr.vmem [resolvable:$true] %s4419_s25 }
 0x3c1   : > { %6233 = vmatmul.mubr.f32.gmra.mrb[118].mxu0 %v8923_v14  ;;  %v3993_v14 = vsel %vm937_vm2, %v3990_v49, %v3992_v9  ;;  %v3996_v1 = vsel %vm937_vm2, %v3994_v21, %v3995_v57  ;;  %v3998_v63 = vsel %vm937_vm2, %v3995_v57, %v3997_v58  ;;  %v4664_v49 = vld [vmem:[%s9251_s8] ss:$0 sm:$0xff]  ;;  %s7106_s16 = scalar_lea.vmem %s9196_s25, 4096  ;;  %p7113_p0 = scmp.lt.s32.totalorder %s9196_s25, %s7111_s21 }
 0x3c2   : > { %6235 = vmatprep.mubr.f32.mxu0 %v3986_v42  ;;  %v9125_v9 = vadd.f32 %v4664_v49, %v4663_v30  ;;  %p7107_p11 = scmp.ne.s32.totalorder %s9196_s25, %s7106_s16  ;;  %p7114_p1 = scmp.lt.s32.totalorder %s7112_s23, %s7106_s16 }
 0x3c4   : > { %p7108_p12 = pnand %p7107_p11, %p7262_p5  ;;  %p7115_p2 = por %p7114_p1, %p7113_p0 }
 0x3c5   : > { %6236 = vmatmul.mubr.f32.gmra.mrb[120].mxu0 %v3988_v19 }
 0x3c6   : > { %6238 = vmatprep.mubr.f32.mxu0 %v3991_v13  ;;  %p7109_p13 = pneg %p7108_p12 }
 0x3c8   : > { %p7116_p3 = pnand %p7115_p2, %p7109_p13 }
 0x3c9   : > { %6239 = vmatmul.mubr.f32.gmra.mrb[122].mxu0 %v3993_v14 }
 0x3ca   : > { %6241 = vmatprep.mubr.f32.mxu0 %v3996_v1 }
 0x3cd   : > { %6242 = vmatmul.mubr.f32.gmra.mrb[124].mxu0 %v3998_v63 }
 0x3ce   : > { %6244 = vmatprep.mubr.f32.mxu0 %v4001_v39 }
 0x3d1   : > { %6245 = vmatmul.mubr.f32.gmra.mrb[126].mxu0 %v4003_v35 }
 0x3d2   : > { %6247 = vmatprep.mubr.f32.mxu0 %v4006_v16 }
 0x3d5   : > { %6248 = vmatmul.mubr.f32.gmra.mrb[128].mxu0 %v4008_v3 }
 0x3d6   : > { %6250 = vmatprep.mubr.f32.mxu0 %v4011_v5 }
 0x3d9   : > { %6251 = vmatmul.mubr.f32.gmra.mrb[130].mxu0 %v4013_v36 }
 0x3da   : > { %6253 = vmatprep.mubr.f32.mxu0 %v4016_v11 }
 0x3dd   : > { %6254 = vmatmul.mubr.f32.gmra.mrb[132].mxu0 %v4018_v52 }
 0x3de   : > { %6256 = vmatprep.mubr.f32.mxu0 %v4021_v32 }
 0x3e1   : > { %6257 = vmatmul.mubr.f32.gmra.mrb[134].mxu0 %v4023_v46 }
 0x3e2   : > { %6259 = vmatprep.mubr.f32.mxu0 %v4026_v51 }
 0x3e5   : > { %6260 = vmatmul.mubr.f32.gmra.mrb[136].mxu0 %v4028_v55 }
 0x47c   : > { %v6216_v42 = vpop.f32.mrb[106].mxu0 }
 0x47d   : > { %v6714_v43 = vadd.f32 %v6216_v42, %v4663_v30  ;;  %v4150_v19 = vpop.f32.mrb[107].mxu0 }
 0x47e   : > { %v6716_v50 = vadd.f32 %v4663_v30, %v4150_v19 }
 0x47f   : > { %v6715_v21 = vadd.f32 %v6714_v43, %v4664_v49 }
 0x480   : > { %v6717_v37 = vadd.f32 %v6716_v50, %v4664_v49  ;;  %v6219_v57 = vpop.f32.mrb[108].mxu0 }
 0x481   : > { %v4342_v13 = vmax.f32 %v6715_v21, 0.0  ;;  %v6719_v31 = vadd.f32 %v9125_v9, %v6219_v57  ;;  %v4160_v58 = vpop.f32.mrb[109].mxu0 }
 0x482   : > { %v4341_v14 = vmax.f32 %v6717_v37, 0.0  ;;  %v6721_v54 = vadd.f32 %v9125_v9, %v4160_v58 }
 0x483   : > { %4374 = vst [vmem:[%s9129_s22 + $0x8] sm:$0xff] %v4342_v13  ;;  %v4344_v2 = vmax.f32 %v6719_v31, 0.0 }
 0x484   : > { %4373 = vst [vmem:[%s9129_s22] sm:$0xff] %v4341_v14  ;;  %v4343_v38 = vmax.f32 %v6721_v54, 0.0  ;;  %v6222_v56 = vpop.f32.mrb[110].mxu0 }
 0x485   : > { %4376 = vst [vmem:[%s9129_s22 + $0x18] sm:$0xff] %v4344_v2  ;;  %v6723_v1 = vadd.f32 %v9125_v9, %v6222_v56  ;;  %v4170_v28 = vpop.f32.mrb[111].mxu0 }
 0x486   : > { %4375 = vst [vmem:[%s9129_s22 + $0x10] sm:$0xff] %v4343_v38  ;;  %v6725_v17 = vadd.f32 %v9125_v9, %v4170_v28 }
 0x487   : > { %v4346_v63 = vmax.f32 %v6723_v1, 0.0 }
 0x488   : > { %v4345_v23 = vmax.f32 %v6725_v17, 0.0  ;;  %v6225_v24 = vpop.f32.mrb[112].mxu0 }
 0x489   : > { %4378 = vst [vmem:[%s9129_s22 + $0x28] sm:$0xff] %v4346_v63  ;;  %v6727_v7 = vadd.f32 %v9125_v9, %v6225_v24  ;;  %v4180_v6 = vpop.f32.mrb[113].mxu0 }
 0x48a   : > { %4377 = vst [vmem:[%s9129_s22 + $0x20] sm:$0xff] %v4345_v23  ;;  %v6729_v39 = vadd.f32 %v9125_v9, %v4180_v6 }
 0x48b   : > { %v4348_v25 = vmax.f32 %v6727_v7, 0.0 }
 0x48c   : > { %v4347_v10 = vmax.f32 %v6729_v39, 0.0  ;;  %v6228_v35 = vpop.f32.mrb[114].mxu0 }
 0x48d   : > { %4380 = vst [vmem:[%s9129_s22 + $0x38] sm:$0xff] %v4348_v25  ;;  %v6731_v15 = vadd.f32 %v9125_v9, %v6228_v35  ;;  %v4190_v61 = vpop.f32.mrb[115].mxu0 }
 0x48e   : > { %4379 = vst [vmem:[%s9129_s22 + $0x30] sm:$0xff] %v4347_v10  ;;  %v6733_v40 = vadd.f32 %v9125_v9, %v4190_v61 }
 0x48f   : > { %v4350_v48 = vmax.f32 %v6731_v15, 0.0 }
 0x490   : > { %v4349_v16 = vmax.f32 %v6733_v40, 0.0  ;;  %v6231_v47 = vpop.f32.mrb[116].mxu0 }
 0x491   : > { %4382 = vst [vmem:[%s9129_s22 + $0x48] sm:$0xff] %v4350_v48  ;;  %v6735_v26 = vadd.f32 %v9125_v9, %v6231_v47  ;;  %v4200_v3 = vpop.f32.mrb[117].mxu0 }
 0x492   : > { %4381 = vst [vmem:[%s9129_s22 + $0x40] sm:$0xff] %v4349_v16  ;;  %v6737_v4 = vadd.f32 %v9125_v9, %v4200_v3 }
 0x493   : > { %v4352_v18 = vmax.f32 %v6735_v26, 0.0 }
 0x494   : > { %v4351_v0 = vmax.f32 %v6737_v4, 0.0  ;;  %v6234_v33 = vpop.f32.mrb[118].mxu0 }
 0x495   : > { %4384 = vst [vmem:[%s9129_s22 + $0x58] sm:$0xff] %v4352_v18  ;;  %v6739_v5 = vadd.f32 %v9125_v9, %v6234_v33  ;;  %v4210_v8 = vpop.f32.mrb[119].mxu0 }
 0x496   : > { %4383 = vst [vmem:[%s9129_s22 + $0x50] sm:$0xff] %v4351_v0  ;;  %v6741_v44 = vadd.f32 %v9125_v9, %v4210_v8 }
 0x497   : > { %v4354_v36 = vmax.f32 %v6739_v5, 0.0 }
 0x498   : > { %v4353_v60 = vmax.f32 %v6741_v44, 0.0  ;;  %v6237_v20 = vpop.f32.mrb[120].mxu0 }
 0x499   : > { %4386 = vst [vmem:[%s9129_s22 + $0x68] sm:$0xff] %v4354_v36  ;;  %v6743_v34 = vadd.f32 %v9125_v9, %v6237_v20  ;;  %v4220_v59 = vpop.f32.mrb[121].mxu0 }
 0x49a   : > { %4385 = vst [vmem:[%s9129_s22 + $0x60] sm:$0xff] %v4353_v60  ;;  %v6745_v11 = vadd.f32 %v9125_v9, %v4220_v59 }
 0x49b   : > { %v4356_v22 = vmax.f32 %v6743_v34, 0.0 }
 0x49c   : > { %v4355_v41 = vmax.f32 %v6745_v11, 0.0  ;;  %v6240_v52 = vpop.f32.mrb[122].mxu0 }
 0x49d   : > { %4388 = vst [vmem:[%s9129_s22 + $0x78] sm:$0xff] %v4356_v22  ;;  %v6747_v53 = vadd.f32 %v9125_v9, %v6240_v52  ;;  %v4230_v45 = vpop.f32.mrb[123].mxu0 }
 0x49e   : > { %4387 = vst [vmem:[%s9129_s22 + $0x70] sm:$0xff] %v4355_v41  ;;  %v6749_v29 = vadd.f32 %v9125_v9, %v4230_v45 }
 0x49f   : > { %v4358_v62 = vmax.f32 %v6747_v53, 0.0 }
 0x4a0   : > { %v4357_v32 = vmax.f32 %v6749_v29, 0.0  ;;  %v6243_v27 = vpop.f32.mrb[124].mxu0 }
 0x4a1   : > { %4390 = vst [vmem:[%s9129_s22 + $0x88] sm:$0xff] %v4358_v62  ;;  %v6751_v12 = vadd.f32 %v9125_v9, %v6243_v27  ;;  %v4240_v46 = vpop.f32.mrb[125].mxu0 }
 0x4a2   : > { %4389 = vst [vmem:[%s9129_s22 + $0x80] sm:$0xff] %v4357_v32  ;;  %v6753_v51 = vadd.f32 %v9125_v9, %v4240_v46 }
 0x4a3   : > { %v4360_v55 = vmax.f32 %v6751_v12, 0.0 }
 0x4a4   : > { %v4359_v30 = vmax.f32 %v6753_v51, 0.0  ;;  %v6246_v49 = vpop.f32.mrb[126].mxu0 }
 0x4a5   : > { %4392 = vst [vmem:[%s9129_s22 + $0x98] sm:$0xff] %v4360_v55  ;;  %v6755_v42 = vadd.f32 %v9125_v9, %v6246_v49  ;;  %v4250_v43 = vpop.f32.mrb[127].mxu0 }
 0x4a6   : > { %4391 = vst [vmem:[%s9129_s22 + $0x90] sm:$0xff] %v4359_v30  ;;  %v6757_v19 = vadd.f32 %v9125_v9, %v4250_v43 }
 0x4a7   : > { %v4362_v50 = vmax.f32 %v6755_v42, 0.0 }
 0x4a8   : > { %v4361_v21 = vmax.f32 %v6757_v19, 0.0  ;;  %v6249_v37 = vpop.f32.mrb[128].mxu0 }
 0x4a9   : > { %4394 = vst [vmem:[%s9129_s22 + $0xa8] sm:$0xff] %v4362_v50  ;;  %v6759_v57 = vadd.f32 %v9125_v9, %v6249_v37  ;;  %v4260_v13 = vpop.f32.mrb[129].mxu0 }
 0x4aa   : > { %4393 = vst [vmem:[%s9129_s22 + $0xa0] sm:$0xff] %v4361_v21  ;;  %v6761_v31 = vadd.f32 %v9125_v9, %v4260_v13 }
 0x4ab   : > { %v4364_v58 = vmax.f32 %v6759_v57, 0.0 }
 0x4ac   : > { %v4363_v14 = vmax.f32 %v6761_v31, 0.0  ;;  %v6252_v54 = vpop.f32.mrb[130].mxu0 }
 0x4ad   : > { %4396 = vst [vmem:[%s9129_s22 + $0xb8] sm:$0xff] %v4364_v58  ;;  %v6763_v2 = vadd.f32 %v9125_v9, %v6252_v54  ;;  %v4270_v38 = vpop.f32.mrb[131].mxu0 }
 0x4ae   : > { %4395 = vst [vmem:[%s9129_s22 + $0xb0] sm:$0xff] %v4363_v14  ;;  %v6765_v56 = vadd.f32 %v9125_v9, %v4270_v38 }
 0x4af   : > { %v4366_v1 = vmax.f32 %v6763_v2, 0.0 }
 0x4b0   : > { %v4365_v28 = vmax.f32 %v6765_v56, 0.0  ;;  %v6255_v17 = vpop.f32.mrb[132].mxu0 }
 0x4b1   : > { %4398 = vst [vmem:[%s9129_s22 + $0xc8] sm:$0xff] %v4366_v1  ;;  %v6767_v63 = vadd.f32 %v9125_v9, %v6255_v17  ;;  %v4280_v23 = vpop.f32.mrb[133].mxu0 }
 0x4b2   : > { %4397 = vst [vmem:[%s9129_s22 + $0xc0] sm:$0xff] %v4365_v28  ;;  %v6769_v24 = vadd.f32 %v9125_v9, %v4280_v23 }
 0x4b3   : > { %v4368_v7 = vmax.f32 %v6767_v63, 0.0 }
 0x4b4   : > { %v4367_v6 = vmax.f32 %v6769_v24, 0.0  ;;  %v6258_v39 = vpop.f32.mrb[134].mxu0 }
 0x4b5   : > { %4400 = vst [vmem:[%s9129_s22 + $0xd8] sm:$0xff] %v4368_v7  ;;  %v6771_v25 = vadd.f32 %v9125_v9, %v6258_v39  ;;  %v4290_v10 = vpop.f32.mrb[135].mxu0 }
 0x4b6   : > { %4399 = vst [vmem:[%s9129_s22 + $0xd0] sm:$0xff] %v4367_v6  ;;  %v6773_v35 = vadd.f32 %v9125_v9, %v4290_v10 }
 0x4b7   : > { %v4370_v15 = vmax.f32 %v6771_v25, 0.0 }
 0x4b8   : > { %v4369_v61 = vmax.f32 %v6773_v35, 0.0  ;;  %v6261_v40 = vpop.f32.mrb[136].mxu0 }
 0x4b9   : > { %4402 = vst [vmem:[%s9129_s22 + $0xe8] sm:$0xff] %v4370_v15  ;;  %v6775_v48 = vadd.f32 %v9125_v9, %v6261_v40  ;;  %v4300_v16 = vpop.f32.mrb[137].mxu0 }
 0x4ba   : > { %4401 = vst [vmem:[%s9129_s22 + $0xe0] sm:$0xff] %v4369_v61  ;;  %v6777_v47 = vadd.f32 %v9125_v9, %v4300_v16 }
 0x4bb   : > { %v4372_v26 = vmax.f32 %v6775_v48, 0.0 }
 0x4bc   : > { %v4371_v3 = vmax.f32 %v6777_v47, 0.0 }
 0x4bd   : > { %4404 = vst [vmem:[%s9129_s22 + $0xf8] sm:$0xff] %v4372_v26 }
 0x4be   : > { %4403 = vst [vmem:[%s9129_s22 + $0xf0] sm:$0xff] %v4371_v3 }
 0x4bf   : > { %7119 = shalt.err (!%p7116_p3)
}
 0x4c0   : > { %s7120_s14 = scalar_lea.hbm %s9194_s28, 4096  ;;  %s7124_s24 = scalar_lea.hbm %s9252_s9, 8192 }
 0x4c1   : > { %p7121_p4 = scmp.ne.s32.totalorder %s9194_s28, %s7120_s14  ;;  %p7125_p9 = scmp.lt.u32.totalorder %s9194_s28, %s9252_s9 }
 0x4c2   : > { %p7126_p10 = scmp.lt.u32.totalorder %s7124_s24, %s7120_s14  ;;  %p7128_p12 = scmp.lt.u32.totalorder %s7120_s14, %s9194_s28 }
 0x4c3   : > { %p7122_p7 = pnand %p7121_p4, %p7262_p5 }
 0x4c4   : > { %p7127_p11 = por %p7126_p10, %p7125_p9 }
 0x4c5   : > { %p7123_p8 = pneg %p7122_p7 }
 0x4c6   : > { %p7129_p13 = por %p7128_p12, %p7127_p11 }
 0x4c8   : > { %p7130_p0 = pnand %p7129_p13, %p7123_p8 }
 0x4ca   : > { %7133 = shalt.err (!%p7130_p0)
}
 0x4cb   : > { %s7172_s16 = smov 128   ;;  %s7173_s17 = smov 8  }
 0x4cc   : > { %7015 = dma.vmem_to_hbm [thread:$0]  (%p7262_p5), %s9196_s25, 4096, %s9194_s28, %s9202_s13, %s7172_s16, %s7172_s16, %s7173_s17  }
 0x4cd PF: > { %p7021_p1 = scmp.ge.s32.totalorder %s7168_s12, 2  ;;  %s4434_s21 = sand.u32 1, %s7156_s30  }
 0x4ce   : > { %s4435_s23 = scalar_lea.sflag [#allocation3], %s4434_s21 }
 0x4cf   : > { %p7018_p2 = pnand %p7021_p1, %p7266_p6 }
 0x4d1   : > { %7151 = dma.done.wait (!%p7018_p2), %s4435_s23, 4096  }
 0x4d2   : > { %7153 = vsyncadd (!%p7018_p2), %s4435_s23, 4294963200  ;;  %p19_p3 = scmp.ge.s32.totalorder %s7249_s15, 4   ;;  %s9553_s30 = smov %s7160_s10 }
 0x4d3   : > { %s9554_s10 = smov %s7164_s11  ;;  %s9555_s11 = smov %s7260_s18 }
 0x4d4   : > { %s9556_s12 = smov %s7249_s15  ;;  %21 = sbr.rel (!%p19_p3) target bundleno = 3 (0x3), region = 99 }
 0x4db   :  { %4440 = vsyncpa [#allocation3], 1 }
 0x4dc   :  { %4442 = vsyncpa [#allocation3 + $0x1], 1 }

</bundles_post_ra>
